<compile_context>
chip_gen: v6e
topology: v6e:2x2x1
jax: 0.10.0
libtpu: 0.0.40
codegen_flags: <defaults>
</compile_context>

<pallas_src>
import numpy as np

import jax
import jax.numpy as jnp
from jax.experimental import pallas as pl
from jax.experimental.pallas import tpu as pltpu


_PREP_ORDER = ("t1", "b1", "se1", "so1", "t2", "b2", "se2", "so2",
               "w1", "bf1", "sfc", "w2", "bf2", "w3", "bf3")


# ----------------------------------------------------------------------------
# Fused LeNet kernel (IM images per grid step, stacked along sublanes)
# ----------------------------------------------------------------------------
def _lenet_kernel(x_ref, t1_ref, b1_ref, se1_ref, so1_ref, t2_ref, b2_ref,
                  se2_ref, so2_ref, w1_ref, bf1_ref, sfc_ref, w2_ref, bf2_ref,
                  w3_ref, bf3_ref, out_ref):
    im = out_ref.shape[0]
    v1 = im * 28 - 4          # rows of the stacked conv1 accumulator
    v2 = im * 12 - 4          # rows of the stacked conv2 accumulator

    def mm(a, b):
        return jnp.dot(a, b, preferred_element_type=jnp.float32)

    # ---- conv1 (1->6, 5x5) + bias + ReLU + 2x2 max-pool ---------------------
    # Even output columns live in lanes [0,72), odd ones in [128,200); the sum
    # over the 5 vertical kernel offsets uses row-shifted windows of the
    # stacked input (image stride 28 along sublanes, rows >=24 per image are
    # never selected by the pooling matrices).
    acc = mm(x_ref[0:v1, :], t1_ref[0])
    for di in range(1, 5):
        acc = acc + mm(x_ref[di:di + v1, :], t1_ref[di])
    # Horizontal pool (even/odd lane max) + bias + ReLU.  max/ReLU commute, so
    # this equals PyTorch's relu-then-pool exactly.
    z = jnp.maximum(jnp.maximum(acc[:, :128], acc[:, 128:]) + b1_ref[...], 0.0)
    # Vertical pool: 0/1 row-selection matmuls (even rows / odd rows) + max.
    p1 = jnp.maximum(mm(se1_ref[...], z), mm(so1_ref[...], z))       # (im*12, 128)

    # ---- conv2 (6->16, 5x5) + bias + ReLU + 2x2 max-pool --------------------
    acc = mm(p1[0:v2, :], t2_ref[0])
    for di in range(1, 5):
        acc = acc + mm(p1[di:di + v2, :], t2_ref[di])
    z = jnp.maximum(jnp.maximum(acc[:, :128], acc[:, 128:]) + b2_ref[...], 0.0)
    p2 = jnp.maximum(mm(se2_ref[...], z), mm(so2_ref[...], z))       # (im*4, 128)

    # ---- fc1 (256->120) + ReLU; PyTorch's NCHW flatten folded into 4 weight
    # blocks, one per pooled row.  sfc[r] gathers row m*4+r of every image.
    h = mm(mm(sfc_ref[0], p2), w1_ref[0])
    for r in range(1, 4):
        h = h + mm(mm(sfc_ref[r], p2), w1_ref[r])
    h = jnp.maximum(h + bf1_ref[...], 0.0)                           # (im, 120)

    # ---- fc2 (120->84) + ReLU, fc3 (84->10, zero-padded to 128 lanes) -------
    h = jnp.maximum(mm(h, w2_ref[...]) + bf2_ref[...], 0.0)          # (im, 84)
    out_ref[...] = mm(h, w3_ref[...]) + bf3_ref[...]                 # (im, 128)


# ----------------------------------------------------------------------------
# One-time (outside jit) weight repacking
# ----------------------------------------------------------------------------
def _conv_toeplitz_fused(w, w_in, k_rows):
    """Fold (Cout, Cin, 5, 5) conv weights into (5, k_rows, 256) blocks.

    Even output columns land in lanes [0, Cout*Wh), odd ones at lane offset
    128; rows beyond Cin*w_in are zero padding.
    """
    w = np.asarray(w, np.float32)
    cout, cin, kh, kw = w.shape
    w_half = (w_in - kw + 1) // 2
    assert cout * w_half <= 128 and cin * w_in <= k_rows
    t = np.zeros((kh, k_rows, 256), np.float32)
    co_idx = np.arange(cout) * w_half
    for di in range(kh):
        for ci in range(cin):
            for k in range(w_in):
                row = ci * w_in + k
                for parity, base in ((0, 0), (1, 128)):
                    for jh in range(w_half):
                        dj = k - (2 * jh + parity)
                        if 0 <= dj < kw:
                            t[di, row, base + co_idx + jh] = w[:, ci, di, dj]
    return jnp.asarray(t)


def _pool_select(im, rows_per_img, out_rows, valid_rows, parity):
    """(im*out_rows, valid_rows) 0/1 matrix picking stacked rows m*stride+2r+p."""
    s = np.zeros((im * out_rows, valid_rows), np.float32)
    for m in range(im):
        for r in range(out_rows):
            s[m * out_rows + r, m * rows_per_img + 2 * r + parity] = 1.0
    return jnp.asarray(s)


def prepare_params(params, images_per_step=4):
    """Repack PyTorch-layout LeNet params for the fused kernel (runs once)."""
    im = int(images_per_step)
    v1 = im * 28 - 4
    v2 = im * 12 - 4

    # fc1: PyTorch flattens (16, 4, 4) as co*16 + r*4 + jh; our pooled conv2
    # layout is lane = co*4 + jh, one stacked row per pooled row r.
    fc1_w = np.asarray(params["fc1_w"], np.float32)          # (120, 256)
    w1 = np.zeros((4, 128, 120), np.float32)
    for r in range(4):
        for co in range(16):
            for jh in range(4):
                w1[r, co * 4 + jh, :] = fc1_w[:, co * 16 + r * 4 + jh]

    # fc1 row-gather matrices: sfc[r, m, m*4+r] = 1.
    sfc = np.zeros((4, im, im * 4), np.float32)
    for r in range(4):
        for m in range(im):
            sfc[r, m, m * 4 + r] = 1.0

    b1 = np.zeros((1, 128), np.float32)
    b1[0, :72] = np.repeat(np.asarray(params["conv1_b"], np.float32), 12)
    b2 = np.zeros((1, 128), np.float32)
    b2[0, :64] = np.repeat(np.asarray(params["conv2_b"], np.float32), 4)

    w3 = np.zeros((84, 128), np.float32)
    w3[:, :10] = np.asarray(params["fc3_w"], np.float32).T
    b3 = np.zeros((1, 128), np.float32)
    b3[0, :10] = np.asarray(params["fc3_b"], np.float32)

    return {
        "t1": _conv_toeplitz_fused(params["conv1_w"], 28, 28),
        "b1": jnp.asarray(b1),
        "se1": _pool_select(im, 28, 12, v1, 0),
        "so1": _pool_select(im, 28, 12, v1, 1),
        "t2": _conv_toeplitz_fused(params["conv2_w"], 12, 128),
        "b2": jnp.asarray(b2),
        "se2": _pool_select(im, 12, 4, v2, 0),
        "so2": _pool_select(im, 12, 4, v2, 1),
        "w1": jnp.asarray(w1),
        "bf1": jnp.asarray(params["fc1_b"], jnp.float32).reshape(1, 120),
        "sfc": jnp.asarray(sfc),
        "w2": jnp.asarray(params["fc2_w"], jnp.float32).T,
        "bf2": jnp.asarray(params["fc2_b"], jnp.float32).reshape(1, 84),
        "w3": jnp.asarray(w3),
        "bf3": jnp.asarray(b3),
    }


# ----------------------------------------------------------------------------
# Forward pass: one fused pallas_call, grid over image groups of size IM
# ----------------------------------------------------------------------------
def lenet_forward(prep, x):
    """x: (B, 1, 28, 28) float32 NCHW. Returns logits (B, 10)."""
    B = x.shape[0]
    assert x.shape[1:] == (1, 28, 28), x.shape
    im = prep["sfc"].shape[1]                 # images per grid step (static)
    steps = -(-B // im)
    bp = steps * im

    x2 = x.reshape(B, 28, 28).astype(jnp.float32)
    if bp != B:
        x2 = jnp.pad(x2, ((0, bp - B), (0, 0), (0, 0)))
    x3 = x2.reshape(steps, im * 28, 28)

    v1 = im * 28 - 4
    v2 = im * 12 - 4
    flops_per_step = 2 * (5 * v1 * 28 * 256 + 5 * v2 * 128 * 256
                          + 2 * (im * 12 * v1 + im * 4 * v2) * 128
                          + 4 * im * (im * 4 * 128 + 128 * 120)
                          + im * 120 * 84 + im * 84 * 128)
    weight_bytes = sum(int(prep[k].size) * 4 for k in _PREP_ORDER)
    cost = pl.CostEstimate(
        flops=int(steps * flops_per_step),
        transcendentals=0,
        bytes_accessed=int(x3.size * 4 + bp * 128 * 4 + weight_bytes))

    def _const_spec(arr):
        nd = arr.ndim
        return pl.BlockSpec(arr.shape, lambda b, nd=nd: (0,) * nd)

    out = pl.pallas_call(
        _lenet_kernel,
        out_shape=jax.ShapeDtypeStruct((steps, im, 128), jnp.float32),
        grid=(steps,),
        in_specs=[pl.BlockSpec((None, im * 28, 28), lambda b: (b, 0, 0))]
                 + [_const_spec(prep[k]) for k in _PREP_ORDER],
        out_specs=pl.BlockSpec((None, im, 128), lambda b: (b, 0, 0)),
        compiler_params=pltpu.CompilerParams(
            dimension_semantics=("parallel",),
            vmem_limit_bytes=32 * 1024 * 1024),
        cost_estimate=cost,
    )(x3, *[prep[k] for k in _PREP_ORDER])

    return out.reshape(bp, 128)[:B, :10]


# ----------------------------------------------------------------------------
# LeNet parameters (deterministic, PyTorch-style U(-1/sqrt(fan_in), ...))
# ----------------------------------------------------------------------------
def init_lenet_params(key):
    def uni(k, shape, fan_in):
        bound = 1.0 / jnp.sqrt(jnp.float32(fan_in))
        return jax.random.uniform(k, shape, jnp.float32, -bound, bound)

    ks = jax.random.split(key, 10)
    return {
        "conv1_w": uni(ks[0], (6, 1, 5, 5), 1 * 5 * 5),
        "conv1_b": uni(ks[1], (6,), 1 * 5 * 5),
        "conv2_w": uni(ks[2], (16, 6, 5, 5), 6 * 5 * 5),
        "conv2_b": uni(ks[3], (16,), 6 * 5 * 5),
        "fc1_w": uni(ks[4], (120, 256), 256),
        "fc1_b": uni(ks[5], (120,), 256),
        "fc2_w": uni(ks[6], (84, 120), 120),
        "fc2_b": uni(ks[7], (84,), 120),
        "fc3_w": uni(ks[8], (10, 84), 84),
        "fc3_b": uni(ks[9], (10,), 84),
    }


# ----------------------------------------------------------------------------
# Pure-JAX reference (correctness check of the Pallas path)
# ----------------------------------------------------------------------------
def lenet_reference(params, x):
    dn = ("NCHW", "OIHW", "NCHW")

    def conv(x, w, b):
        y = jax.lax.conv_general_dilated(x, w, (1, 1), "VALID", dimension_numbers=dn)
        return jnp.maximum(y + b.reshape(1, -1, 1, 1), 0.0)

    def pool(x):
        B, C, H, W = x.shape
        return x.reshape(B, C, H // 2, 2, W // 2, 2).max(axis=(3, 5))

    x = pool(conv(x, params["conv1_w"], params["conv1_b"]))
    x = pool(conv(x, params["conv2_w"], params["conv2_b"]))
    x = x.reshape(x.shape[0], -1)
    x = jnp.maximum(x @ params["fc1_w"].T + params["fc1_b"], 0.0)
    x = jnp.maximum(x @ params["fc2_w"].T + params["fc2_b"], 0.0)
    x = x @ params["fc3_w"].T + params["fc3_b"]
    return x


if __name__ == "__main__":
    key = jax.random.PRNGKey(0)
    k_x, k_p = jax.random.split(key)

    # LeNet-5's fc_1 (256 inputs) fixes spatial size to 28x28 with 1 channel.
    B = 8
    x = jax.random.normal(k_x, (B, 1, 28, 28), dtype=jnp.float32)
    params = init_lenet_params(k_p)
    prep = prepare_params(params, images_per_step=4)   # one-time repack, 2 grid steps

    out = jax.jit(lenet_forward)(prep, x)
    out = jax.block_until_ready(out)
    assert out.shape == (B, 10), out.shape

    ref = jax.block_until_ready(lenet_reference(params, x))
    assert jnp.allclose(out, ref, atol=2e-3, rtol=2e-3), (
        f"mismatch: max abs diff = {jnp.max(jnp.abs(out - ref))}"
    )

    print("KERNEL_OK")
</pallas_src>

<mosaic_0001>
module attributes {stable_mosaic.version = 11 : i64} {
  func.func @_lenet_kernel(%arg0: i32, %arg1: memref<1x112x28xf32, #tpu.memory_space<vmem>>, %arg2: memref<5x28x256xf32, #tpu.memory_space<vmem>>, %arg3: memref<1x128xf32, #tpu.memory_space<vmem>>, %arg4: memref<48x108xf32, #tpu.memory_space<vmem>>, %arg5: memref<48x108xf32, #tpu.memory_space<vmem>>, %arg6: memref<5x128x256xf32, #tpu.memory_space<vmem>>, %arg7: memref<1x128xf32, #tpu.memory_space<vmem>>, %arg8: memref<16x44xf32, #tpu.memory_space<vmem>>, %arg9: memref<16x44xf32, #tpu.memory_space<vmem>>, %arg10: memref<4x128x120xf32, #tpu.memory_space<vmem>>, %arg11: memref<1x120xf32, #tpu.memory_space<vmem>>, %arg12: memref<4x4x16xf32, #tpu.memory_space<vmem>>, %arg13: memref<120x84xf32, #tpu.memory_space<vmem>>, %arg14: memref<1x84xf32, #tpu.memory_space<vmem>>, %arg15: memref<84x128xf32, #tpu.memory_space<vmem>>, %arg16: memref<1x128xf32, #tpu.memory_space<vmem>>, %arg17: memref<1x4x128xf32, #tpu.memory_space<vmem>>) attributes {dimension_semantics = [#tpu.dimension_semantics<parallel>], iteration_bounds = array<i64: 2>, scalar_prefetch = 0 : i64, scratch_operands = 0 : i64, tpu.core_type = #tpu.core_type<tc>, window_params = [{transform_indices = @transform_0, window_bounds = array<i64: 1, 112, 28>}, {pipeline_mode = #tpu.pipeline_mode<synchronous>, transform_indices = @transform_1, window_bounds = array<i64: 5, 28, 256>}, {pipeline_mode = #tpu.pipeline_mode<synchronous>, transform_indices = @transform_2, window_bounds = array<i64: 1, 128>}, {pipeline_mode = #tpu.pipeline_mode<synchronous>, transform_indices = @transform_3, window_bounds = array<i64: 48, 108>}, {pipeline_mode = #tpu.pipeline_mode<synchronous>, transform_indices = @transform_4, window_bounds = array<i64: 48, 108>}, {pipeline_mode = #tpu.pipeline_mode<synchronous>, transform_indices = @transform_5, window_bounds = array<i64: 5, 128, 256>}, {pipeline_mode = #tpu.pipeline_mode<synchronous>, transform_indices = @transform_6, window_bounds = array<i64: 1, 128>}, {pipeline_mode = #tpu.pipeline_mode<synchronous>, transform_indices = @transform_7, window_bounds = array<i64: 16, 44>}, {pipeline_mode = #tpu.pipeline_mode<synchronous>, transform_indices = @transform_8, window_bounds = array<i64: 16, 44>}, {pipeline_mode = #tpu.pipeline_mode<synchronous>, transform_indices = @transform_9, window_bounds = array<i64: 4, 128, 120>}, {pipeline_mode = #tpu.pipeline_mode<synchronous>, transform_indices = @transform_10, window_bounds = array<i64: 1, 120>}, {pipeline_mode = #tpu.pipeline_mode<synchronous>, transform_indices = @transform_11, window_bounds = array<i64: 4, 4, 16>}, {pipeline_mode = #tpu.pipeline_mode<synchronous>, transform_indices = @transform_12, window_bounds = array<i64: 120, 84>}, {pipeline_mode = #tpu.pipeline_mode<synchronous>, transform_indices = @transform_13, window_bounds = array<i64: 1, 84>}, {pipeline_mode = #tpu.pipeline_mode<synchronous>, transform_indices = @transform_14, window_bounds = array<i64: 84, 128>}, {pipeline_mode = #tpu.pipeline_mode<synchronous>, transform_indices = @transform_15, window_bounds = array<i64: 1, 128>}, {transform_indices = @transform_16, window_bounds = array<i64: 1, 4, 128>}]} {
    %c0 = arith.constant 0 : index
    %c0_0 = arith.constant 0 : index
    %c0_1 = arith.constant 0 : index
    %0 = vector.load %arg1[%c0, %c0_0, %c0_1] : memref<1x112x28xf32, #tpu.memory_space<vmem>>, vector<1x108x28xf32>
    %1 = vector.shape_cast %0 : vector<1x108x28xf32> to vector<108x28xf32>
    %c0_2 = arith.constant 0 : index
    %c0_3 = arith.constant 0 : index
    %c0_4 = arith.constant 0 : index
    %2 = vector.load %arg2[%c0_2, %c0_3, %c0_4] : memref<5x28x256xf32, #tpu.memory_space<vmem>>, vector<1x28x256xf32>
    %3 = vector.shape_cast %2 : vector<1x28x256xf32> to vector<28x256xf32>
    %cst = arith.constant dense<0.000000e+00> : vector<108x256xf32>
    %4 = tpu.matmul %1, %3, %cst {dimension_numbers = #tpu.dot_dimension_numbers<[1], [0], [0], [1], [0, 0, 1, 1], [], []>} : vector<108x28xf32>, vector<28x256xf32>, vector<108x256xf32> -> vector<108x256xf32>
    %c0_5 = arith.constant 0 : index
    %c1 = arith.constant 1 : index
    %c0_6 = arith.constant 0 : index
    %5 = vector.load %arg1[%c0_5, %c1, %c0_6] : memref<1x112x28xf32, #tpu.memory_space<vmem>>, vector<1x108x28xf32>
    %6 = vector.shape_cast %5 : vector<1x108x28xf32> to vector<108x28xf32>
    %c1_7 = arith.constant 1 : index
    %c0_8 = arith.constant 0 : index
    %c0_9 = arith.constant 0 : index
    %7 = vector.load %arg2[%c1_7, %c0_8, %c0_9] : memref<5x28x256xf32, #tpu.memory_space<vmem>>, vector<1x28x256xf32>
    %8 = vector.shape_cast %7 : vector<1x28x256xf32> to vector<28x256xf32>
    %cst_10 = arith.constant dense<0.000000e+00> : vector<108x256xf32>
    %9 = tpu.matmul %6, %8, %cst_10 {dimension_numbers = #tpu.dot_dimension_numbers<[1], [0], [0], [1], [0, 0, 1, 1], [], []>} : vector<108x28xf32>, vector<28x256xf32>, vector<108x256xf32> -> vector<108x256xf32>
    %10 = arith.addf %4, %9 : vector<108x256xf32>
    %c0_11 = arith.constant 0 : index
    %c2 = arith.constant 2 : index
    %c0_12 = arith.constant 0 : index
    %11 = vector.load %arg1[%c0_11, %c2, %c0_12] : memref<1x112x28xf32, #tpu.memory_space<vmem>>, vector<1x108x28xf32>
    %12 = vector.shape_cast %11 : vector<1x108x28xf32> to vector<108x28xf32>
    %c2_13 = arith.constant 2 : index
    %c0_14 = arith.constant 0 : index
    %c0_15 = arith.constant 0 : index
    %13 = vector.load %arg2[%c2_13, %c0_14, %c0_15] : memref<5x28x256xf32, #tpu.memory_space<vmem>>, vector<1x28x256xf32>
    %14 = vector.shape_cast %13 : vector<1x28x256xf32> to vector<28x256xf32>
    %cst_16 = arith.constant dense<0.000000e+00> : vector<108x256xf32>
    %15 = tpu.matmul %12, %14, %cst_16 {dimension_numbers = #tpu.dot_dimension_numbers<[1], [0], [0], [1], [0, 0, 1, 1], [], []>} : vector<108x28xf32>, vector<28x256xf32>, vector<108x256xf32> -> vector<108x256xf32>
    %16 = arith.addf %10, %15 : vector<108x256xf32>
    %c0_17 = arith.constant 0 : index
    %c3 = arith.constant 3 : index
    %c0_18 = arith.constant 0 : index
    %17 = vector.load %arg1[%c0_17, %c3, %c0_18] : memref<1x112x28xf32, #tpu.memory_space<vmem>>, vector<1x108x28xf32>
    %18 = vector.shape_cast %17 : vector<1x108x28xf32> to vector<108x28xf32>
    %c3_19 = arith.constant 3 : index
    %c0_20 = arith.constant 0 : index
    %c0_21 = arith.constant 0 : index
    %19 = vector.load %arg2[%c3_19, %c0_20, %c0_21] : memref<5x28x256xf32, #tpu.memory_space<vmem>>, vector<1x28x256xf32>
    %20 = vector.shape_cast %19 : vector<1x28x256xf32> to vector<28x256xf32>
    %cst_22 = arith.constant dense<0.000000e+00> : vector<108x256xf32>
    %21 = tpu.matmul %18, %20, %cst_22 {dimension_numbers = #tpu.dot_dimension_numbers<[1], [0], [0], [1], [0, 0, 1, 1], [], []>} : vector<108x28xf32>, vector<28x256xf32>, vector<108x256xf32> -> vector<108x256xf32>
    %22 = arith.addf %16, %21 : vector<108x256xf32>
    %c0_23 = arith.constant 0 : index
    %c4 = arith.constant 4 : index
    %c0_24 = arith.constant 0 : index
    %23 = vector.load %arg1[%c0_23, %c4, %c0_24] : memref<1x112x28xf32, #tpu.memory_space<vmem>>, vector<1x108x28xf32>
    %24 = vector.shape_cast %23 : vector<1x108x28xf32> to vector<108x28xf32>
    %c4_25 = arith.constant 4 : index
    %c0_26 = arith.constant 0 : index
    %c0_27 = arith.constant 0 : index
    %25 = vector.load %arg2[%c4_25, %c0_26, %c0_27] : memref<5x28x256xf32, #tpu.memory_space<vmem>>, vector<1x28x256xf32>
    %26 = vector.shape_cast %25 : vector<1x28x256xf32> to vector<28x256xf32>
    %cst_28 = arith.constant dense<0.000000e+00> : vector<108x256xf32>
    %27 = tpu.matmul %24, %26, %cst_28 {dimension_numbers = #tpu.dot_dimension_numbers<[1], [0], [0], [1], [0, 0, 1, 1], [], []>} : vector<108x28xf32>, vector<28x256xf32>, vector<108x256xf32> -> vector<108x256xf32>
    %28 = arith.addf %22, %27 : vector<108x256xf32>
    %29 = vector.extract_strided_slice %28 {offsets = [0, 0], sizes = [108, 128], strides = [1, 1]} : vector<108x256xf32> to vector<108x128xf32>
    %30 = vector.extract_strided_slice %28 {offsets = [0, 128], sizes = [108, 128], strides = [1, 1]} : vector<108x256xf32> to vector<108x128xf32>
    %31 = arith.maximumf %29, %30 : vector<108x128xf32>
    %c0_29 = arith.constant 0 : index
    %c0_30 = arith.constant 0 : index
    %32 = vector.load %arg3[%c0_29, %c0_30] : memref<1x128xf32, #tpu.memory_space<vmem>>, vector<1x128xf32>
    %33 = vector.broadcast %32 : vector<1x128xf32> to vector<108x128xf32>
    %34 = arith.addf %31, %33 : vector<108x128xf32>
    %cst_31 = arith.constant 0.000000e+00 : f32
    %35 = vector.broadcast %cst_31 : f32 to vector<108x128xf32>
    %36 = arith.maximumf %34, %35 : vector<108x128xf32>
    %c0_32 = arith.constant 0 : index
    %c0_33 = arith.constant 0 : index
    %37 = vector.load %arg4[%c0_32, %c0_33] : memref<48x108xf32, #tpu.memory_space<vmem>>, vector<48x108xf32>
    %cst_34 = arith.constant dense<0.000000e+00> : vector<48x128xf32>
    %38 = tpu.matmul %37, %36, %cst_34 {dimension_numbers = #tpu.dot_dimension_numbers<[1], [0], [0], [1], [0, 0, 1, 1], [], []>} : vector<48x108xf32>, vector<108x128xf32>, vector<48x128xf32> -> vector<48x128xf32>
    %c0_35 = arith.constant 0 : index
    %c0_36 = arith.constant 0 : index
    %39 = vector.load %arg5[%c0_35, %c0_36] : memref<48x108xf32, #tpu.memory_space<vmem>>, vector<48x108xf32>
    %cst_37 = arith.constant dense<0.000000e+00> : vector<48x128xf32>
    %40 = tpu.matmul %39, %36, %cst_37 {dimension_numbers = #tpu.dot_dimension_numbers<[1], [0], [0], [1], [0, 0, 1, 1], [], []>} : vector<48x108xf32>, vector<108x128xf32>, vector<48x128xf32> -> vector<48x128xf32>
    %41 = arith.maximumf %38, %40 : vector<48x128xf32>
    %42 = vector.extract_strided_slice %41 {offsets = [0, 0], sizes = [44, 128], strides = [1, 1]} : vector<48x128xf32> to vector<44x128xf32>
    %c0_38 = arith.constant 0 : index
    %c0_39 = arith.constant 0 : index
    %c0_40 = arith.constant 0 : index
    %43 = vector.load %arg6[%c0_38, %c0_39, %c0_40] : memref<5x128x256xf32, #tpu.memory_space<vmem>>, vector<1x128x256xf32>
    %44 = vector.shape_cast %43 : vector<1x128x256xf32> to vector<128x256xf32>
    %cst_41 = arith.constant dense<0.000000e+00> : vector<44x256xf32>
    %45 = tpu.matmul %42, %44, %cst_41 {dimension_numbers = #tpu.dot_dimension_numbers<[1], [0], [0], [1], [0, 0, 1, 1], [], []>} : vector<44x128xf32>, vector<128x256xf32>, vector<44x256xf32> -> vector<44x256xf32>
    %46 = vector.extract_strided_slice %41 {offsets = [1, 0], sizes = [44, 128], strides = [1, 1]} : vector<48x128xf32> to vector<44x128xf32>
    %c1_42 = arith.constant 1 : index
    %c0_43 = arith.constant 0 : index
    %c0_44 = arith.constant 0 : index
    %47 = vector.load %arg6[%c1_42, %c0_43, %c0_44] : memref<5x128x256xf32, #tpu.memory_space<vmem>>, vector<1x128x256xf32>
    %48 = vector.shape_cast %47 : vector<1x128x256xf32> to vector<128x256xf32>
    %cst_45 = arith.constant dense<0.000000e+00> : vector<44x256xf32>
    %49 = tpu.matmul %46, %48, %cst_45 {dimension_numbers = #tpu.dot_dimension_numbers<[1], [0], [0], [1], [0, 0, 1, 1], [], []>} : vector<44x128xf32>, vector<128x256xf32>, vector<44x256xf32> -> vector<44x256xf32>
    %50 = arith.addf %45, %49 : vector<44x256xf32>
    %51 = vector.extract_strided_slice %41 {offsets = [2, 0], sizes = [44, 128], strides = [1, 1]} : vector<48x128xf32> to vector<44x128xf32>
    %c2_46 = arith.constant 2 : index
    %c0_47 = arith.constant 0 : index
    %c0_48 = arith.constant 0 : index
    %52 = vector.load %arg6[%c2_46, %c0_47, %c0_48] : memref<5x128x256xf32, #tpu.memory_space<vmem>>, vector<1x128x256xf32>
    %53 = vector.shape_cast %52 : vector<1x128x256xf32> to vector<128x256xf32>
    %cst_49 = arith.constant dense<0.000000e+00> : vector<44x256xf32>
    %54 = tpu.matmul %51, %53, %cst_49 {dimension_numbers = #tpu.dot_dimension_numbers<[1], [0], [0], [1], [0, 0, 1, 1], [], []>} : vector<44x128xf32>, vector<128x256xf32>, vector<44x256xf32> -> vector<44x256xf32>
    %55 = arith.addf %50, %54 : vector<44x256xf32>
    %56 = vector.extract_strided_slice %41 {offsets = [3, 0], sizes = [44, 128], strides = [1, 1]} : vector<48x128xf32> to vector<44x128xf32>
    %c3_50 = arith.constant 3 : index
    %c0_51 = arith.constant 0 : index
    %c0_52 = arith.constant 0 : index
    %57 = vector.load %arg6[%c3_50, %c0_51, %c0_52] : memref<5x128x256xf32, #tpu.memory_space<vmem>>, vector<1x128x256xf32>
    %58 = vector.shape_cast %57 : vector<1x128x256xf32> to vector<128x256xf32>
    %cst_53 = arith.constant dense<0.000000e+00> : vector<44x256xf32>
    %59 = tpu.matmul %56, %58, %cst_53 {dimension_numbers = #tpu.dot_dimension_numbers<[1], [0], [0], [1], [0, 0, 1, 1], [], []>} : vector<44x128xf32>, vector<128x256xf32>, vector<44x256xf32> -> vector<44x256xf32>
    %60 = arith.addf %55, %59 : vector<44x256xf32>
    %61 = vector.extract_strided_slice %41 {offsets = [4, 0], sizes = [44, 128], strides = [1, 1]} : vector<48x128xf32> to vector<44x128xf32>
    %c4_54 = arith.constant 4 : index
    %c0_55 = arith.constant 0 : index
    %c0_56 = arith.constant 0 : index
    %62 = vector.load %arg6[%c4_54, %c0_55, %c0_56] : memref<5x128x256xf32, #tpu.memory_space<vmem>>, vector<1x128x256xf32>
    %63 = vector.shape_cast %62 : vector<1x128x256xf32> to vector<128x256xf32>
    %cst_57 = arith.constant dense<0.000000e+00> : vector<44x256xf32>
    %64 = tpu.matmul %61, %63, %cst_57 {dimension_numbers = #tpu.dot_dimension_numbers<[1], [0], [0], [1], [0, 0, 1, 1], [], []>} : vector<44x128xf32>, vector<128x256xf32>, vector<44x256xf32> -> vector<44x256xf32>
    %65 = arith.addf %60, %64 : vector<44x256xf32>
    %66 = vector.extract_strided_slice %65 {offsets = [0, 0], sizes = [44, 128], strides = [1, 1]} : vector<44x256xf32> to vector<44x128xf32>
    %67 = vector.extract_strided_slice %65 {offsets = [0, 128], sizes = [44, 128], strides = [1, 1]} : vector<44x256xf32> to vector<44x128xf32>
    %68 = arith.maximumf %66, %67 : vector<44x128xf32>
    %c0_58 = arith.constant 0 : index
    %c0_59 = arith.constant 0 : index
    %69 = vector.load %arg7[%c0_58, %c0_59] : memref<1x128xf32, #tpu.memory_space<vmem>>, vector<1x128xf32>
    %70 = vector.broadcast %69 : vector<1x128xf32> to vector<44x128xf32>
    %71 = arith.addf %68, %70 : vector<44x128xf32>
    %cst_60 = arith.constant 0.000000e+00 : f32
    %72 = vector.broadcast %cst_60 : f32 to vector<44x128xf32>
    %73 = arith.maximumf %71, %72 : vector<44x128xf32>
    %c0_61 = arith.constant 0 : index
    %c0_62 = arith.constant 0 : index
    %74 = vector.load %arg8[%c0_61, %c0_62] : memref<16x44xf32, #tpu.memory_space<vmem>>, vector<16x44xf32>
    %cst_63 = arith.constant dense<0.000000e+00> : vector<16x128xf32>
    %75 = tpu.matmul %74, %73, %cst_63 {dimension_numbers = #tpu.dot_dimension_numbers<[1], [0], [0], [1], [0, 0, 1, 1], [], []>} : vector<16x44xf32>, vector<44x128xf32>, vector<16x128xf32> -> vector<16x128xf32>
    %c0_64 = arith.constant 0 : index
    %c0_65 = arith.constant 0 : index
    %76 = vector.load %arg9[%c0_64, %c0_65] : memref<16x44xf32, #tpu.memory_space<vmem>>, vector<16x44xf32>
    %cst_66 = arith.constant dense<0.000000e+00> : vector<16x128xf32>
    %77 = tpu.matmul %76, %73, %cst_66 {dimension_numbers = #tpu.dot_dimension_numbers<[1], [0], [0], [1], [0, 0, 1, 1], [], []>} : vector<16x44xf32>, vector<44x128xf32>, vector<16x128xf32> -> vector<16x128xf32>
    %78 = arith.maximumf %75, %77 : vector<16x128xf32>
    %c0_67 = arith.constant 0 : index
    %c0_68 = arith.constant 0 : index
    %c0_69 = arith.constant 0 : index
    %79 = vector.load %arg12[%c0_67, %c0_68, %c0_69] : memref<4x4x16xf32, #tpu.memory_space<vmem>>, vector<1x4x16xf32>
    %80 = vector.shape_cast %79 : vector<1x4x16xf32> to vector<4x16xf32>
    %cst_70 = arith.constant dense<0.000000e+00> : vector<4x128xf32>
    %81 = tpu.matmul %80, %78, %cst_70 {dimension_numbers = #tpu.dot_dimension_numbers<[1], [0], [0], [1], [0, 0, 1, 1], [], []>} : vector<4x16xf32>, vector<16x128xf32>, vector<4x128xf32> -> vector<4x128xf32>
    %c0_71 = arith.constant 0 : index
    %c0_72 = arith.constant 0 : index
    %c0_73 = arith.constant 0 : index
    %82 = vector.load %arg10[%c0_71, %c0_72, %c0_73] : memref<4x128x120xf32, #tpu.memory_space<vmem>>, vector<1x128x120xf32>
    %83 = vector.shape_cast %82 : vector<1x128x120xf32> to vector<128x120xf32>
    %cst_74 = arith.constant dense<0.000000e+00> : vector<4x120xf32>
    %84 = tpu.matmul %81, %83, %cst_74 {dimension_numbers = #tpu.dot_dimension_numbers<[1], [0], [0], [1], [0, 0, 1, 1], [], []>} : vector<4x128xf32>, vector<128x120xf32>, vector<4x120xf32> -> vector<4x120xf32>
    %c1_75 = arith.constant 1 : index
    %c0_76 = arith.constant 0 : index
    %c0_77 = arith.constant 0 : index
    %85 = vector.load %arg12[%c1_75, %c0_76, %c0_77] : memref<4x4x16xf32, #tpu.memory_space<vmem>>, vector<1x4x16xf32>
    %86 = vector.shape_cast %85 : vector<1x4x16xf32> to vector<4x16xf32>
    %cst_78 = arith.constant dense<0.000000e+00> : vector<4x128xf32>
    %87 = tpu.matmul %86, %78, %cst_78 {dimension_numbers = #tpu.dot_dimension_numbers<[1], [0], [0], [1], [0, 0, 1, 1], [], []>} : vector<4x16xf32>, vector<16x128xf32>, vector<4x128xf32> -> vector<4x128xf32>
    %c1_79 = arith.constant 1 : index
    %c0_80 = arith.constant 0 : index
    %c0_81 = arith.constant 0 : index
    %88 = vector.load %arg10[%c1_79, %c0_80, %c0_81] : memref<4x128x120xf32, #tpu.memory_space<vmem>>, vector<1x128x120xf32>
    %89 = vector.shape_cast %88 : vector<1x128x120xf32> to vector<128x120xf32>
    %cst_82 = arith.constant dense<0.000000e+00> : vector<4x120xf32>
    %90 = tpu.matmul %87, %89, %cst_82 {dimension_numbers = #tpu.dot_dimension_numbers<[1], [0], [0], [1], [0, 0, 1, 1], [], []>} : vector<4x128xf32>, vector<128x120xf32>, vector<4x120xf32> -> vector<4x120xf32>
    %91 = arith.addf %84, %90 : vector<4x120xf32>
    %c2_83 = arith.constant 2 : index
    %c0_84 = arith.constant 0 : index
    %c0_85 = arith.constant 0 : index
    %92 = vector.load %arg12[%c2_83, %c0_84, %c0_85] : memref<4x4x16xf32, #tpu.memory_space<vmem>>, vector<1x4x16xf32>
    %93 = vector.shape_cast %92 : vector<1x4x16xf32> to vector<4x16xf32>
    %cst_86 = arith.constant dense<0.000000e+00> : vector<4x128xf32>
    %94 = tpu.matmul %93, %78, %cst_86 {dimension_numbers = #tpu.dot_dimension_numbers<[1], [0], [0], [1], [0, 0, 1, 1], [], []>} : vector<4x16xf32>, vector<16x128xf32>, vector<4x128xf32> -> vector<4x128xf32>
    %c2_87 = arith.constant 2 : index
    %c0_88 = arith.constant 0 : index
    %c0_89 = arith.constant 0 : index
    %95 = vector.load %arg10[%c2_87, %c0_88, %c0_89] : memref<4x128x120xf32, #tpu.memory_space<vmem>>, vector<1x128x120xf32>
    %96 = vector.shape_cast %95 : vector<1x128x120xf32> to vector<128x120xf32>
    %cst_90 = arith.constant dense<0.000000e+00> : vector<4x120xf32>
    %97 = tpu.matmul %94, %96, %cst_90 {dimension_numbers = #tpu.dot_dimension_numbers<[1], [0], [0], [1], [0, 0, 1, 1], [], []>} : vector<4x128xf32>, vector<128x120xf32>, vector<4x120xf32> -> vector<4x120xf32>
    %98 = arith.addf %91, %97 : vector<4x120xf32>
    %c3_91 = arith.constant 3 : index
    %c0_92 = arith.constant 0 : index
    %c0_93 = arith.constant 0 : index
    %99 = vector.load %arg12[%c3_91, %c0_92, %c0_93] : memref<4x4x16xf32, #tpu.memory_space<vmem>>, vector<1x4x16xf32>
    %100 = vector.shape_cast %99 : vector<1x4x16xf32> to vector<4x16xf32>
    %cst_94 = arith.constant dense<0.000000e+00> : vector<4x128xf32>
    %101 = tpu.matmul %100, %78, %cst_94 {dimension_numbers = #tpu.dot_dimension_numbers<[1], [0], [0], [1], [0, 0, 1, 1], [], []>} : vector<4x16xf32>, vector<16x128xf32>, vector<4x128xf32> -> vector<4x128xf32>
    %c3_95 = arith.constant 3 : index
    %c0_96 = arith.constant 0 : index
    %c0_97 = arith.constant 0 : index
    %102 = vector.load %arg10[%c3_95, %c0_96, %c0_97] : memref<4x128x120xf32, #tpu.memory_space<vmem>>, vector<1x128x120xf32>
    %103 = vector.shape_cast %102 : vector<1x128x120xf32> to vector<128x120xf32>
    %cst_98 = arith.constant dense<0.000000e+00> : vector<4x120xf32>
    %104 = tpu.matmul %101, %103, %cst_98 {dimension_numbers = #tpu.dot_dimension_numbers<[1], [0], [0], [1], [0, 0, 1, 1], [], []>} : vector<4x128xf32>, vector<128x120xf32>, vector<4x120xf32> -> vector<4x120xf32>
    %105 = arith.addf %98, %104 : vector<4x120xf32>
    %c0_99 = arith.constant 0 : index
    %c0_100 = arith.constant 0 : index
    %106 = vector.load %arg11[%c0_99, %c0_100] : memref<1x120xf32, #tpu.memory_space<vmem>>, vector<1x120xf32>
    %107 = vector.broadcast %106 : vector<1x120xf32> to vector<4x120xf32>
    %108 = arith.addf %105, %107 : vector<4x120xf32>
    %cst_101 = arith.constant 0.000000e+00 : f32
    %109 = vector.broadcast %cst_101 : f32 to vector<4x120xf32>
    %110 = arith.maximumf %108, %109 : vector<4x120xf32>
    %c0_102 = arith.constant 0 : index
    %c0_103 = arith.constant 0 : index
    %111 = vector.load %arg13[%c0_102, %c0_103] : memref<120x84xf32, #tpu.memory_space<vmem>>, vector<120x84xf32>
    %cst_104 = arith.constant dense<0.000000e+00> : vector<4x84xf32>
    %112 = tpu.matmul %110, %111, %cst_104 {dimension_numbers = #tpu.dot_dimension_numbers<[1], [0], [0], [1], [0, 0, 1, 1], [], []>} : vector<4x120xf32>, vector<120x84xf32>, vector<4x84xf32> -> vector<4x84xf32>
    %c0_105 = arith.constant 0 : index
    %c0_106 = arith.constant 0 : index
    %113 = vector.load %arg14[%c0_105, %c0_106] : memref<1x84xf32, #tpu.memory_space<vmem>>, vector<1x84xf32>
    %114 = vector.broadcast %113 : vector<1x84xf32> to vector<4x84xf32>
    %115 = arith.addf %112, %114 : vector<4x84xf32>
    %cst_107 = arith.constant 0.000000e+00 : f32
    %116 = vector.broadcast %cst_107 : f32 to vector<4x84xf32>
    %117 = arith.maximumf %115, %116 : vector<4x84xf32>
    %c0_108 = arith.constant 0 : index
    %c0_109 = arith.constant 0 : index
    %118 = vector.load %arg15[%c0_108, %c0_109] : memref<84x128xf32, #tpu.memory_space<vmem>>, vector<84x128xf32>
    %cst_110 = arith.constant dense<0.000000e+00> : vector<4x128xf32>
    %119 = tpu.matmul %117, %118, %cst_110 {dimension_numbers = #tpu.dot_dimension_numbers<[1], [0], [0], [1], [0, 0, 1, 1], [], []>} : vector<4x84xf32>, vector<84x128xf32>, vector<4x128xf32> -> vector<4x128xf32>
    %c0_111 = arith.constant 0 : index
    %c0_112 = arith.constant 0 : index
    %120 = vector.load %arg16[%c0_111, %c0_112] : memref<1x128xf32, #tpu.memory_space<vmem>>, vector<1x128xf32>
    %121 = vector.broadcast %120 : vector<1x128xf32> to vector<4x128xf32>
    %122 = arith.addf %119, %121 : vector<4x128xf32>
    %c0_113 = arith.constant 0 : index
    %c0_114 = arith.constant 0 : index
    %c0_115 = arith.constant 0 : index
    %123 = vector.load %arg17[%c0_113, %c0_114, %c0_115] : memref<1x4x128xf32, #tpu.memory_space<vmem>>, vector<1x4x128xf32>
    %124 = vector.shape_cast %123 : vector<1x4x128xf32> to vector<4x128xf32>
    %125 = vector.shape_cast %122 : vector<4x128xf32> to vector<1x4x128xf32>
    tpu.vector_store %arg17[%c0_113, %c0_114, %c0_115], %125 {strides = array<i32>} : memref<1x4x128xf32, #tpu.memory_space<vmem>>, vector<1x4x128xf32>,
    return
  }
  func.func @transform_0(%arg0: i32) -> (i32, i32, i32) {
    %c0_i32 = arith.constant 0 : i32
    %c0_i32_0 = arith.constant 0 : i32
    %c0_i32_1 = arith.constant 0 : i32
    return %arg0, %c0_i32, %c0_i32_0 : i32, i32, i32
  }
  func.func @transform_1(%arg0: i32) -> (i32, i32, i32) {
    %c0_i32 = arith.constant 0 : i32
    %c0_i32_0 = arith.constant 0 : i32
    %c0_i32_1 = arith.constant 0 : i32
    %c0_i32_2 = arith.constant 0 : i32
    return %c0_i32, %c0_i32_0, %c0_i32_1 : i32, i32, i32
  }
  func.func @transform_2(%arg0: i32) -> (i32, i32) {
    %c0_i32 = arith.constant 0 : i32
    %c0_i32_0 = arith.constant 0 : i32
    %c0_i32_1 = arith.constant 0 : i32
    return %c0_i32, %c0_i32_0 : i32, i32
  }
  func.func @transform_3(%arg0: i32) -> (i32, i32) {
    %c0_i32 = arith.constant 0 : i32
    %c0_i32_0 = arith.constant 0 : i32
    %c0_i32_1 = arith.constant 0 : i32
    return %c0_i32, %c0_i32_0 : i32, i32
  }
  func.func @transform_4(%arg0: i32) -> (i32, i32) {
    %c0_i32 = arith.constant 0 : i32
    %c0_i32_0 = arith.constant 0 : i32
    %c0_i32_1 = arith.constant 0 : i32
    return %c0_i32, %c0_i32_0 : i32, i32
  }
  func.func @transform_5(%arg0: i32) -> (i32, i32, i32) {
    %c0_i32 = arith.constant 0 : i32
    %c0_i32_0 = arith.constant 0 : i32
    %c0_i32_1 = arith.constant 0 : i32
    %c0_i32_2 = arith.constant 0 : i32
    return %c0_i32, %c0_i32_0, %c0_i32_1 : i32, i32, i32
  }
  func.func @transform_6(%arg0: i32) -> (i32, i32) {
    %c0_i32 = arith.constant 0 : i32
    %c0_i32_0 = arith.constant 0 : i32
    %c0_i32_1 = arith.constant 0 : i32
    return %c0_i32, %c0_i32_0 : i32, i32
  }
  func.func @transform_7(%arg0: i32) -> (i32, i32) {
    %c0_i32 = arith.constant 0 : i32
    %c0_i32_0 = arith.constant 0 : i32
    %c0_i32_1 = arith.constant 0 : i32
    return %c0_i32, %c0_i32_0 : i32, i32
  }
  func.func @transform_8(%arg0: i32) -> (i32, i32) {
    %c0_i32 = arith.constant 0 : i32
    %c0_i32_0 = arith.constant 0 : i32
    %c0_i32_1 = arith.constant 0 : i32
    return %c0_i32, %c0_i32_0 : i32, i32
  }
  func.func @transform_9(%arg0: i32) -> (i32, i32, i32) {
    %c0_i32 = arith.constant 0 : i32
    %c0_i32_0 = arith.constant 0 : i32
    %c0_i32_1 = arith.constant 0 : i32
    %c0_i32_2 = arith.constant 0 : i32
    return %c0_i32, %c0_i32_0, %c0_i32_1 : i32, i32, i32
  }
  func.func @transform_10(%arg0: i32) -> (i32, i32) {
    %c0_i32 = arith.constant 0 : i32
    %c0_i32_0 = arith.constant 0 : i32
    %c0_i32_1 = arith.constant 0 : i32
    return %c0_i32, %c0_i32_0 : i32, i32
  }
  func.func @transform_11(%arg0: i32) -> (i32, i32, i32) {
    %c0_i32 = arith.constant 0 : i32
    %c0_i32_0 = arith.constant 0 : i32
    %c0_i32_1 = arith.constant 0 : i32
    %c0_i32_2 = arith.constant 0 : i32
    return %c0_i32, %c0_i32_0, %c0_i32_1 : i32, i32, i32
  }
  func.func @transform_12(%arg0: i32) -> (i32, i32) {
    %c0_i32 = arith.constant 0 : i32
    %c0_i32_0 = arith.constant 0 : i32
    %c0_i32_1 = arith.constant 0 : i32
    return %c0_i32, %c0_i32_0 : i32, i32
  }
  func.func @transform_13(%arg0: i32) -> (i32, i32) {
    %c0_i32 = arith.constant 0 : i32
    %c0_i32_0 = arith.constant 0 : i32
    %c0_i32_1 = arith.constant 0 : i32
    return %c0_i32, %c0_i32_0 : i32, i32
  }
  func.func @transform_14(%arg0: i32) -> (i32, i32) {
    %c0_i32 = arith.constant 0 : i32
    %c0_i32_0 = arith.constant 0 : i32
    %c0_i32_1 = arith.constant 0 : i32
    return %c0_i32, %c0_i32_0 : i32, i32
  }
  func.func @transform_15(%arg0: i32) -> (i32, i32) {
    %c0_i32 = arith.constant 0 : i32
    %c0_i32_0 = arith.constant 0 : i32
    %c0_i32_1 = arith.constant 0 : i32
    return %c0_i32, %c0_i32_0 : i32, i32
  }
  func.func @transform_16(%arg0: i32) -> (i32, i32, i32) {
    %c0_i32 = arith.constant 0 : i32
    %c0_i32_0 = arith.constant 0 : i32
    %c0_i32_1 = arith.constant 0 : i32
    return %arg0, %c0_i32, %c0_i32_0 : i32, i32, i32
  }
}

</mosaic_0001>

<bundles_post_ra>
// kernel: lenet_forward.1
= control target key start
LH: loop header
LB: loop body
LE: loop exit
PB: predicated region body
PF: predicated region fallthrough
CT: control target
= control target key end

     0   :  { %s6281_s0 = inlined_call_operand.vmem [shape: f32[2,112,28], index: 0, kind: input, shape index: {}]   ;;  %s6282_s1 = inlined_call_operand.vmem [shape: f32[5,28,256], index: 1, kind: input, shape index: {}]   ;;  %s6283_s2 = inlined_call_operand.vmem [shape: f32[1,128], index: 2, kind: input, shape index: {}]   ;;  %s6284_s3 = inlined_call_operand.vmem [shape: f32[48,108], index: 3, kind: input, shape index: {}]   ;;  %s6285_s4 = inlined_call_operand.vmem [shape: f32[48,108], index: 4, kind: input, shape index: {}]   ;;  %s6286_s5 = inlined_call_operand.hbm [shape: f32[5,128,256], index: 5, kind: input, shape index: {}]   ;;  %s6287_s6 = inlined_call_operand.vmem [shape: f32[1,128], index: 6, kind: input, shape index: {}]   ;;  %s6288_s7 = inlined_call_operand.vmem [shape: f32[16,44], index: 7, kind: input, shape index: {}]   ;;  %s6289_s8 = inlined_call_operand.vmem [shape: f32[16,44], index: 8, kind: input, shape index: {}]   ;;  %s6290_s9 = inlined_call_operand.vmem [shape: f32[4,128,120], index: 9, kind: input, shape index: {}]   ;;  %s6291_s10 = inlined_call_operand.vmem [shape: f32[1,120], index: 10, kind: input, shape index: {}]   ;;  %s6292_s11 = inlined_call_operand.vmem [shape: f32[4,4,16], index: 11, kind: input, shape index: {}]   ;;  %s6293_s12 = inlined_call_operand.vmem [shape: f32[120,84], index: 12, kind: input, shape index: {}]   ;;  %s6294_s13 = inlined_call_operand.vmem [shape: f32[1,84], index: 13, kind: input, shape index: {}]   ;;  %s6295_s14 = inlined_call_operand.vmem [shape: f32[84,128], index: 14, kind: input, shape index: {}]   ;;  %s6296_s15 = inlined_call_operand.vmem [shape: f32[1,128], index: 15, kind: input, shape index: {}]   ;;  %s6297_s16 = inlined_call_operand.hbm [shape: f32[2,4,128], index: 16, kind: output, shape index: {}]  }
   0x1   :  { %6306 = sst [smem:[#allocation14_spill]] %s6281_s0 }
   0x2   :  { %6307 = sst [smem:[#allocation15_spill]] %s6286_s5 }
   0x3   :  { %21 = vsyncpa [#allocation3], 0 }
   0x4   :  { %22 = vsyncpa [#allocation4], 0 }
   0x5   :  { %24 = vsyncpa [#allocation4 + $0x1], 0  ;;  %s4871_s21 = smov 0   ;;  %s4873_s22 = smov 0  }
   0x6   :  { %s4875_s23 = smov 0   ;;  %s4877_s24 = smov 0  }
   0x7 LB: > { %6308 = sst [smem:[#allocation8_spill]] %s4766_s21  ;;  %s4892_s25 = sadd.s32 4294967295, %s4778_s24   ;;  %s4778_s24 = sphi %s4877_s24, %s6324_s24   ;;  %s4774_s23 = sphi %s4875_s23, %s6326_s23   ;;  %s4770_s22 = sphi %s4873_s22, %s6328_s22   ;;  %s4766_s21 = sphi %s4871_s21, %s6327_s21  }
   0x8   : > { %6309 = sst [smem:[#allocation9_spill]] %s4774_s23  ;;  %s3932_s26 = sadd.s32 4294967294, %s4778_s24  }
   0x9   : > { %6310 = sst [smem:[#allocation10_spill]] %s4778_s24  ;;  %s4896_s27 = sadd.s32 1, %s4778_s24  }
   0xa   : > { %6311 = sst [smem:[#allocation11_spill]] %s4896_s27  ;;  %s378_s28 = sadd.s32 1, %s4774_s23 }
   0xb   : > { %s375_s29 = ssub.s32 %s4778_s24, %s4896_s27  ;;  %p388_p0 = scmp.ne.s32.totalorder %s4774_s23, %s4770_s22 }
   0xc   : > { %p376_p1 = scmp.eq.s32.totalorder %s375_s29, 0  ;;  %p389_p2 = scmp.eq.s32.totalorder %s4892_s25, 1 }
   0xd   : > { %p394_p3 = scmp.ne.s32.totalorder %s4770_s22, %s4766_s21  ;;  %p395_p4 = scmp.eq.s32.totalorder %s3932_s26, 1 }
   0xe   : > { %s4907_s30 = scalar_select %p376_p1, %s4774_s23, %s378_s28  }
   0xf   : > { %p4909_p5 = por %p389_p2, %p388_p0  ;;  %p4913_p6 = por %p395_p4, %p394_p3 }
  0x10   : > { %6312 = sst [smem:[#allocation12_spill]] %s4907_s30  ;;  %p3933_p7 = scmp.ge.s32.totalorder %s4778_s24, 1 }
  0x11   : > { %s6314_s17 = scalar_select %p4913_p6, 1, 0 }
  0x12   : > { %p402_p8 = scmp.lt.s32.totalorder %s4778_s24, 3  ;;  %p4648_p9 = scmp.eq.s32.totalorder %s4892_s25, 0 }
  0x13   : > { %6315 = sst [smem:[#allocation13_spill]] %s6314_s17  ;;  %s4780_s19 = smov [#allocation2]  }
  0x14   : > { %p4920_p10 = pnand %p3933_p7, %p402_p8  ;;  %s426_s20 = sshll.u32 %s4780_s19, 4  ;;  %s427_s20 = int_to_ptr.vmem [resolvable:$true] %s426_s20 }
  0x15   : > { %s4699_s26 = scalar_lea.vmem %s427_s20, 20480  ;;  %p4707_p3 = scmp.lt.s32.totalorder %s427_s20, %s427_s20 }
  0x16   : > { %p4640_p11 = pneg %p4920_p10  ;;  %p4700_p0 = scmp.ne.s32.totalorder %s427_s20, %s4699_s26 }
  0x17   : > { %p4708_p4 = scmp.lt.s32.totalorder %s4699_s26, %s4699_s26 }
  0x18   : > { %p4641_p12 = pnand %p4648_p9, %p4640_p11 }
  0x19   : > { %p4709_p6 = por %p4708_p4, %p4707_p3 }
  0x1a   : > { %p4690_p13 = pneg %p4641_p12 }
  0x1c   : > { %p4702_p1 = pnand %p4700_p0, %p4690_p13 }
  0x1e   : > { %p4703_p2 = pneg %p4702_p1 }
  0x20   : > { %p4710_p7 = pnand %p4709_p6, %p4703_p2 }
  0x22   : > { %4713 = shalt.err (!%p4710_p7)
}
  0x23   : > { %s4781_s28 = smov 256   ;;  %s4782_s29 = smov 16  }
  0x24   : > { %s6317_s5 = sld [smem:[#allocation15_spill]] }
  0x26   : > { %480 = sbr.rel (%p4920_p10) target bundleno = 2391 (0x957), region = 84 }
  0x2a   : > { %4643 = dma.hbm_to_vmem [thread:$0]  (!%p4641_p12), %s6317_s5, 20480, %s427_s20, [#allocation3], %s4781_s28, %s4781_s28, %s4782_s29  }
  0x2b   : > { %4757 = dma.done.wait (%p4648_p9), [#allocation3], 20480  }
  0x2c   : > { %4759 = vsyncadd (%p4648_p9), [#allocation3], 4294946816  ;;  %p530_p8 = scmp.lt.s32.totalorder %s4892_s25, 1  ;;  %v6304_v0 = vmov 0.0   ;;  %vm623_vm0 = vcmask 1043456   ;;  %v3945_v5 = vld [vmem:[%s6282_s1 + $0x68] sm:$0xff] }
  0x2d   : > { %694 = vmatprep.mubr.f32.mxu0 %v6304_v0  ;;  %891 = vmatprep.mubr.f32.mxu1 %v6304_v0  ;;  %v3947_v1 = vld [vmem:[%s6282_s1 + $0x78] sm:$0xf]  ;;  %v3946_v3 = vld [vmem:[%s6282_s1 + $0x70] sm:$0xf]  ;;  %v554_v6 = vld [vmem:[%s6282_s1 + $0x28] sm:$0xff]  ;;  %s6318_s21 = sld [smem:[#allocation14_spill]] }
  0x2e   : > { %s531_s19 = scalar_select %p530_p8, %s4892_s25, 1  ;;  %v556_v2 = vld [vmem:[%s6282_s1 + $0x38] sm:$0xf]  ;;  %3948 = vmatprep.subr.msk.mxu0 %vm623_vm0, %v3947_v1  ;;  %v555_v4 = vld [vmem:[%s6282_s1 + $0x30] sm:$0xf]  ;;  %v3944_v7 = vld [vmem:[%s6282_s1 + $0x60] sm:$0xff] }
  0x2f   : > { %3964 = vmatprep.subr.msk.mxu1 %vm623_vm0, %v556_v2  ;;  %3949 = vmatpush1.msk.msra.mxu0 %vm623_vm0, %v3946_v3  ;;  %v553_v8 = vld [vmem:[%s6282_s1 + $0x20] sm:$0xff]  ;;  %v3943_v9 = vld [vmem:[%s6282_s1 + $0x58] sm:$0xff]  ;;  %v3942_v11 = vld [vmem:[%s6282_s1 + $0x50] sm:$0xff]  ;;  %vm580_vm1 = vcmask 228352   ;;  %vm1775_vm2 = vcmask 883712   ;;  %vm2088_vm3 = vcmask 1046528  }
  0x30   : > { %s4633_s23 = smul.u32 112, %s531_s19  ;;  %3965 = vmatpush1.msk.msra.mxu1 %vm623_vm0, %v555_v4  ;;  %656 = vmatprep.subr.mxu0 %v3945_v5  ;;  %v552_v10 = vld [vmem:[%s6282_s1 + $0x18] sm:$0xff]  ;;  %v551_v12 = vld [vmem:[%s6282_s1 + $0x10] sm:$0xff]  ;;  %v3941_v13 = vld [vmem:[%s6282_s1 + $0x48] sm:$0xff]  ;;  %vm2505_vm4 = vcmask 1044480   ;;  %vm2341_vm5 = vcmask 1045504  }
  0x31   : > { %853 = vmatprep.subr.mxu1 %v554_v6  ;;  %657 = vmatpush1.msra.mxu0 %v3944_v7  ;;  %v550_v14 = vld [vmem:[%s6282_s1 + $0x8] sm:$0xff]  ;;  %v3940_v15 = vld [vmem:[%s6282_s1 + $0x40] sm:$0xff]  ;;  %v3987_v21 = vld [vmem:[%s6282_s1 + $0xb8] sm:$0xf]  ;;  %vm2826_vm6 = vcmask 359424   ;;  %vm4784_vm7 = vmmov 0  }
  0x32   : > { %854 = vmatpush1.msra.mxu1 %v553_v8  ;;  %658 = vmatprep.subr.mxu0 %v3943_v9  ;;  %v549_v16 = vld [vmem:[%s6282_s1] sm:$0xff]  ;;  %v3986_v22 = vld [vmem:[%s6282_s1 + $0xb0] sm:$0xf]  ;;  %v3985_v23 = vld [vmem:[%s6282_s1 + $0xa8] sm:$0xff]  ;;  %vm2997_vm8 = vcmask 130048   ;;  %vm3676_vm9 = vcmask 982016  }
  0x33   : > { %s4984_s24 = scalar_lea.vmem %s6318_s21, %s4633_s23  ;;  %855 = vmatprep.subr.mxu1 %v552_v10  ;;  %659 = vmatpush1.msra.mxu0 %v3942_v11  ;;  %v3984_v24 = vld [vmem:[%s6282_s1 + $0xa0] sm:$0xff]  ;;  %v4011_v27 = vld [vmem:[%s6282_s1 + $0xf8] sm:$0xf]  ;;  %v4010_v28 = vld [vmem:[%s6282_s1 + $0xf0] sm:$0xf]  ;;  %vm3769_vm10 = vcmask 687104  }
  0x34   : > { %856 = vmatpush1.msra.mxu1 %v551_v12  ;;  %v557_v17 = vld [vmem:[%s4984_s24 + $0x1] sm:$0xff]  ;;  %660 = vmatprep.subr.mxu0 %v3941_v13  ;;  %v558_v19 = vld [vmem:[%s4984_s24 + $0x9] sm:$0xff]  ;;  %v559_v25 = vld [vmem:[%s4984_s24 + $0x11] sm:$0xff]  ;;  %s527_s17 = sand.u32 1, %s4770_s22   ;;  %s4136_s21 = sshll.u32 %s4892_s25, 6 }
  0x35   : > { %v535_v18 = vld [vmem:[%s4984_s24] sm:$0xff]  ;;  %857 = vmatprep.subr.mxu1 %v550_v14  ;;  %661 = vmatpush1.msra.mxu0 %v3940_v15  ;;  %v536_v20 = vld [vmem:[%s4984_s24 + $0x8] sm:$0xff]  ;;  %v537_v26 = vld [vmem:[%s4984_s24 + $0x10] sm:$0xff]  ;;  %s3938_s19 = sshll.u32 %s527_s17, 2  ;;  %s6246_s28 = scalar_lea.hbm %s6297_s16, %s4136_s21 }
  0x36   : > { %858 = vmatpush1.msra.mxu1 %v549_v16  ;;  %3950 = vmatmul.mubr.msk.f32.vlgmr.msra.gmra.mxu0 %vm580_vm1, %v557_v17  ;;  %v3983_v29 = vld [vmem:[%s6282_s1 + $0x98] sm:$0xff]  ;;  %v4009_v30 = vld [vmem:[%s6282_s1 + $0xe8] sm:$0xff]  ;;  %v3982_v31 = vld [vmem:[%s6282_s1 + $0x90] sm:$0xff]  ;;  %s529_s23 = scalar_lea.vmem [#allocation5], %s3938_s19  ;;  %s3848_s29 = scalar_lea.sflag [#allocation4], %s527_s17 }
  0x37   : > { %3966 = vmatmul.mubr.msk.f32.vlgmr.msra.gmra.mxu1 %vm580_vm1, %v535_v18  ;;  %700 = vmatprep.mubr.f32.mxu0 %v6304_v0  ;;  %v560_v32 = vld [vmem:[%s4984_s24 + $0x19] sm:$0xff]  ;;  %v3981_v35 = vld [vmem:[%s6282_s1 + $0x88] sm:$0xff]  ;;  %v4006_v40 = vld [vmem:[%s6282_s1 + $0xd0] sm:$0xff]  ;;  %s4785_s27 = smov [#allocation5]  }
  0x38   : > { %897 = vmatprep.mubr.f32.mxu1 %v6304_v0  ;;  %3988 = vmatprep.subr.msk.mxu0 %vm623_vm0, %v3987_v21  ;;  %v538_v33 = vld [vmem:[%s4984_s24 + $0x18] sm:$0xff]  ;;  %v4008_v34 = vld [vmem:[%s6282_s1 + $0xe0] sm:$0xff]  ;;  %v4005_v42 = vld [vmem:[%s6282_s1 + $0xc8] sm:$0xff]  ;;  %s4718_s25 = sshll.u32 %s4785_s27, 4  ;;  %s4719_s25 = int_to_ptr.vmem [resolvable:$false] %s4718_s25 }
  0x39   : > { %3989 = vmatpush1.msk.msra.mxu0 %vm623_vm0, %v3986_v22  ;;  %4012 = vmatprep.subr.msk.mxu1 %vm623_vm0, %v4011_v27  ;;  %v4007_v36 = vld [vmem:[%s6282_s1 + $0xd8] sm:$0xff]  ;;  %v3980_v37 = vld [vmem:[%s6282_s1 + $0x80] sm:$0xff]  ;;  %v562_v43 = vld [vmem:[%s4984_s24 + $0x29] sm:$0xff]  ;;  %s4720_s19 = scalar_lea.vmem %s4719_s25, 128 }
  0x3a   : > { %3951 = vmatmul.mubr.msk.f32.gmra.mxu0 %vm580_vm1, %v558_v19  ;;  %1073 = vmatprep.subr.mxu0 %v3985_v23  ;;  %v561_v38 = vld [vmem:[%s4984_s24 + $0x21] sm:$0xff]  ;;  %v4035_v41 = vld [vmem:[%s6282_s1 + $0x138] sm:$0xf]  ;;  %v541_v47 = vld [vmem:[%s4984_s24 + $0x30] sm:$0xff] }
  0x3b   : > { %3967 = vmatmul.mubr.msk.f32.gmra.mxu1 %vm580_vm1, %v536_v20  ;;  %706 = vmatprep.mubr.f32.mxu0 %v6304_v0  ;;  %v539_v39 = vld [vmem:[%s4984_s24 + $0x20] sm:$0xff]  ;;  %v540_v44 = vld [vmem:[%s4984_s24 + $0x28] sm:$0xff]  ;;  %v563_v46 = vld [vmem:[%s4984_s24 + $0x31] sm:$0xff] }
  0x3c   : > { %903 = vmatprep.mubr.f32.mxu1 %v6304_v0  ;;  %1074 = vmatpush1.msra.mxu0 %v3984_v24  ;;  %v4004_v45 = vld [vmem:[%s6282_s1 + $0xc0] sm:$0xff]  ;;  %v542_v49 = vld [vmem:[%s4984_s24 + $0x38] sm:$0xff]  ;;  %v566_v52 = vld [vmem:[%s4984_s24 + $0x49] sm:$0xff] }
  0x3d   : > { %4013 = vmatpush1.msk.msra.mxu1 %vm623_vm0, %v4010_v28  ;;  %1075 = vmatprep.subr.mxu0 %v3983_v29  ;;  %v564_v48 = vld [vmem:[%s4984_s24 + $0x39] sm:$0xff]  ;;  %v565_v50 = vld [vmem:[%s4984_s24 + $0x41] sm:$0xff]  ;;  %v567_v54 = vld [vmem:[%s4984_s24 + $0x51] sm:$0xff] }
  0x3e   : > { %3952 = vmatmul.mubr.msk.f32.gmra.mxu0 %vm580_vm1, %v559_v25  ;;  %1321 = vmatprep.subr.mxu1 %v4009_v30  ;;  %v543_v51 = vld [vmem:[%s4984_s24 + $0x40] sm:$0xff]  ;;  %v544_v53 = vld [vmem:[%s4984_s24 + $0x48] sm:$0xff]  ;;  %v545_v55 = vld [vmem:[%s4984_s24 + $0x50] sm:$0xff] }
  0x3f   : > { %3968 = vmatmul.mubr.msk.f32.gmra.mxu1 %vm580_vm1, %v537_v26  ;;  %712 = vmatprep.mubr.f32.mxu0 %v6304_v0  ;;  %v568_v56 = vld [vmem:[%s4984_s24 + $0x59] sm:$0xff]  ;;  %v569_v58 = vld [vmem:[%s4984_s24 + $0x61] sm:$0xff]  ;;  %v570_v60 = vld [vmem:[%s4984_s24 + $0x69] sm:$0xf] }
  0x40   : > { %909 = vmatprep.mubr.f32.mxu1 %v6304_v0  ;;  %1076 = vmatpush1.msra.mxu0 %v3982_v31  ;;  %v546_v57 = vld [vmem:[%s4984_s24 + $0x58] sm:$0xff]  ;;  %v547_v59 = vld [vmem:[%s4984_s24 + $0x60] sm:$0xff]  ;;  %v548_v61 = vld [vmem:[%s4984_s24 + $0x68] sm:$0xf] }
  0x41   : > { %1322 = vmatpush1.msra.mxu1 %v4008_v34  ;;  %1077 = vmatprep.subr.mxu0 %v3981_v35  ;;  %v976_v62 = vld [vmem:[%s4984_s24 + $0x2] sm:$0xff]  ;;  %v4034_v1 = vld [vmem:[%s6282_s1 + $0x130] sm:$0xf]  ;;  %v4031_v6 = vld [vmem:[%s6282_s1 + $0x118] sm:$0xff] }
  0x42   : > { %3953 = vmatmul.mubr.msk.f32.gmra.mxu0 %vm580_vm1, %v560_v32  ;;  %1323 = vmatprep.subr.mxu1 %v4007_v36  ;;  %v1224_v63 = vld [vmem:[%s4984_s24 + $0x3] sm:$0xff]  ;;  %v1225_v4 = vld [vmem:[%s4984_s24 + $0xb] sm:$0xff]  ;;  %v1226_v8 = vld [vmem:[%s4984_s24 + $0x13] sm:$0xff] }
  0x43   : > { %3969 = vmatmul.mubr.msk.f32.gmra.mxu1 %vm580_vm1, %v538_v33  ;;  %718 = vmatprep.mubr.f32.mxu0 %v6304_v0  ;;  %v4033_v2 = vld [vmem:[%s6282_s1 + $0x128] sm:$0xff]  ;;  %v4032_v5 = vld [vmem:[%s6282_s1 + $0x120] sm:$0xff]  ;;  %v978_v7 = vld [vmem:[%s4984_s24 + $0x12] sm:$0xff] }
  0x44   : > { %915 = vmatprep.mubr.f32.mxu1 %v6304_v0  ;;  %1078 = vmatpush1.msra.mxu0 %v3980_v37  ;;  %v977_v3 = vld [vmem:[%s4984_s24 + $0xa] sm:$0xff]  ;;  %v979_v11 = vld [vmem:[%s4984_s24 + $0x1a] sm:$0xff]  ;;  %v980_v14 = vld [vmem:[%s4984_s24 + $0x22] sm:$0xff] }
  0x45   : > { %1324 = vmatpush1.msra.mxu1 %v4006_v40  ;;  %4036 = vmatprep.subr.msk.mxu0 %vm623_vm0, %v4035_v41  ;;  %v4030_v9 = vld [vmem:[%s6282_s1 + $0x110] sm:$0xff]  ;;  %v4029_v10 = vld [vmem:[%s6282_s1 + $0x108] sm:$0xff]  ;;  %v1227_v12 = vld [vmem:[%s4984_s24 + $0x1b] sm:$0xff] }
  0x46   : > { %3954 = vmatmul.mubr.msk.f32.gmra.mxu0 %vm580_vm1, %v561_v38  ;;  %1325 = vmatprep.subr.mxu1 %v4005_v42  ;;  %v4028_v13 = vld [vmem:[%s6282_s1 + $0x100] sm:$0xff]  ;;  %v981_v16 = vld [vmem:[%s4984_s24 + $0x2a] sm:$0xff]  ;;  %v982_v18 = vld [vmem:[%s4984_s24 + $0x32] sm:$0xff] }
  0x47   : > { %3970 = vmatmul.mubr.msk.f32.gmra.mxu1 %vm580_vm1, %v539_v39  ;;  %724 = vmatprep.mubr.f32.mxu0 %v6304_v0  ;;  %v1228_v15 = vld [vmem:[%s4984_s24 + $0x23] sm:$0xff]  ;;  %v1229_v17 = vld [vmem:[%s4984_s24 + $0x2b] sm:$0xff]  ;;  %v1230_v19 = vld [vmem:[%s4984_s24 + $0x33] sm:$0xff] }
  0x48   : > { %921 = vmatprep.mubr.f32.mxu1 %v6304_v0  ;;  %1326 = vmatpush1.msra.mxu1 %v4004_v45  ;;  %v983_v20 = vld [vmem:[%s4984_s24 + $0x3a] sm:$0xff]  ;;  %v984_v22 = vld [vmem:[%s4984_s24 + $0x42] sm:$0xff]  ;;  %v985_v24 = vld [vmem:[%s4984_s24 + $0x4a] sm:$0xff] }
  0x49   : > { %v1231_v21 = vld [vmem:[%s4984_s24 + $0x3b] sm:$0xff]  ;;  %v1232_v23 = vld [vmem:[%s4984_s24 + $0x43] sm:$0xff]  ;;  %v1233_v25 = vld [vmem:[%s4984_s24 + $0x4b] sm:$0xff] }
  0x4a   : > { %3955 = vmatmul.mubr.msk.f32.gmra.mxu0 %vm580_vm1, %v562_v43  ;;  %v986_v26 = vld [vmem:[%s4984_s24 + $0x52] sm:$0xff]  ;;  %v987_v28 = vld [vmem:[%s4984_s24 + $0x5a] sm:$0xff]  ;;  %v988_v30 = vld [vmem:[%s4984_s24 + $0x62] sm:$0xff] }
  0x4b   : > { %3971 = vmatmul.mubr.msk.f32.gmra.mxu1 %vm580_vm1, %v540_v44  ;;  %730 = vmatprep.mubr.f32.mxu0 %v6304_v0  ;;  %v1234_v27 = vld [vmem:[%s4984_s24 + $0x53] sm:$0xff]  ;;  %v1235_v29 = vld [vmem:[%s4984_s24 + $0x5b] sm:$0xff]  ;;  %v1236_v31 = vld [vmem:[%s4984_s24 + $0x63] sm:$0xff] }
  0x4c   : > { %927 = vmatprep.mubr.f32.mxu1 %v6304_v0  ;;  %v989_v32 = vld [vmem:[%s4984_s24 + $0x6a] sm:$0xf]  ;;  %v1474_v36 = vld [vmem:[%s4984_s24 + $0x14] sm:$0xff]  ;;  %v1475_v37 = vld [vmem:[%s4984_s24 + $0x1c] sm:$0xff] }
  0x4d   : > { %v1237_v33 = vld [vmem:[%s4984_s24 + $0x6b] sm:$0xf]  ;;  %v1478_v40 = vld [vmem:[%s4984_s24 + $0x34] sm:$0xff]  ;;  %v1479_v41 = vld [vmem:[%s4984_s24 + $0x3c] sm:$0xff] }
  0x4e   : > { %3956 = vmatmul.mubr.msk.f32.gmra.mxu0 %vm580_vm1, %v563_v46  ;;  %v1472_v34 = vld [vmem:[%s4984_s24 + $0x4] sm:$0xff]  ;;  %v1473_v35 = vld [vmem:[%s4984_s24 + $0xc] sm:$0xff]  ;;  %v1482_v44 = vld [vmem:[%s4984_s24 + $0x54] sm:$0xff] }
  0x4f   : > { %3972 = vmatmul.mubr.msk.f32.gmra.mxu1 %vm580_vm1, %v541_v47  ;;  %736 = vmatprep.mubr.f32.mxu0 %v6304_v0  ;;  %v1476_v38 = vld [vmem:[%s4984_s24 + $0x24] sm:$0xff]  ;;  %v1477_v39 = vld [vmem:[%s4984_s24 + $0x2c] sm:$0xff]  ;;  %v1483_v45 = vld [vmem:[%s4984_s24 + $0x5c] sm:$0xff] }
  0x50   : > { %933 = vmatprep.mubr.f32.mxu1 %v6304_v0  ;;  %v1480_v42 = vld [vmem:[%s4984_s24 + $0x44] sm:$0xff]  ;;  %v1481_v43 = vld [vmem:[%s4984_s24 + $0x4c] sm:$0xff] }
  0x51   : > { %v1484_v46 = vld [vmem:[%s4984_s24 + $0x64] sm:$0xff]  ;;  %v1485_v47 = vld [vmem:[%s4984_s24 + $0x6c] sm:$0xf]  ;;  %s3861_s24 = sshll.u32 %s529_s23, 4  ;;  %s3862_s24 = int_to_ptr.vmem [resolvable:$true] %s3861_s24 }
  0x52   : > { %3957 = vmatmul.mubr.msk.f32.gmra.mxu0 %vm580_vm1, %v564_v48  ;;  %s4714_s5 = scalar_lea.vmem %s3862_s24, 64  ;;  %p4721_p11 = scmp.lt.s32.totalorder %s3862_s24, %s4719_s25 }
  0x53   : > { %3973 = vmatmul.mubr.msk.f32.gmra.mxu1 %vm580_vm1, %v542_v49  ;;  %742 = vmatprep.mubr.f32.mxu0 %v6304_v0  ;;  %p4715_p6 = scmp.ne.s32.totalorder %s3862_s24, %s4714_s5  ;;  %p4722_p12 = scmp.lt.s32.totalorder %s4720_s19, %s4714_s5 }
  0x54   : > { %939 = vmatprep.mubr.f32.mxu1 %v6304_v0 }
  0x55   : > { %p4716_p9 = pnand %p4715_p6, %p4909_p5  ;;  %p4723_p13 = por %p4722_p12, %p4721_p11 }
  0x56   : > { %3958 = vmatmul.mubr.msk.f32.gmra.mxu0 %vm580_vm1, %v565_v50 }
  0x57   : > { %3974 = vmatmul.mubr.msk.f32.gmra.mxu1 %vm580_vm1, %v543_v51  ;;  %748 = vmatprep.mubr.f32.mxu0 %v6304_v0  ;;  %p4717_p10 = pneg %p4716_p9 }
  0x58   : > { %945 = vmatprep.mubr.f32.mxu1 %v6304_v0 }
  0x59   : > { %p4724_p0 = pnand %p4723_p13, %p4717_p10 }
  0x5a   : > { %3959 = vmatmul.mubr.msk.f32.gmra.mxu0 %vm580_vm1, %v566_v52 }
  0x5b   : > { %3975 = vmatmul.mubr.msk.f32.gmra.mxu1 %vm580_vm1, %v544_v53  ;;  %754 = vmatprep.mubr.f32.mxu0 %v6304_v0 }
  0x5c   : > { %951 = vmatprep.mubr.f32.mxu1 %v6304_v0 }
  0x5e   : > { %3960 = vmatmul.mubr.msk.f32.gmra.mxu0 %vm580_vm1, %v567_v54 }
  0x5f   : > { %3976 = vmatmul.mubr.msk.f32.gmra.mxu1 %vm580_vm1, %v545_v55  ;;  %760 = vmatprep.mubr.f32.mxu0 %v6304_v0 }
  0x60   : > { %957 = vmatprep.mubr.f32.mxu1 %v6304_v0 }
  0x62   : > { %3961 = vmatmul.mubr.msk.f32.gmra.mxu0 %vm580_vm1, %v568_v56 }
  0x63   : > { %3977 = vmatmul.mubr.msk.f32.gmra.mxu1 %vm580_vm1, %v546_v57  ;;  %766 = vmatprep.mubr.f32.mxu0 %v6304_v0 }
  0x64   : > { %963 = vmatprep.mubr.f32.mxu1 %v6304_v0 }
  0x66   : > { %3962 = vmatmul.mubr.msk.f32.gmra.mxu0 %vm580_vm1, %v569_v58 }
  0x67   : > { %3978 = vmatmul.mubr.msk.f32.gmra.mxu1 %vm580_vm1, %v547_v59  ;;  %772 = vmatprep.mubr.f32.mxu0 %v6304_v0 }
  0x68   : > { %969 = vmatprep.mubr.f32.mxu1 %v6304_v0 }
  0x6a   : > { %3963 = vmatmul.mubr.msk.f32.gmra.mxu0 %vm580_vm1, %v570_v60 }
  0x6b   : > { %3979 = vmatmul.mubr.msk.f32.gmra.mxu1 %vm580_vm1, %v548_v61  ;;  %1111 = vmatprep.mubr.f32.mxu0 %v6304_v0 }
  0x6c   : > { %1359 = vmatprep.mubr.f32.mxu1 %v6304_v0 }
  0x6e   : > { %3990 = vmatmul.mubr.msk.f32.vlgmr.msra.gmra.mxu0 %vm580_vm1, %v976_v62 }
  0x6f   : > { %4014 = vmatmul.mubr.msk.f32.vlgmr.msra.gmra.mxu1 %vm580_vm1, %v1224_v63  ;;  %1117 = vmatprep.mubr.f32.mxu0 %v6304_v0 }
  0x70   : > { %1365 = vmatprep.mubr.f32.mxu1 %v6304_v0  ;;  %4037 = vmatpush1.msk.msra.mxu0 %vm623_vm0, %v4034_v1 }
  0x71   : > { %1569 = vmatprep.subr.mxu0 %v4033_v2 }
  0x72   : > { %3991 = vmatmul.mubr.msk.f32.gmra.mxu0 %vm580_vm1, %v977_v3 }
  0x73   : > { %4015 = vmatmul.mubr.msk.f32.gmra.mxu1 %vm580_vm1, %v1225_v4  ;;  %1123 = vmatprep.mubr.f32.mxu0 %v6304_v0 }
  0x74   : > { %1371 = vmatprep.mubr.f32.mxu1 %v6304_v0  ;;  %1570 = vmatpush1.msra.mxu0 %v4032_v5 }
  0x75   : > { %1571 = vmatprep.subr.mxu0 %v4031_v6 }
  0x76   : > { %3992 = vmatmul.mubr.msk.f32.gmra.mxu0 %vm580_vm1, %v978_v7 }
  0x77   : > { %4016 = vmatmul.mubr.msk.f32.gmra.mxu1 %vm580_vm1, %v1226_v8  ;;  %1129 = vmatprep.mubr.f32.mxu0 %v6304_v0 }
  0x78   : > { %1377 = vmatprep.mubr.f32.mxu1 %v6304_v0  ;;  %1572 = vmatpush1.msra.mxu0 %v4030_v9 }
  0x79   : > { %1573 = vmatprep.subr.mxu0 %v4029_v10 }
  0x7a   : > { %3993 = vmatmul.mubr.msk.f32.gmra.mxu0 %vm580_vm1, %v979_v11 }
  0x7b   : > { %4017 = vmatmul.mubr.msk.f32.gmra.mxu1 %vm580_vm1, %v1227_v12  ;;  %1135 = vmatprep.mubr.f32.mxu0 %v6304_v0 }
  0x7c   : > { %1383 = vmatprep.mubr.f32.mxu1 %v6304_v0  ;;  %1574 = vmatpush1.msra.mxu0 %v4028_v13 }
  0x7e   : > { %3994 = vmatmul.mubr.msk.f32.gmra.mxu0 %vm580_vm1, %v980_v14 }
  0x7f   : > { %4018 = vmatmul.mubr.msk.f32.gmra.mxu1 %vm580_vm1, %v1228_v15  ;;  %1141 = vmatprep.mubr.f32.mxu0 %v6304_v0 }
  0x80   : > { %1389 = vmatprep.mubr.f32.mxu1 %v6304_v0 }
  0x82   : > { %3995 = vmatmul.mubr.msk.f32.gmra.mxu0 %vm580_vm1, %v981_v16 }
  0x83   : > { %4019 = vmatmul.mubr.msk.f32.gmra.mxu1 %vm580_vm1, %v1229_v17  ;;  %1147 = vmatprep.mubr.f32.mxu0 %v6304_v0 }
  0x84   : > { %1395 = vmatprep.mubr.f32.mxu1 %v6304_v0 }
  0x86   : > { %3996 = vmatmul.mubr.msk.f32.gmra.mxu0 %vm580_vm1, %v982_v18 }
  0x87   : > { %4020 = vmatmul.mubr.msk.f32.gmra.mxu1 %vm580_vm1, %v1230_v19  ;;  %1153 = vmatprep.mubr.f32.mxu0 %v6304_v0 }
  0x88   : > { %1401 = vmatprep.mubr.f32.mxu1 %v6304_v0 }
  0x8a   : > { %3997 = vmatmul.mubr.msk.f32.gmra.mxu0 %vm580_vm1, %v983_v20 }
  0x8b   : > { %4021 = vmatmul.mubr.msk.f32.gmra.mxu1 %vm580_vm1, %v1231_v21  ;;  %1159 = vmatprep.mubr.f32.mxu0 %v6304_v0 }
  0x8c   : > { %1407 = vmatprep.mubr.f32.mxu1 %v6304_v0 }
  0x8e   : > { %3998 = vmatmul.mubr.msk.f32.gmra.mxu0 %vm580_vm1, %v984_v22 }
  0x8f   : > { %4022 = vmatmul.mubr.msk.f32.gmra.mxu1 %vm580_vm1, %v1232_v23  ;;  %1165 = vmatprep.mubr.f32.mxu0 %v6304_v0 }
  0x90   : > { %1413 = vmatprep.mubr.f32.mxu1 %v6304_v0 }
  0x92   : > { %3999 = vmatmul.mubr.msk.f32.gmra.mxu0 %vm580_vm1, %v985_v24 }
  0x93   : > { %4023 = vmatmul.mubr.msk.f32.gmra.mxu1 %vm580_vm1, %v1233_v25  ;;  %1171 = vmatprep.mubr.f32.mxu0 %v6304_v0 }
  0x94   : > { %1419 = vmatprep.mubr.f32.mxu1 %v6304_v0 }
  0x96   : > { %4000 = vmatmul.mubr.msk.f32.gmra.mxu0 %vm580_vm1, %v986_v26 }
  0x97   : > { %4024 = vmatmul.mubr.msk.f32.gmra.mxu1 %vm580_vm1, %v1234_v27  ;;  %1177 = vmatprep.mubr.f32.mxu0 %v6304_v0 }
  0x98   : > { %1425 = vmatprep.mubr.f32.mxu1 %v6304_v0 }
  0x9a   : > { %4001 = vmatmul.mubr.msk.f32.gmra.mxu0 %vm580_vm1, %v987_v28 }
  0x9b   : > { %4025 = vmatmul.mubr.msk.f32.gmra.mxu1 %vm580_vm1, %v1235_v29  ;;  %1183 = vmatprep.mubr.f32.mxu0 %v6304_v0 }
  0x9c   : > { %1431 = vmatprep.mubr.f32.mxu1 %v6304_v0 }
  0x9e   : > { %4002 = vmatmul.mubr.msk.f32.gmra.mxu0 %vm580_vm1, %v988_v30 }
  0x9f   : > { %4026 = vmatmul.mubr.msk.f32.gmra.mxu1 %vm580_vm1, %v1236_v31  ;;  %1189 = vmatprep.mubr.f32.mxu0 %v6304_v0 }
  0xa0   : > { %1437 = vmatprep.mubr.f32.mxu1 %v6304_v0 }
  0xa2   : > { %4003 = vmatmul.mubr.msk.f32.gmra.mxu0 %vm580_vm1, %v989_v32 }
  0xa3   : > { %4027 = vmatmul.mubr.msk.f32.gmra.mxu1 %vm580_vm1, %v1237_v33  ;;  %1607 = vmatprep.mubr.f32.mxu0 %v6304_v0 }
  0xa6   : > { %4038 = vmatmul.mubr.msk.f32.vlgmr.msra.gmra.mxu0 %vm580_vm1, %v1472_v34 }
  0xa7   : > { %1613 = vmatprep.mubr.f32.mxu0 %v6304_v0 }
  0xaa   : > { %4039 = vmatmul.mubr.msk.f32.gmra.mxu0 %vm580_vm1, %v1473_v35 }
  0xab   : > { %1619 = vmatprep.mubr.f32.mxu0 %v6304_v0 }
  0xae   : > { %4040 = vmatmul.mubr.msk.f32.gmra.mxu0 %vm580_vm1, %v1474_v36 }
  0xaf   : > { %1625 = vmatprep.mubr.f32.mxu0 %v6304_v0 }
  0xb2   : > { %4041 = vmatmul.mubr.msk.f32.gmra.mxu0 %vm580_vm1, %v1475_v37 }
  0xb3   : > { %1631 = vmatprep.mubr.f32.mxu0 %v6304_v0 }
  0xb6   : > { %4042 = vmatmul.mubr.msk.f32.gmra.mxu0 %vm580_vm1, %v1476_v38 }
  0xb7   : > { %1637 = vmatprep.mubr.f32.mxu0 %v6304_v0 }
  0xba   : > { %4043 = vmatmul.mubr.msk.f32.gmra.mxu0 %vm580_vm1, %v1477_v39 }
  0xbb   : > { %1643 = vmatprep.mubr.f32.mxu0 %v6304_v0 }
  0xbe   : > { %4044 = vmatmul.mubr.msk.f32.gmra.mxu0 %vm580_vm1, %v1478_v40 }
  0xbf   : > { %1649 = vmatprep.mubr.f32.mxu0 %v6304_v0 }
  0xc2   : > { %4045 = vmatmul.mubr.msk.f32.gmra.mxu0 %vm580_vm1, %v1479_v41 }
  0xc3   : > { %1655 = vmatprep.mubr.f32.mxu0 %v6304_v0 }
  0xc6   : > { %4046 = vmatmul.mubr.msk.f32.gmra.mxu0 %vm580_vm1, %v1480_v42 }
  0xc7   : > { %1661 = vmatprep.mubr.f32.mxu0 %v6304_v0 }
  0xca   : > { %4047 = vmatmul.mubr.msk.f32.gmra.mxu0 %vm580_vm1, %v1481_v43 }
  0xcb   : > { %1667 = vmatprep.mubr.f32.mxu0 %v6304_v0 }
  0xce   : > { %4048 = vmatmul.mubr.msk.f32.gmra.mxu0 %vm580_vm1, %v1482_v44 }
  0xcf   : > { %1673 = vmatprep.mubr.f32.mxu0 %v6304_v0 }
  0xd2   : > { %4049 = vmatmul.mubr.msk.f32.gmra.mxu0 %vm580_vm1, %v1483_v45 }
  0xd3   : > { %1679 = vmatprep.mubr.f32.mxu0 %v6304_v0 }
  0xd6   : > { %4050 = vmatmul.mubr.msk.f32.gmra.mxu0 %vm580_vm1, %v1484_v46 }
  0xd7   : > { %1685 = vmatprep.mubr.f32.mxu0 %v6304_v0 }
  0xda   : > { %4051 = vmatmul.mubr.msk.f32.gmra.mxu0 %vm580_vm1, %v1485_v47 }
  0xdb   : > { %2170 = vmatprep.mubr.f32.mxu0 %v6304_v0 }
  0xf6   : > { %v696_v48 = vpop.f32.mrf.mxu0 }
  0xf7   : > { %v893_v49 = vpop.f32.mrf.mxu1 }
  0xf8   : > { %v5285_v50 = vadd.f32 %v893_v49, %v696_v48  ;;  %v5287_v51 = vpop.f32.mrf.mxu0 }
  0xf9   : > { %v5289_v52 = vpop.f32.mrf.mxu1 }
  0xfa   : > { %v702_v53 = vpop.f32.mrf.mxu0 }
  0xfb   : > { %v899_v54 = vpop.f32.mrf.mxu1 }
  0xfc   : > { %v5291_v55 = vadd.f32 %v899_v54, %v702_v53  ;;  %v5293_v56 = vpop.f32.mrf.mxu0 }
  0xfd   : > { %v5295_v57 = vpop.f32.mrf.mxu1 }
  0xfe   : > { %v708_v58 = vpop.f32.mrf.mxu0 }
  0xff   : > { %v905_v59 = vpop.f32.mrf.mxu1 }
 0x100   : > { %v5297_v60 = vadd.f32 %v905_v59, %v708_v58  ;;  %v5299_v61 = vpop.f32.mrf.mxu0 }
 0x101   : > { %v5301_v62 = vpop.f32.mrf.mxu1 }
 0x102   : > { %v714_v63 = vpop.f32.mrf.mxu0 }
 0x103   : > { %v911_v1 = vpop.f32.mrf.mxu1 }
 0x104   : > { %v5303_v2 = vadd.f32 %v911_v1, %v714_v63  ;;  %v5305_v3 = vpop.f32.mrf.mxu0 }
 0x105   : > { %v5307_v4 = vpop.f32.mrf.mxu1 }
 0x106   : > { %v720_v5 = vpop.f32.mrf.mxu0 }
 0x107   : > { %v917_v6 = vpop.f32.mrf.mxu1 }
 0x108   : > { %v5309_v7 = vadd.f32 %v917_v6, %v720_v5  ;;  %v5311_v8 = vpop.f32.mrf.mxu0 }
 0x109   : > { %v5313_v9 = vpop.f32.mrf.mxu1 }
 0x10a   : > { %v726_v10 = vpop.f32.mrf.mxu0 }
 0x10b   : > { %v923_v11 = vpop.f32.mrf.mxu1 }
 0x10c   : > { %v5315_v12 = vadd.f32 %v923_v11, %v726_v10  ;;  %v5317_v13 = vpop.f32.mrf.mxu0  ;;  %v896_v10 = vadd.f32 %v5289_v52, %v5287_v51 }
 0x10d   : > { %v5319_v14 = vpop.f32.mrf.mxu1 }
 0x10e   : > { %v732_v15 = vpop.f32.mrf.mxu0 }
 0x10f   : > { %v929_v16 = vpop.f32.mrf.mxu1 }
 0x110   : > { %v5321_v17 = vadd.f32 %v929_v16, %v732_v15  ;;  %v5323_v18 = vpop.f32.mrf.mxu0 }
 0x111   : > { %v5325_v19 = vpop.f32.mrf.mxu1 }
 0x112   : > { %v738_v20 = vpop.f32.mrf.mxu0 }
 0x113   : > { %v935_v21 = vpop.f32.mrf.mxu1 }
 0x114   : > { %v5327_v22 = vadd.f32 %v935_v21, %v738_v20  ;;  %v5329_v23 = vpop.f32.mrf.mxu0 }
 0x115   : > { %v5331_v24 = vpop.f32.mrf.mxu1 }
 0x116   : > { %v744_v25 = vpop.f32.mrf.mxu0 }
 0x117   : > { %v941_v26 = vpop.f32.mrf.mxu1 }
 0x118   : > { %v5333_v27 = vadd.f32 %v941_v26, %v744_v25  ;;  %v5335_v28 = vpop.f32.mrf.mxu0 }
 0x119   : > { %v5337_v29 = vpop.f32.mrf.mxu1 }
 0x11a   : > { %v750_v30 = vpop.f32.mrf.mxu0 }
 0x11b   : > { %v947_v31 = vpop.f32.mrf.mxu1 }
 0x11c   : > { %v5339_v32 = vadd.f32 %v947_v31, %v750_v30  ;;  %v752_v33 = vpop.f32.mrf.mxu0  ;;  %v902_v30 = vadd.f32 %v5295_v57, %v5293_v56 }
 0x11d   : > { %v949_v34 = vpop.f32.mrf.mxu1 }
 0x11e   : > { %v5341_v35 = vadd.f32 %v949_v34, %v752_v33  ;;  %v756_v36 = vpop.f32.mrf.mxu0 }
 0x11f   : > { %v953_v37 = vpop.f32.mrf.mxu1 }
 0x120   : > { %v5343_v38 = vadd.f32 %v953_v37, %v756_v36  ;;  %v758_v39 = vpop.f32.mrf.mxu0 }
 0x121   : > { %v955_v40 = vpop.f32.mrf.mxu1 }
 0x122   : > { %v5345_v41 = vadd.f32 %v955_v40, %v758_v39  ;;  %v762_v42 = vpop.f32.mrf.mxu0  ;;  %v908_v39 = vadd.f32 %v5301_v62, %v5299_v61  ;;  %v920_v62 = vadd.f32 %v5313_v9, %v5311_v8 }
 0x123   : > { %v959_v43 = vpop.f32.mrf.mxu1 }
 0x124   : > { %v5347_v44 = vadd.f32 %v959_v43, %v762_v42  ;;  %v764_v45 = vpop.f32.mrf.mxu0 }
 0x125   : > { %v961_v46 = vpop.f32.mrf.mxu1 }
 0x126   : > { %v5349_v47 = vadd.f32 %v961_v46, %v764_v45  ;;  %v5351_v48 = vpop.f32.mrf.mxu0  ;;  %v914_v46 = vadd.f32 %v5307_v4, %v5305_v3 }
 0x127   : > { %v5353_v49 = vpop.f32.mrf.mxu1 }
 0x128   : > { %v5355_v53 = vpop.f32.mrf.mxu0 }
 0x129   : > { %v5357_v54 = vpop.f32.mrf.mxu1 }
 0x12a   : > { %v5359_v58 = vpop.f32.mrf.mxu0 }
 0x12b   : > { %v5361_v59 = vpop.f32.mrf.mxu1 }
 0x12c   : > { %v5363_v63 = vpop.f32.mrf.mxu0 }
 0x12d   : > { %v5365_v1 = vpop.f32.mrf.mxu1 }
 0x12e   : > { %v1113_v5 = vpop.f32.mrf.mxu0 }
 0x12f   : > { %v1361_v6 = vpop.f32.mrf.mxu1  ;;  %v1196_v11 = vadd.f32 %v1113_v5, %v5285_v50 }
 0x130   : > { %v1115_v15 = vpop.f32.mrf.mxu0 }
 0x131   : > { %v1363_v16 = vpop.f32.mrf.mxu1  ;;  %v1197_v20 = vadd.f32 %v1115_v15, %v896_v10  ;;  %v5370_v21 = vadd.f32 %v1361_v6, %v1196_v11  ;;  %v1769_v15 = vld [vmem:[%s6284_s3] sm:$0xff] }
 0x132   : > { %v1119_v25 = vpop.f32.mrf.mxu0  ;;  %4331 = vmatprep.mubr.msk.f32.mxu1 %vm1775_vm2, %v1769_v15 }
 0x133   : > { %v1367_v26 = vpop.f32.mrf.mxu1  ;;  %v1198_v31 = vadd.f32 %v1119_v25, %v5291_v55  ;;  %v5375_v33 = vadd.f32 %v1363_v16, %v1197_v20  ;;  %v926_v16 = vadd.f32 %v5319_v14, %v5317_v13 }
 0x134   : > { %v1121_v34 = vpop.f32.mrf.mxu0 }
 0x135   : > { %v1369_v36 = vpop.f32.mrf.mxu1  ;;  %v1199_v37 = vadd.f32 %v1121_v34, %v902_v30  ;;  %v5377_v51 = vadd.f32 %v1367_v26, %v1198_v31  ;;  %v932_v26 = vadd.f32 %v5325_v19, %v5323_v18 }
 0x136   : > { %v1125_v50 = vpop.f32.mrf.mxu0 }
 0x137   : > { %v1373_v52 = vpop.f32.mrf.mxu1  ;;  %v1200_v40 = vadd.f32 %v1125_v50, %v5297_v60  ;;  %v5382_v42 = vadd.f32 %v1369_v36, %v1199_v37 }
 0x138   : > { %v1127_v43 = vpop.f32.mrf.mxu0 }
 0x139   : > { %v1375_v56 = vpop.f32.mrf.mxu1  ;;  %v1201_v57 = vadd.f32 %v1127_v43, %v908_v39  ;;  %v5384_v55 = vadd.f32 %v1373_v52, %v1200_v40 }
 0x13a   : > { %v1131_v45 = vpop.f32.mrf.mxu0 }
 0x13b   : > { %v5389_v5 = vadd.f32 %v1131_v45, %v5303_v2  ;;  %v5391_v6 = vadd.f32 %v1375_v56, %v1201_v57  ;;  %v5411_v8 = vpop.f32.mrf.mxu1 }
 0x13c   : > { %v1133_v10 = vpop.f32.mrf.mxu0 }
 0x13d   : > { %v5393_v61 = vadd.f32 %v1133_v10, %v914_v46  ;;  %v5420_v31 = vpop.f32.mrf.mxu1 }
 0x13e   : > { %v1137_v60 = vpop.f32.mrf.mxu0 }
 0x13f   : > { %v5398_v11 = vadd.f32 %v1137_v60, %v5309_v7  ;;  %v5429_v37 = vpop.f32.mrf.mxu1 }
 0x140   : > { %v1139_v3 = vpop.f32.mrf.mxu0 }
 0x141   : > { %v5404_v2 = vadd.f32 %v1139_v3, %v920_v62  ;;  %v5438_v39 = vpop.f32.mrf.mxu1 }
 0x142   : > { %v1143_v4 = vpop.f32.mrf.mxu0 }
 0x143   : > { %v5409_v20 = vadd.f32 %v1143_v4, %v5315_v12  ;;  %v938_v12 = vadd.f32 %v5331_v24, %v5329_v23  ;;  %v5445_v24 = vpop.f32.mrf.mxu1 }
 0x144   : > { %v1145_v7 = vpop.f32.mrf.mxu0 }
 0x145   : > { %v5413_v9 = vadd.f32 %v1145_v7, %v926_v16  ;;  %v2081_v7 = vld [vmem:[#allocation2 + $0x1f8] sm:$0xff] }
 0x146   : > { %v1149_v25 = vpop.f32.mrf.mxu0  ;;  %2106 = vmatprep.subr.mxu0 %v2081_v7 }
 0x147   : > { %v5418_v30 = vadd.f32 %v1149_v25, %v5321_v17  ;;  %v944_v17 = vadd.f32 %v5337_v29, %v5335_v28  ;;  %v2080_v25 = vld [vmem:[#allocation2 + $0x1f0] sm:$0xff] }
 0x148   : > { %v1151_v34 = vpop.f32.mrf.mxu0  ;;  %2107 = vmatpush1.msra.mxu0 %v2080_v25  ;;  %v2071_v25 = vld [vmem:[#allocation2 + $0x1a8] sm:$0xff] }
 0x149   : > { %v5422_v36 = vadd.f32 %v1151_v34, %v932_v26 }
 0x14a   : > { %v1155_v13 = vpop.f32.mrf.mxu0 }
 0x14b   : > { %v5427_v14 = vadd.f32 %v1155_v13, %v5327_v22 }
 0x14c   : > { %v1157_v50 = vpop.f32.mrf.mxu0 }
 0x14d   : > { %v5431_v52 = vadd.f32 %v1157_v50, %v938_v12  ;;  %v2078_v12 = vld [vmem:[#allocation2 + $0x1e0] sm:$0xff]  ;;  %v2077_v50 = vld [vmem:[#allocation2 + $0x1d8] sm:$0xff] }
 0x14e   : > { %v1161_v18 = vpop.f32.mrf.mxu0 }
 0x14f   : > { %v5436_v19 = vadd.f32 %v1161_v18, %v5333_v27  ;;  %v5453_v27 = vpop.f32.mrf.mxu1 }
 0x150   : > { %v1163_v40 = vpop.f32.mrf.mxu0 }
 0x151   : > { %v5440_v43 = vadd.f32 %v1163_v40, %v944_v17  ;;  %v5461_v60 = vpop.f32.mrf.mxu1  ;;  %v2076_v17 = vld [vmem:[#allocation2 + $0x1d0] sm:$0xff] }
 0x152   : > { %v1167_v23 = vpop.f32.mrf.mxu0 }
 0x153   : > { %v5443_v22 = vadd.f32 %v1167_v23, %v5339_v32  ;;  %v2075_v23 = vld [vmem:[#allocation2 + $0x1c8] sm:$0xff] }
 0x154   : > { %v1169_v56 = vpop.f32.mrf.mxu0 }
 0x155   : > { %v5448_v57 = vadd.f32 %v1169_v56, %v5341_v35 }
 0x156   : > { %v1173_v45 = vpop.f32.mrf.mxu0 }
 0x157   : > { %v5451_v28 = vadd.f32 %v1173_v45, %v5343_v38  ;;  %v5468_v38 = vpop.f32.mrf.mxu1  ;;  %v2074_v45 = vld [vmem:[#allocation2 + $0x1c0] sm:$0xff] }
 0x158   : > { %v1175_v29 = vpop.f32.mrf.mxu0 }
 0x159   : > { %v5456_v46 = vadd.f32 %v1175_v29, %v5345_v41  ;;  %v5474_v41 = vpop.f32.mrf.mxu1 }
 0x15a   : > { %v1179_v10 = vpop.f32.mrf.mxu0 }
 0x15b   : > { %v5459_v32 = vadd.f32 %v1179_v10, %v5347_v44  ;;  %v5481_v34 = vpop.f32.mrf.mxu1 }
 0x15c   : > { %v1181_v62 = vpop.f32.mrf.mxu0 }
 0x15d   : > { %v5464_v35 = vadd.f32 %v1181_v62, %v5349_v47  ;;  %v2079_v47 = vld [vmem:[#allocation2 + $0x1e8] sm:$0xff]  ;;  %v1409_v29 = vpop.f32.mrf.mxu1  ;;  %v2073_v62 = vld [vmem:[#allocation2 + $0x1b8] sm:$0xff] }
 0x15e   : > { %v5466_v15 = vpop.f32.mrf.mxu0  ;;  %2108 = vmatprep.subr.mxu0 %v2079_v47 }
 0x15f   : > { %2109 = vmatpush1.msra.mxu0 %v2078_v12  ;;  %v1411_v12 = vpop.f32.mrf.mxu1 }
 0x160   : > { %v5470_v3 = vpop.f32.mrf.mxu0  ;;  %2110 = vmatprep.subr.mxu0 %v2077_v50 }
 0x161   : > { %2111 = vmatpush1.msra.mxu0 %v2076_v17 }
 0x162   : > { %v5472_v4 = vpop.f32.mrf.mxu0  ;;  %2112 = vmatprep.subr.mxu0 %v2075_v23  ;;  %v1451_v23 = vadd.f32 %v5420_v31, %v5393_v61 }
 0x163   : > { %2113 = vmatpush1.msra.mxu0 %v2074_v45  ;;  %v1415_v45 = vpop.f32.mrf.mxu1 }
 0x164   : > { %v5476_v16 = vpop.f32.mrf.mxu0  ;;  %2114 = vmatprep.subr.mxu0 %v2073_v62 }
 0x165   : > { %v1417_v61 = vpop.f32.mrf.mxu1 }
 0x166   : > { %v1609_v44 = vpop.f32.mrf.mxu0 }
 0x167   : > { %v5479_v26 = vadd.f32 %v1609_v44, %v5370_v21  ;;  %v2072_v44 = vld [vmem:[#allocation2 + $0x1b0] sm:$0xff] }
 0x168   : > { %v1611_v13 = vpop.f32.mrf.mxu0  ;;  %2115 = vmatpush1.msra.mxu0 %v2072_v44 }
 0x169   : > { %v5484_v18 = vadd.f32 %v1611_v13, %v5375_v33  ;;  %v2070_v13 = vld [vmem:[#allocation2 + $0x1a0] sm:$0xff]  ;;  %2116 = vmatprep.subr.mxu0 %v2071_v25  ;;  %v1453_v25 = vadd.f32 %v5438_v39, %v5404_v2  ;;  %v1421_v2 = vpop.f32.mrf.mxu1 }
 0x16a   : > { %v1615_v40 = vpop.f32.mrf.mxu0  ;;  %2117 = vmatpush1.msra.mxu0 %v2070_v13  ;;  %v1464_v0 = vadd.f32 %v1421_v2, %v5451_v28 }
 0x16b   : > { %v1720_v21 = vmax.f32 %v5479_v26, %v5484_v18  ;;  %v5489_v56 = vadd.f32 %v1615_v40, %v5377_v51  ;;  %v1450_v40 = vadd.f32 %v5411_v8, %v5389_v5  ;;  %v1772_v26 = vld [vmem:[%s6284_s3 + $0x18] sm:$0xff]  ;;  %v1773_v18 = vld [vmem:[%s6284_s3 + $0x20] sm:$0xff] }
 0x16c   : > { %v1617_v10 = vpop.f32.mrf.mxu0 }
 0x16d   : > { %v5492_v33 = vadd.f32 %v1617_v10, %v5382_v42 }
 0x16e   : > { %v1621_v7 = vpop.f32.mrf.mxu0 }
 0x16f   : > { %v1721_v47 = vmax.f32 %v5489_v56, %v5492_v33  ;;  %v5497_v51 = vadd.f32 %v1621_v7, %v5384_v55  ;;  %v1452_v7 = vadd.f32 %v5429_v37, %v5398_v11  ;;  %v1770_v56 = vld [vmem:[%s6284_s3 + $0x8] sm:$0xff]  ;;  %v1771_v33 = vld [vmem:[%s6284_s3 + $0x10] sm:$0xff] }
 0x170   : > { %v1623_v50 = vpop.f32.mrf.mxu0 }
 0x171   : > { %v5500_v17 = vadd.f32 %v1623_v50, %v5391_v6 }
 0x172   : > { %v1627_v42 = vpop.f32.mrf.mxu0 }
 0x173   : > { %v1722_v55 = vmax.f32 %v5497_v51, %v5500_v17  ;;  %v5508_v62 = vadd.f32 %v1627_v42, %v1450_v40  ;;  %v1454_v42 = vadd.f32 %v5445_v24, %v5409_v20  ;;  %v1455_v40 = vadd.f32 %v5453_v27, %v5413_v9  ;;  %v1423_v9 = vpop.f32.mrf.mxu1  ;;  %v1893_v17 = vld [vmem:[%s6285_s4 + $0x8] sm:$0xff] }
 0x174   : > { %v1629_v10 = vpop.f32.mrf.mxu0 }
 0x175   : > { %v5510_v44 = vadd.f32 %v1629_v10, %v1451_v23 }
 0x176   : > { %v1633_v6 = vpop.f32.mrf.mxu0 }
 0x177   : > { %v1723_v5 = vmax.f32 %v5508_v62, %v5510_v44  ;;  %v5518_v31 = vadd.f32 %v1633_v6, %v1452_v7  ;;  %v1456_v6 = vadd.f32 %v5461_v60, %v5418_v30  ;;  %v1457_v7 = vadd.f32 %v5468_v38, %v5422_v36  ;;  %v1427_v36 = vpop.f32.mrf.mxu1 }
 0x178   : > { %v1635_v8 = vpop.f32.mrf.mxu0 }
 0x179   : > { %v5520_v13 = vadd.f32 %v1635_v8, %v1453_v25 }
 0x17a   : > { %v1639_v50 = vpop.f32.mrf.mxu0 }
 0x17b   : > { %v1724_v11 = vmax.f32 %v5518_v31, %v5520_v13  ;;  %v5528_v39 = vadd.f32 %v1639_v50, %v1454_v42  ;;  %v1458_v50 = vadd.f32 %v5474_v41, %v5427_v14  ;;  %v1459_v42 = vadd.f32 %v5481_v34, %v5431_v52  ;;  %v1429_v41 = vpop.f32.mrf.mxu1 }
 0x17c   : > { %v1641_v37 = vpop.f32.mrf.mxu0  ;;  %v1467_v28 = vadd.f32 %v1429_v41, %v5464_v35 }
 0x17d   : > { %v5530_v23 = vadd.f32 %v1641_v37, %v1455_v40 }
 0x17e   : > { %v1645_v10 = vpop.f32.mrf.mxu0 }
 0x17f   : > { %v1725_v20 = vmax.f32 %v5528_v39, %v5530_v23  ;;  %v5538_v27 = vadd.f32 %v1645_v10, %v1456_v6  ;;  %v1460_v10 = vadd.f32 %v1409_v29, %v5436_v19  ;;  %v1461_v6 = vadd.f32 %v1411_v12, %v5440_v43  ;;  %v1433_v19 = vpop.f32.mrf.mxu1 }
 0x180   : > { %v1647_v24 = vpop.f32.mrf.mxu0 }
 0x181   : > { %v5540_v25 = vadd.f32 %v1647_v24, %v1457_v7 }
 0x182   : > { %v1651_v8 = vpop.f32.mrf.mxu0 }
 0x183   : > { %v1726_v30 = vmax.f32 %v5538_v27, %v5540_v25  ;;  %v5548_v38 = vadd.f32 %v1651_v8, %v1458_v50  ;;  %v1462_v8 = vadd.f32 %v1415_v45, %v5443_v22  ;;  %v1463_v50 = vadd.f32 %v1417_v61, %v5448_v57 }
 0x184   : > { %v1653_v60 = vpop.f32.mrf.mxu0  ;;  %v968_v57 = vadd.f32 %v5357_v54, %v5355_v53 }
 0x185   : > { %v5550_v40 = vadd.f32 %v1653_v60, %v1459_v42 }
 0x186   : > { %v1657_v37 = vpop.f32.mrf.mxu0 }
 0x187   : > { %v1727_v14 = vmax.f32 %v5548_v38, %v5550_v40  ;;  %v5556_v52 = vadd.f32 %v1657_v37, %v1460_v10  ;;  %v1465_v37 = vadd.f32 %v1423_v9, %v5456_v46  ;;  %v1221_v46 = vadd.f32 %v5470_v3, %v968_v57 }
 0x188   : > { %v1659_v7 = vpop.f32.mrf.mxu0 }
 0x189   : > { %v5558_v34 = vadd.f32 %v1659_v7, %v1461_v6  ;;  %v966_v6 = vadd.f32 %v5353_v49, %v5351_v48  ;;  %v1435_v7 = vpop.f32.mrf.mxu1  ;;  %v972_v48 = vadd.f32 %v5361_v59, %v5359_v58  ;;  %v974_v49 = vadd.f32 %v5365_v1, %v5363_v63 }
 0x18a   : > { %v1663_v24 = vpop.f32.mrf.mxu0 }
 0x18b   : > { %v1728_v42 = vmax.f32 %v5556_v52, %v5558_v34  ;;  %v1710_v43 = vadd.f32 %v1663_v24, %v1462_v8  ;;  %v1220_v52 = vadd.f32 %v5466_v15, %v966_v6  ;;  %v1466_v24 = vadd.f32 %v1427_v36, %v5459_v32  ;;  %v1439_v9 = vpop.f32.mrf.mxu1 }
 0x18c   : > { %v1665_v29 = vpop.f32.mrf.mxu0  ;;  %v1469_v32 = vadd.f32 %v1435_v7, %v1221_v46  ;;  %v1223_v35 = vadd.f32 %v5476_v16, %v974_v49  ;;  %v1896_v49 = vld [vmem:[%s6285_s4 + $0x20] sm:$0xff] }
 0x18d   : > { %v1711_v12 = vadd.f32 %v1665_v29, %v1463_v50  ;;  %v1468_v54 = vadd.f32 %v1433_v19, %v1220_v52  ;;  %v1222_v50 = vadd.f32 %v5472_v4, %v972_v48  ;;  %v1441_v3 = vpop.f32.mrf.mxu1  ;;  %v4052_v4 = vld [vmem:[%s6283_s2] ss:$0 sm:$0xff]  ;;  %v2044_v48 = vld [vmem:[#allocation2 + $0xd8] sm:$0xff] }
 0x18e   : > { %v1669_v60 = vpop.f32.mrf.mxu0  ;;  %v1471_v58 = vadd.f32 %v1441_v3, %v1223_v35  ;;  %v1745_v38 = vadd.f32 %v4052_v4, %v1724_v11  ;;  %v1744_v27 = vadd.f32 %v4052_v4, %v1723_v5  ;;  %v1743_v39 = vadd.f32 %v4052_v4, %v1722_v55  ;;  %v2048_v55 = vld [vmem:[#allocation2 + $0xf8] sm:$0xff]  ;;  %v1894_v11 = vld [vmem:[%s6285_s4 + $0x10] sm:$0xff]  ;;  %v2038_v35 = vld [vmem:[#allocation2 + $0xa8] sm:$0xff] }
 0x18f   : > { %v1729_v10 = vmax.f32 %v1710_v43, %v1711_v12  ;;  %v1712_v45 = vadd.f32 %v1669_v60, %v1464_v0  ;;  %v1470_v60 = vadd.f32 %v1439_v9, %v1222_v50  ;;  %v1742_v31 = vadd.f32 %v4052_v4, %v1721_v47  ;;  %v1892_v47 = vld [vmem:[%s6285_s4] sm:$0xff]  ;;  %v2040_v50 = vld [vmem:[#allocation2 + $0xb8] sm:$0xff] }
 0x190   : > { %v1671_v22 = vpop.f32.mrf.mxu0  ;;  %v1759_v23 = vmax.f32 %v1745_v38, 0.0  ;;  %v1758_v13 = vmax.f32 %v1744_v27, 0.0  ;;  %v1741_v62 = vadd.f32 %v4052_v4, %v1720_v21  ;;  %v1757_v44 = vmax.f32 %v1743_v39, 0.0  ;;  %v1774_v21 = vld [vmem:[%s6284_s3 + $0x28] sm:$0xff]  ;;  %v2036_v3 = vld [vmem:[#allocation2 + $0x98] sm:$0xff]  ;;  %v2021_v38 = vld [vmem:[#allocation2 + $0x20] sm:$0xff] }
 0x191   : > { %v1713_v61 = vadd.f32 %v1671_v22, %v1465_v37  ;;  %v1756_v5 = vmax.f32 %v1742_v31, 0.0  ;;  %v2020_v27 = vld [vmem:[#allocation2 + $0x18] sm:$0xff]  ;;  %v2019_v39 = vld [vmem:[#allocation2 + $0x10] sm:$0xff]  ;;  %v2018_v31 = vld [vmem:[#allocation2 + $0x8] sm:$0xff] }
 0x192   : > { %v1675_v34 = vpop.f32.mrf.mxu0  ;;  %v1755_v51 = vmax.f32 %v1741_v62, 0.0  ;;  %v2017_v62 = vld [vmem:[#allocation2] sm:$0xff] }
 0x193   : > { %v1730_v2 = vmax.f32 %v1712_v45, %v1713_v61  ;;  %v1714_v0 = vadd.f32 %v1675_v34, %v1466_v24  ;;  %v1750_v61 = vadd.f32 %v4052_v4, %v1729_v10  ;;  %v1749_v34 = vadd.f32 %v4052_v4, %v1728_v42 }
 0x194   : > { %v1677_v8 = vpop.f32.mrf.mxu0  ;;  %v1746_v42 = vadd.f32 %v4052_v4, %v1725_v20  ;;  %v2047_v20 = vld [vmem:[#allocation2 + $0xf0] sm:$0xff] }
 0x195   : > { %v1715_v53 = vadd.f32 %v1677_v8, %v1467_v28  ;;  %v1751_v57 = vadd.f32 %v4052_v4, %v1730_v2  ;;  %v1748_v28 = vadd.f32 %v4052_v4, %v1727_v14  ;;  %v1764_v46 = vmax.f32 %v1750_v61, 0.0  ;;  %v2045_v14 = vld [vmem:[#allocation2 + $0xe0] sm:$0xff]  ;;  %v1895_v8 = vld [vmem:[%s6285_s4 + $0x18] sm:$0xff]  ;;  %v2026_v61 = vld [vmem:[#allocation2 + $0x48] sm:$0xff] }
 0x196   : > { %v1681_v15 = vpop.f32.mrf.mxu0  ;;  %v1747_v2 = vadd.f32 %v4052_v4, %v1726_v30  ;;  %v1763_v9 = vmax.f32 %v1749_v34, 0.0  ;;  %v1760_v25 = vmax.f32 %v1746_v42, 0.0  ;;  %v2046_v30 = vld [vmem:[#allocation2 + $0xe8] sm:$0xff]  ;;  %v2025_v34 = vld [vmem:[#allocation2 + $0x40] sm:$0xff] }
 0x197   : > { %v1731_v36 = vmax.f32 %v1714_v0, %v1715_v53  ;;  %v1716_v29 = vadd.f32 %v1681_v15, %v1468_v54  ;;  %v1765_v24 = vmax.f32 %v1751_v57, 0.0  ;;  %v1762_v10 = vmax.f32 %v1748_v28, 0.0  ;;  %v2043_v0 = vld [vmem:[#allocation2 + $0xd0] sm:$0xff]  ;;  %v2042_v53 = vld [vmem:[#allocation2 + $0xc8] sm:$0xff]  ;;  %v2041_v54 = vld [vmem:[#allocation2 + $0xc0] sm:$0xff] }
 0x198   : > { %v1683_v41 = vpop.f32.mrf.mxu0  ;;  %v1761_v40 = vmax.f32 %v1747_v2, 0.0  ;;  %v1897_v15 = vld [vmem:[%s6285_s4 + $0x28] sm:$0xff]  ;;  %v2027_v57 = vld [vmem:[#allocation2 + $0x50] sm:$0xff]  ;;  %v2024_v28 = vld [vmem:[#allocation2 + $0x38] sm:$0xff] }
 0x199   : > { %v1717_v43 = vadd.f32 %v1683_v41, %v1469_v32  ;;  %v1752_v16 = vadd.f32 %v4052_v4, %v1731_v36  ;;  %v2039_v32 = vld [vmem:[#allocation2 + $0xb0] sm:$0xff]  ;;  %v2037_v36 = vld [vmem:[#allocation2 + $0xa0] sm:$0xff]  ;;  %v6319_v41 = vmov 0.0   ;;  %v2022_v42 = vld [vmem:[#allocation2 + $0x28] sm:$0xff] }
 0x19a   : > { %v1687_v12 = vpop.f32.mrf.mxu0  ;;  %v2023_v2 = vld [vmem:[#allocation2 + $0x30] sm:$0xff] }
 0x19b   : > { %v1732_v59 = vmax.f32 %v1716_v29, %v1717_v43  ;;  %v1718_v63 = vadd.f32 %v1687_v12, %v1470_v60  ;;  %v1766_v52 = vmax.f32 %v1752_v16, 0.0  ;;  %v2035_v29 = vld [vmem:[#allocation2 + $0x90] sm:$0xff]  ;;  %v2034_v43 = vld [vmem:[#allocation2 + $0x88] sm:$0xff]  ;;  %v2069_v12 = vld [vmem:[#allocation2 + $0x198] sm:$0xff] }
 0x19c   : > { %v1689_v37 = vpop.f32.mrf.mxu0  ;;  %v2033_v60 = vld [vmem:[#allocation2 + $0x80] sm:$0xff]  ;;  %2118 = vmatprep.subr.mxu0 %v2069_v12  ;;  %v2028_v16 = vld [vmem:[#allocation2 + $0x58] sm:$0xff] }
 0x19d   : > { %v1719_v1 = vadd.f32 %v1689_v37, %v1471_v58  ;;  %v1753_v19 = vadd.f32 %v4052_v4, %v1732_v59  ;;  %v2068_v58 = vld [vmem:[#allocation2 + $0x190] sm:$0xff]  ;;  %v2032_v59 = vld [vmem:[#allocation2 + $0x78] sm:$0xff]  ;;  %v2067_v37 = vld [vmem:[#allocation2 + $0x188] sm:$0xff] }
 0x19e   : > { %2119 = vmatpush1.msra.mxu0 %v2068_v58  ;;  %v2499_v58 = vld [vmem:[#allocation2 + $0x3d0] sm:$0xff] }
 0x19f   : > { %v1733_v6 = vmax.f32 %v1718_v63, %v1719_v1  ;;  %v1767_v45 = vmax.f32 %v1753_v19, 0.0  ;;  %v2031_v63 = vld [vmem:[#allocation2 + $0x70] sm:$0xff]  ;;  %v2066_v1 = vld [vmem:[#allocation2 + $0x180] sm:$0xff]  ;;  %2120 = vmatprep.subr.mxu0 %v2067_v37 }
 0x1a0   : > { %v2029_v19 = vld [vmem:[#allocation2 + $0x60] sm:$0xff]  ;;  %2121 = vmatpush1.msra.mxu0 %v2066_v1 }
 0x1a1   : > { %v1754_v7 = vadd.f32 %v4052_v4, %v1733_v6  ;;  %v2030_v6 = vld [vmem:[#allocation2 + $0x68] sm:$0xff]  ;;  %v2065_v4 = vld [vmem:[#allocation2 + $0x178] sm:$0xff] }
 0x1a2   : > { %2122 = vmatprep.subr.mxu0 %v2065_v4  ;;  %v2336_v4 = vld [vmem:[#allocation2 + $0x2d8] sm:$0xff] }
 0x1a3   : > { %v1768_v22 = vmax.f32 %v1754_v7, 0.0  ;;  %v2064_v7 = vld [vmem:[#allocation2 + $0x170] sm:$0xff] }
 0x1a4   : > { %2123 = vmatpush1.msra.mxu0 %v2064_v7 }
 0x1a5   : > { %4303 = vmatprep.subr.msk.mxu1 %vm623_vm0, %v1768_v22 }
 0x1a6   : > { %4304 = vmatpush3.msk.msra.mxu1 %vm623_vm0, %v1768_v22 }
 0x1a7   : > { %4305 = vmatprep.subr.mxu1 %v1767_v45 }
 0x1a8   : > { %4306 = vmatpush3.msra.mxu1 %v1767_v45 }
 0x1a9   : > { %4307 = vmatprep.subr.mxu1 %v1766_v52 }
 0x1aa   : > { %4308 = vmatpush3.msra.mxu1 %v1766_v52 }
 0x1ab   : > { %4309 = vmatprep.subr.mxu1 %v1765_v24 }
 0x1ac   : > { %4310 = vmatpush3.msra.mxu1 %v1765_v24 }
 0x1ad   : > { %4311 = vmatprep.subr.mxu1 %v1764_v46 }
 0x1ae   : > { %4312 = vmatpush3.msra.mxu1 %v1764_v46 }
 0x1af   : > { %4313 = vmatprep.subr.mxu1 %v1763_v9 }
 0x1b0   : > { %4314 = vmatpush3.msra.mxu1 %v1763_v9 }
 0x1b1   : > { %4315 = vmatprep.subr.mxu1 %v1762_v10 }
 0x1b2   : > { %4316 = vmatpush3.msra.mxu1 %v1762_v10 }
 0x1b3   : > { %4317 = vmatprep.subr.mxu1 %v1761_v40 }
 0x1b4   : > { %4318 = vmatpush3.msra.mxu1 %v1761_v40 }
 0x1b5   : > { %4319 = vmatprep.subr.mxu1 %v1760_v25 }
 0x1b6   : > { %4320 = vmatpush3.msra.mxu1 %v1760_v25 }
 0x1b7   : > { %4321 = vmatprep.subr.mxu1 %v1759_v23 }
 0x1b8   : > { %4322 = vmatpush3.msra.mxu1 %v1759_v23 }
 0x1b9   : > { %4323 = vmatprep.subr.mxu1 %v1758_v13 }
 0x1ba   : > { %4324 = vmatpush3.msra.mxu1 %v1758_v13 }
 0x1bb   : > { %4325 = vmatprep.subr.mxu1 %v1757_v44 }
 0x1bc   : > { %4326 = vmatpush3.msra.mxu1 %v1757_v44 }
 0x1bd   : > { %4327 = vmatprep.subr.mxu1 %v1756_v5 }
 0x1be   : > { %4328 = vmatpush3.msra.mxu1 %v1756_v5 }
 0x1bf   : > { %4329 = vmatprep.subr.mxu1 %v1755_v51 }
 0x1c0   : > { %4330 = vmatpush3.msra.mxu1 %v1755_v51 }
 0x1c1   : > { %4340 = vmatprep.subr.msk.mxu1 %vm623_vm0, %v1768_v22  ;;  %4332 = vmatmul.mubr.msk.f32.vlgmr.msra.gmra.mxu1 %vm1775_vm2, %v1770_v56  ;;  %v2050_v56 = vld [vmem:[#allocation2 + $0x100] sm:$0xff] }
 0x1c2   : > { %4341 = vmatpush3.msk.msra.mxu1 %vm623_vm0, %v1768_v22  ;;  %4334 = vmatprep.mubr.msk.f32.mxu1 %vm1775_vm2, %v1771_v33  ;;  %v2063_v22 = vld [vmem:[#allocation2 + $0x168] sm:$0xff]  ;;  %v2340_v33 = vld [vmem:[#allocation2 + $0x2f8] sm:$0xff] }
 0x1c3   : > { %4342 = vmatprep.subr.mxu1 %v1767_v45  ;;  %2124 = vmatprep.subr.mxu0 %v2063_v22 }
 0x1c4   : > { %4343 = vmatpush3.msra.mxu1 %v1767_v45  ;;  %v2062_v45 = vld [vmem:[#allocation2 + $0x160] sm:$0xff] }
 0x1c5   : > { %4344 = vmatprep.subr.mxu1 %v1766_v52  ;;  %4335 = vmatmul.mubr.msk.f32.gmra.mxu1 %vm1775_vm2, %v1772_v26 }
 0x1c6   : > { %4345 = vmatpush3.msra.mxu1 %v1766_v52  ;;  %4337 = vmatprep.mubr.msk.f32.mxu1 %vm1775_vm2, %v1773_v18  ;;  %v2061_v52 = vld [vmem:[#allocation2 + $0x158] sm:$0xff] }
 0x1c7   : > { %4346 = vmatprep.subr.mxu1 %v1765_v24  ;;  %2125 = vmatpush1.msra.mxu0 %v2062_v45  ;;  %v2335_v45 = vld [vmem:[#allocation2 + $0x2d0] sm:$0xff] }
 0x1c8   : > { %4347 = vmatpush3.msra.mxu1 %v1765_v24  ;;  %v2060_v24 = vld [vmem:[#allocation2 + $0x150] sm:$0xff]  ;;  %2126 = vmatprep.subr.mxu0 %v2061_v52 }
 0x1c9   : > { %4348 = vmatprep.subr.mxu1 %v1764_v46  ;;  %4338 = vmatmul.mubr.msk.f32.gmra.mxu1 %vm1775_vm2, %v1774_v21 }
 0x1ca   : > { %4349 = vmatpush3.msra.mxu1 %v1764_v46  ;;  %4368 = vmatprep.mubr.msk.f32.mxu1 %vm1775_vm2, %v1892_v47  ;;  %v2059_v46 = vld [vmem:[#allocation2 + $0x148] sm:$0xff] }
 0x1cb   : > { %4350 = vmatprep.subr.mxu1 %v1763_v9  ;;  %2127 = vmatpush1.msra.mxu0 %v2060_v24  ;;  %v2495_v24 = vld [vmem:[#allocation2 + $0x3b0] sm:$0xff] }
 0x1cc   : > { %4351 = vmatpush3.msra.mxu1 %v1763_v9  ;;  %v2058_v9 = vld [vmem:[#allocation2 + $0x140] sm:$0xff]  ;;  %2128 = vmatprep.subr.mxu0 %v2059_v46 }
 0x1cd   : > { %4352 = vmatprep.subr.mxu1 %v1762_v10  ;;  %2129 = vmatpush1.msra.mxu0 %v2058_v9 }
 0x1ce   : > { %4353 = vmatpush3.msra.mxu1 %v1762_v10  ;;  %v2057_v10 = vld [vmem:[#allocation2 + $0x138] sm:$0xff] }
 0x1cf   : > { %4354 = vmatprep.subr.mxu1 %v1761_v40  ;;  %2130 = vmatprep.subr.mxu0 %v2057_v10 }
 0x1d0   : > { %4355 = vmatpush3.msra.mxu1 %v1761_v40  ;;  %v2056_v40 = vld [vmem:[#allocation2 + $0x130] sm:$0xff] }
 0x1d1   : > { %4356 = vmatprep.subr.mxu1 %v1760_v25  ;;  %2131 = vmatpush1.msra.mxu0 %v2056_v40  ;;  %v2493_v40 = vld [vmem:[#allocation2 + $0x3a0] sm:$0xff] }
 0x1d2   : > { %4357 = vmatpush3.msra.mxu1 %v1760_v25  ;;  %v2055_v25 = vld [vmem:[#allocation2 + $0x128] sm:$0xff] }
 0x1d3   : > { %4358 = vmatprep.subr.mxu1 %v1759_v23  ;;  %2132 = vmatprep.subr.mxu0 %v2055_v25 }
 0x1d4   : > { %4359 = vmatpush3.msra.mxu1 %v1759_v23  ;;  %v2054_v23 = vld [vmem:[#allocation2 + $0x120] sm:$0xff] }
 0x1d5   : > { %4360 = vmatprep.subr.mxu1 %v1758_v13  ;;  %2133 = vmatpush1.msra.mxu0 %v2054_v23  ;;  %v2331_v23 = vld [vmem:[#allocation2 + $0x2b0] sm:$0xff] }
 0x1d6   : > { %4361 = vmatpush3.msra.mxu1 %v1758_v13  ;;  %v2053_v13 = vld [vmem:[#allocation2 + $0x118] sm:$0xff] }
 0x1d7   : > { %4362 = vmatprep.subr.mxu1 %v1757_v44  ;;  %2134 = vmatprep.subr.mxu0 %v2053_v13 }
 0x1d8   : > { %4363 = vmatpush3.msra.mxu1 %v1757_v44  ;;  %v2052_v44 = vld [vmem:[#allocation2 + $0x110] sm:$0xff] }
 0x1d9   : > { %4364 = vmatprep.subr.mxu1 %v1756_v5  ;;  %2135 = vmatpush1.msra.mxu0 %v2052_v44  ;;  %v2491_v44 = vld [vmem:[#allocation2 + $0x390] sm:$0xff] }
 0x1da   : > { %4365 = vmatpush3.msra.mxu1 %v1756_v5  ;;  %v2504_v5 = vld [vmem:[#allocation2 + $0x3f8] sm:$0xff] }
 0x1db   : > { %4366 = vmatprep.subr.mxu1 %v1755_v51 }
 0x1dc   : > { %4367 = vmatpush3.msra.mxu1 %v1755_v51  ;;  %v2051_v51 = vld [vmem:[#allocation2 + $0x108] sm:$0xff] }
 0x1dd   : > { %4369 = vmatmul.mubr.msk.f32.vlgmr.msra.gmra.mxu1 %vm1775_vm2, %v1893_v17  ;;  %2207 = vmatprep.subr.mxu1 %v2048_v55 }
 0x1de   : > { %4371 = vmatprep.mubr.msk.f32.mxu1 %vm1775_vm2, %v1894_v11  ;;  %2208 = vmatpush1.msra.mxu1 %v2047_v20 }
 0x1df   : > { %2209 = vmatprep.subr.mxu1 %v2046_v30  ;;  %2136 = vmatprep.subr.mxu0 %v2051_v51  ;;  %v2490_v51 = vld [vmem:[#allocation2 + $0x388] sm:$0xff] }
 0x1e0   : > { %2210 = vmatpush1.msra.mxu1 %v2045_v14  ;;  %2137 = vmatpush1.msra.mxu0 %v2050_v56 }
 0x1e1   : > { %4372 = vmatmul.mubr.msk.f32.gmra.mxu1 %vm1775_vm2, %v1895_v8  ;;  %2211 = vmatprep.subr.mxu1 %v2044_v48  ;;  %v2503_v8 = vld [vmem:[#allocation2 + $0x3f0] sm:$0xff] }
 0x1e2   : > { %4374 = vmatprep.mubr.msk.f32.mxu1 %vm1775_vm2, %v1896_v49  ;;  %2212 = vmatpush1.msra.mxu1 %v2043_v0  ;;  %v2502_v49 = vld [vmem:[#allocation2 + $0x3e8] sm:$0xff]  ;;  %v2501_v0 = vld [vmem:[#allocation2 + $0x3e0] sm:$0xff] }
 0x1e3   : > { %2213 = vmatprep.subr.mxu1 %v2042_v53  ;;  %2359 = vmatprep.subr.mxu0 %v2340_v33  ;;  %v2328_v33 = vld [vmem:[#allocation2 + $0x298] sm:$0xff] }
 0x1e4   : > { %2214 = vmatpush1.msra.mxu1 %v2041_v54 }
 0x1e5   : > { %4375 = vmatmul.mubr.msk.f32.gmra.mxu1 %vm1775_vm2, %v1897_v15  ;;  %2215 = vmatprep.subr.mxu1 %v2040_v50  ;;  %v2339_v50 = vld [vmem:[#allocation2 + $0x2f0] sm:$0xff] }
 0x1e6   : > { %2216 = vmatpush1.msra.mxu1 %v2039_v32  ;;  %2271 = vmatprep.mubr.f32.mxu1 %v6319_v41  ;;  %v2500_v32 = vld [vmem:[#allocation2 + $0x3d8] sm:$0xff] }
 0x1e7   : > { %2217 = vmatprep.subr.mxu1 %v2038_v35 }
 0x1e8   : > { %2218 = vmatpush1.msra.mxu1 %v2037_v36 }
 0x1e9   : > { %2219 = vmatprep.subr.mxu1 %v2036_v3 }
 0x1ea   : > { %2220 = vmatpush1.msra.mxu1 %v2035_v29 }
 0x1eb   : > { %2221 = vmatprep.subr.mxu1 %v2034_v43  ;;  %v2338_v43 = vld [vmem:[#allocation2 + $0x2e8] sm:$0xff] }
 0x1ec   : > { %2222 = vmatpush1.msra.mxu1 %v2033_v60 }
 0x1ed   : > { %2223 = vmatprep.subr.mxu1 %v2032_v59  ;;  %v2337_v59 = vld [vmem:[#allocation2 + $0x2e0] sm:$0xff] }
 0x1ee   : > { %2224 = vmatpush1.msra.mxu1 %v2031_v63  ;;  %v2498_v63 = vld [vmem:[#allocation2 + $0x3c8] sm:$0xff] }
 0x1ef   : > { %2225 = vmatprep.subr.mxu1 %v2030_v6 }
 0x1f0   : > { %2226 = vmatpush1.msra.mxu1 %v2029_v19  ;;  %v2497_v19 = vld [vmem:[#allocation2 + $0x3c0] sm:$0xff] }
 0x1f1   : > { %2227 = vmatprep.subr.mxu1 %v2028_v16 }
 0x1f2   : > { %2228 = vmatpush1.msra.mxu1 %v2027_v57 }
 0x1f3   : > { %2229 = vmatprep.subr.mxu1 %v2026_v61  ;;  %v2496_v61 = vld [vmem:[#allocation2 + $0x3b8] sm:$0xff] }
 0x1f4   : > { %2230 = vmatpush1.msra.mxu1 %v2025_v34  ;;  %v2334_v34 = vld [vmem:[#allocation2 + $0x2c8] sm:$0xff] }
 0x1f5   : > { %2231 = vmatprep.subr.mxu1 %v2024_v28  ;;  %v2333_v28 = vld [vmem:[#allocation2 + $0x2c0] sm:$0xff] }
 0x1f6   : > { %2232 = vmatpush1.msra.mxu1 %v2023_v2 }
 0x1f7   : > { %2233 = vmatprep.subr.mxu1 %v2022_v42  ;;  %v2494_v42 = vld [vmem:[#allocation2 + $0x3a8] sm:$0xff] }
 0x1f8   : > { %2234 = vmatpush1.msra.mxu1 %v2021_v38  ;;  %v2332_v38 = vld [vmem:[#allocation2 + $0x2b8] sm:$0xff] }
 0x1f9   : > { %2235 = vmatprep.subr.mxu1 %v2020_v27 }
 0x1fa   : > { %2236 = vmatpush1.msra.mxu1 %v2019_v39 }
 0x1fb   : > { %2237 = vmatprep.subr.mxu1 %v2018_v31  ;;  %v2492_v31 = vld [vmem:[#allocation2 + $0x398] sm:$0xff] }
 0x1fc   : > { %2238 = vmatpush1.msra.mxu1 %v2017_v62  ;;  %v2330_v62 = vld [vmem:[#allocation2 + $0x2a8] sm:$0xff] }
 0x1fd   : > { %2523 = vmatprep.subr.mxu1 %v2504_v5  ;;  %v2329_v5 = vld [vmem:[#allocation2 + $0x2a0] sm:$0xff] }
 0x281   : > { %v4333_v26 = vpop.f32.mrf.mxu1 }
 0x283   : > { %v1863_v18 = vpop.f32.mrf.mxu1 }
 0x285   : > { %v4336_v21 = vpop.f32.mrf.mxu1 }
 0x287   : > { %v1873_v47 = vpop.f32.mrf.mxu1 }
 0x289   : > { %v4339_v17 = vpop.f32.mrf.mxu1 }
 0x28b   : > { %v1883_v55 = vpop.f32.mrf.mxu1 }
 0x29d   : > { %v4370_v11 = vpop.f32.mrf.mxu1 }
 0x29e   : > { %v5656_v20 = vmax.f32 %v4333_v26, %v4370_v11  ;;  %v2489_v26 = vld [vmem:[#allocation2 + $0x380] sm:$0xff] }
 0x29f   : > { %v1982_v30 = vpop.f32.mrf.mxu1  ;;  %v2325_v11 = vld [vmem:[#allocation2 + $0x280] sm:$0xff] }
 0x2a0   : > { %v5658_v14 = vmax.f32 %v1863_v18, %v1982_v30  ;;  %v2090_v54 = vrot.slane %v5656_v20, 1  ;;  %v2670_v36 = vrot.slane %v5656_v20, 4  ;;  %v2327_v18 = vld [vmem:[#allocation2 + $0x290] sm:$0xff]  ;;  %v2486_v30 = vld [vmem:[#allocation2 + $0x368] sm:$0xff] }
 0x2a1   : > { %v4373_v48 = vpop.f32.mrf.mxu1 }
 0x2a2   : > { %2272 = vmatmul.mubr.f32.vlgmr.msra.gmra.mxu1 %v5658_v14  ;;  %v2089_v53 = vrot.slane %v5658_v14, 1  ;;  %v2669_v35 = vrot.slane %v5658_v14, 4  ;;  %v5669_v12 = vmax.f32 %v4336_v21, %v4373_v48  ;;  %v2488_v21 = vld [vmem:[#allocation2 + $0x378] sm:$0xff]  ;;  %v2485_v48 = vld [vmem:[#allocation2 + $0x360] sm:$0xff] }
 0x2a3   : > { %2524 = vmatpush1.msra.mxu1 %v2503_v8  ;;  %v1992_v15 = vpop.f32.mrf.mxu1  ;;  %2277 = vmatprep.mubr.f32.mxu1 %v6319_v41  ;;  %v2324_v8 = vld [vmem:[#allocation2 + $0x278] sm:$0xff] }
 0x2a4   : > { %v5666_v3 = vmax.f32 %v1873_v47, %v1992_v15  ;;  %2525 = vmatprep.subr.mxu1 %v2502_v49  ;;  %v2091_v29 = vsel %vm2088_vm3, %v2089_v53, %v2090_v54  ;;  %v5672_v37 = vsel %vm623_vm0, %v2669_v35, %v2670_v36  ;;  %v2674_v52 = vrot.slane %v5669_v12, 4  ;;  %v2484_v53 = vld [vmem:[#allocation2 + $0x358] sm:$0xff]  ;;  %v2322_v15 = vld [vmem:[#allocation2 + $0x268] sm:$0xff] }
 0x2a5   : > { %2526 = vmatpush1.msra.mxu1 %v2501_v0  ;;  %v4376_v60 = vpop.f32.mrf.mxu1  ;;  %2171 = vmatmul.mubr.f32.vlgmr.msra.gmra.mxu0 %v2091_v29  ;;  %v2094_v27 = vrot.slane %v5669_v12, 1  ;;  %v2323_v0 = vld [vmem:[#allocation2 + $0x270] sm:$0xff]  ;;  %v2482_v35 = vld [vmem:[#allocation2 + $0x348] sm:$0xff]  ;;  %v2481_v29 = vld [vmem:[#allocation2 + $0x340] sm:$0xff] }
 0x2a6   : > { %2360 = vmatpush1.msra.mxu0 %v2339_v50  ;;  %2527 = vmatprep.subr.mxu1 %v2500_v32  ;;  %v2092_v1 = vrot.slane %v5666_v3, 1  ;;  %v2672_v7 = vrot.slane %v5666_v3, 4  ;;  %v5677_v16 = vmax.f32 %v4339_v17, %v4376_v60  ;;  %v2326_v17 = vld [vmem:[#allocation2 + $0x288] sm:$0xff]  ;;  %v2483_v50 = vld [vmem:[#allocation2 + $0x350] sm:$0xff]  ;;  %v2321_v32 = vld [vmem:[#allocation2 + $0x260] sm:$0xff] }
 0x2a7   : > { %2278 = vmatmul.mubr.f32.gmra.mxu1 %v5656_v20  ;;  %2361 = vmatprep.subr.mxu0 %v2338_v43  ;;  %v2002_v6 = vpop.f32.mrf.mxu1  ;;  %v2480_v43 = vld [vmem:[#allocation2 + $0x338] sm:$0xff]  ;;  %v2319_v60 = vld [vmem:[#allocation2 + $0x250] sm:$0xff] }
 0x2a8   : > { %2528 = vmatpush1.msra.mxu1 %v2499_v58  ;;  %v5679_v22 = vmax.f32 %v1883_v55, %v2002_v6  ;;  %2362 = vmatpush1.msra.mxu0 %v2337_v59  ;;  %v2093_v57 = vsel %vm2088_vm3, %v2090_v54, %v2092_v1  ;;  %v5686_v46 = vsel %vm623_vm0, %v2670_v36, %v2672_v7  ;;  %v2678_v10 = vrot.slane %v5677_v16, 4  ;;  %v2487_v55 = vld [vmem:[#allocation2 + $0x370] sm:$0xff]  ;;  %v2320_v36 = vld [vmem:[#allocation2 + $0x258] sm:$0xff]  ;;  %v2318_v59 = vld [vmem:[#allocation2 + $0x248] sm:$0xff] }
 0x2a9   : > { %2529 = vmatprep.subr.mxu1 %v2498_v63  ;;  %2176 = vmatprep.mubr.f32.mxu0 %v6319_v41  ;;  %v5689_v2 = vsel %vm623_vm0, %v2672_v7, %v2674_v52  ;;  %v2095_v13 = vsel %vm2088_vm3, %v2092_v1, %v2094_v27  ;;  %v2098_v49 = vrot.slane %v5677_v16, 1  ;;  %v2479_v58 = vld [vmem:[#allocation2 + $0x330] sm:$0xff]  ;;  %v2478_v63 = vld [vmem:[#allocation2 + $0x328] sm:$0xff]  ;;  %v2317_v1 = vld [vmem:[#allocation2 + $0x240] sm:$0xff] }
 0x2aa   : > { %2363 = vmatprep.subr.mxu0 %v2336_v4  ;;  %2530 = vmatpush1.msra.mxu1 %v2497_v19  ;;  %v2676_v9 = vrot.slane %v5679_v22, 4  ;;  %v2096_v56 = vrot.slane %v5679_v22, 1  ;;  %v2477_v6 = vld [vmem:[#allocation2 + $0x320] sm:$0xff]  ;;  %v2316_v4 = vld [vmem:[#allocation2 + $0x238] sm:$0xff]  ;;  %v2315_v7 = vld [vmem:[#allocation2 + $0x230] sm:$0xff] }
 0x2ab   : > { %2177 = vmatmul.mubr.f32.gmra.mxu0 %v2093_v57  ;;  %2283 = vmatprep.mubr.f32.mxu1 %v6319_v41  ;;  %v2476_v19 = vld [vmem:[#allocation2 + $0x318] sm:$0xff]  ;;  %v2475_v57 = vld [vmem:[#allocation2 + $0x310] sm:$0xff] }
 0x2ac   : > { %2364 = vmatpush1.msra.mxu0 %v2335_v45  ;;  %2531 = vmatprep.subr.mxu1 %v2496_v61  ;;  %v5696_v25 = vsel %vm623_vm0, %v2674_v52, %v2676_v9  ;;  %v5701_v39 = vsel %vm623_vm0, %v2676_v9, %v2678_v10  ;;  %v2097_v47 = vsel %vm2088_vm3, %v2094_v27, %v2096_v56  ;;  %v2314_v45 = vld [vmem:[#allocation2 + $0x228] sm:$0xff]  ;;  %v2313_v52 = vld [vmem:[#allocation2 + $0x220] sm:$0xff]  ;;  %v2311_v9 = vld [vmem:[#allocation2 + $0x210] sm:$0xff] }
 0x2ad   : > { %2284 = vmatmul.mubr.f32.gmra.mxu1 %v5666_v3  ;;  %2365 = vmatprep.subr.mxu0 %v2334_v34  ;;  %v2099_v54 = vsel %vm2088_vm3, %v2096_v56, %v2098_v49  ;;  %v2474_v61 = vld [vmem:[#allocation2 + $0x308] sm:$0xff]  ;;  %v2473_v34 = vld [vmem:[#allocation2 + $0x300] sm:$0xff] }
 0x2ae   : > { %2532 = vmatpush1.msra.mxu1 %v2495_v24  ;;  %2366 = vmatpush1.msra.mxu0 %v2333_v28  ;;  %v2506_v24 = vrot.slane %v5658_v14, 3  ;;  %v2312_v28 = vld [vmem:[#allocation2 + $0x218] sm:$0xff] }
 0x2af   : > { %2533 = vmatprep.subr.mxu1 %v2494_v42  ;;  %2182 = vmatprep.mubr.f32.mxu0 %v6319_v41  ;;  %v2507_v42 = vrot.slane %v5656_v20, 3 }
 0x2b0   : > { %2367 = vmatprep.subr.mxu0 %v2332_v38  ;;  %2534 = vmatpush1.msra.mxu1 %v2493_v40  ;;  %v2310_v38 = vld [vmem:[#allocation2 + $0x208] sm:$0xff]  ;;  %v2342_v40 = vrot.slane %v5658_v14, 2 }
 0x2b1   : > { %2183 = vmatmul.mubr.f32.gmra.mxu0 %v2095_v13  ;;  %2289 = vmatprep.mubr.f32.mxu1 %v6319_v41  ;;  %v2508_v27 = vsel %vm2505_vm4, %v2506_v24, %v2507_v42  ;;  %v2343_v13 = vrot.slane %v5656_v20, 2  ;;  %v2664_v20 = vld [vmem:[#allocation2 + $0x4d8] sm:$0xff]  ;;  %v2638_v24 = vld [vmem:[#allocation2 + $0x408] sm:$0xff] }
 0x2b2   : > { %2368 = vmatpush1.msra.mxu0 %v2331_v23  ;;  %2535 = vmatprep.subr.mxu1 %v2492_v31  ;;  %v2309_v23 = vld [vmem:[#allocation2 + $0x200] sm:$0xff]  ;;  %v2509_v31 = vrot.slane %v5666_v3, 3 }
 0x2b3   : > { %2290 = vmatmul.mubr.f32.gmra.mxu1 %v5669_v12  ;;  %2369 = vmatprep.subr.mxu0 %v2330_v62  ;;  %v2668_v62 = vld [vmem:[#allocation2 + $0x4f8] sm:$0xff]  ;;  %v2344_v14 = vsel %vm2341_vm5, %v2342_v40, %v2343_v13 }
 0x2b4   : > { %2536 = vmatpush1.msra.mxu1 %v2491_v44  ;;  %2370 = vmatpush1.msra.mxu0 %v2329_v5  ;;  %v2667_v44 = vld [vmem:[#allocation2 + $0x4f0] sm:$0xff]  ;;  %v2666_v5 = vld [vmem:[#allocation2 + $0x4e8] sm:$0xff]  ;;  %v2510_v56 = vsel %vm2505_vm4, %v2507_v42, %v2509_v31 }
 0x2b5   : > { %2537 = vmatprep.subr.mxu1 %v2490_v51  ;;  %2188 = vmatprep.mubr.f32.mxu0 %v6319_v41  ;;  %v2345_v51 = vrot.slane %v5666_v3, 2  ;;  %v2662_v3 = vld [vmem:[#allocation2 + $0x4c8] sm:$0xff] }
 0x2b6   : > { %2371 = vmatprep.subr.mxu0 %v2328_v33  ;;  %2538 = vmatpush1.msra.mxu1 %v2489_v26  ;;  %v2665_v33 = vld [vmem:[#allocation2 + $0x4e0] sm:$0xff]  ;;  %v2511_v26 = vrot.slane %v5669_v12, 3 }
 0x2b7   : > { %2189 = vmatmul.mubr.f32.gmra.mxu0 %v2097_v47  ;;  %2295 = vmatprep.mubr.f32.mxu1 %v6319_v41 }
 0x2b8   : > { %2372 = vmatpush1.msra.mxu0 %v2327_v18  ;;  %2539 = vmatprep.subr.mxu1 %v2488_v21  ;;  %v2663_v18 = vld [vmem:[#allocation2 + $0x4d0] sm:$0xff]  ;;  %v2346_v21 = vsel %vm2341_vm5, %v2343_v13, %v2345_v51  ;;  %v2512_v47 = vsel %vm2505_vm4, %v2509_v31, %v2511_v26 }
 0x2b9   : > { %2296 = vmatmul.mubr.f32.gmra.mxu1 %v5679_v22  ;;  %2373 = vmatprep.subr.mxu0 %v2326_v17  ;;  %v2661_v17 = vld [vmem:[#allocation2 + $0x4c0] sm:$0xff] }
 0x2ba   : > { %2540 = vmatpush1.msra.mxu1 %v2487_v55  ;;  %2374 = vmatpush1.msra.mxu0 %v2325_v11  ;;  %v2513_v55 = vrot.slane %v5679_v22, 3  ;;  %v2347_v11 = vrot.slane %v5669_v12, 2  ;;  %v2656_v12 = vld [vmem:[#allocation2 + $0x498] sm:$0xff] }
 0x2bb   : > { %2541 = vmatprep.subr.mxu1 %v2486_v30  ;;  %2194 = vmatprep.mubr.f32.mxu0 %v6319_v41  ;;  %v2660_v30 = vld [vmem:[#allocation2 + $0x4b8] sm:$0xff] }
 0x2bc   : > { %2375 = vmatprep.subr.mxu0 %v2324_v8  ;;  %2542 = vmatpush1.msra.mxu1 %v2485_v48  ;;  %v2659_v8 = vld [vmem:[#allocation2 + $0x4b0] sm:$0xff]  ;;  %v2348_v48 = vsel %vm2341_vm5, %v2345_v51, %v2347_v11 }
 0x2bd   : > { %2195 = vmatmul.mubr.f32.gmra.mxu0 %v2099_v54  ;;  %2301 = vmatprep.mubr.f32.mxu1 %v6319_v41  ;;  %v2657_v54 = vld [vmem:[#allocation2 + $0x4a0] sm:$0xff] }
 0x2be   : > { %2376 = vmatpush1.msra.mxu0 %v2323_v0  ;;  %2543 = vmatprep.subr.mxu1 %v2484_v53  ;;  %v2349_v0 = vrot.slane %v5679_v22, 2  ;;  %v2514_v53 = vsel %vm2505_vm4, %v2511_v26, %v2513_v55  ;;  %v2654_v22 = vld [vmem:[#allocation2 + $0x488] sm:$0xff] }
 0x2bf   : > { %2302 = vmatmul.mubr.f32.gmra.mxu1 %v5677_v16  ;;  %2377 = vmatprep.subr.mxu0 %v2322_v15  ;;  %v2515_v15 = vrot.slane %v5677_v16, 3 }
 0x2c0   : > { %2544 = vmatpush1.msra.mxu1 %v2483_v50  ;;  %2378 = vmatpush1.msra.mxu0 %v2321_v32  ;;  %v2655_v50 = vld [vmem:[#allocation2 + $0x490] sm:$0xff]  ;;  %v2350_v32 = vsel %vm2341_vm5, %v2347_v11, %v2349_v0 }
 0x2c1   : > { %2545 = vmatprep.subr.mxu1 %v2482_v35  ;;  %2200 = vmatprep.mubr.f32.mxu0 %v6319_v41  ;;  %v2516_v35 = vsel %vm2505_vm4, %v2513_v55, %v2515_v15 }
 0x2c2   : > { %2379 = vmatprep.subr.mxu0 %v2320_v36  ;;  %2546 = vmatpush1.msra.mxu1 %v2481_v29  ;;  %v2653_v36 = vld [vmem:[#allocation2 + $0x480] sm:$0xff]  ;;  %v2351_v29 = vrot.slane %v5677_v16, 2 }
 0x2c3   : > { %2201 = vmatmul.mubr.f32.gmra.mxu0 %v2098_v49  ;;  %2547 = vmatprep.subr.mxu1 %v2480_v43  ;;  %v2658_v49 = vld [vmem:[#allocation2 + $0x4a8] sm:$0xff]  ;;  %v2652_v43 = vld [vmem:[#allocation2 + $0x478] sm:$0xff] }
 0x2c4   : > { %2380 = vmatpush1.msra.mxu0 %v2319_v60  ;;  %2548 = vmatpush1.msra.mxu1 %v2479_v58  ;;  %v2651_v60 = vld [vmem:[#allocation2 + $0x470] sm:$0xff]  ;;  %v2352_v58 = vsel %vm2341_vm5, %v2349_v0, %v2351_v29 }
 0x2c5   : > { %2381 = vmatprep.subr.mxu0 %v2318_v59  ;;  %2549 = vmatprep.subr.mxu1 %v2478_v63  ;;  %v2650_v59 = vld [vmem:[#allocation2 + $0x468] sm:$0xff]  ;;  %v2649_v63 = vld [vmem:[#allocation2 + $0x460] sm:$0xff] }
 0x2c6   : > { %2382 = vmatpush1.msra.mxu0 %v2317_v1  ;;  %2550 = vmatpush1.msra.mxu1 %v2477_v6  ;;  %v2648_v1 = vld [vmem:[#allocation2 + $0x458] sm:$0xff]  ;;  %v2647_v6 = vld [vmem:[#allocation2 + $0x450] sm:$0xff] }
 0x2c7   : > { %2383 = vmatprep.subr.mxu0 %v2316_v4  ;;  %2551 = vmatprep.subr.mxu1 %v2476_v19  ;;  %v2646_v4 = vld [vmem:[#allocation2 + $0x448] sm:$0xff]  ;;  %v2645_v19 = vld [vmem:[#allocation2 + $0x440] sm:$0xff] }
 0x2c8   : > { %2384 = vmatpush1.msra.mxu0 %v2315_v7  ;;  %2552 = vmatpush1.msra.mxu1 %v2475_v57  ;;  %v2644_v7 = vld [vmem:[#allocation2 + $0x438] sm:$0xff]  ;;  %v2643_v57 = vld [vmem:[#allocation2 + $0x430] sm:$0xff] }
 0x2c9   : > { %2385 = vmatprep.subr.mxu0 %v2314_v45  ;;  %2553 = vmatprep.subr.mxu1 %v2474_v61  ;;  %v2642_v45 = vld [vmem:[#allocation2 + $0x428] sm:$0xff]  ;;  %v2641_v61 = vld [vmem:[#allocation2 + $0x420] sm:$0xff] }
 0x2ca   : > { %2386 = vmatpush1.msra.mxu0 %v2313_v52  ;;  %2554 = vmatpush1.msra.mxu1 %v2473_v34  ;;  %v2640_v52 = vld [vmem:[#allocation2 + $0x418] sm:$0xff]  ;;  %v2639_v34 = vld [vmem:[#allocation2 + $0x410] sm:$0xff] }
 0x2cb   : > { %2387 = vmatprep.subr.mxu0 %v2312_v28  ;;  %2587 = vmatprep.mubr.f32.mxu1 %v6319_v41  ;;  %v2637_v28 = vld [vmem:[#allocation2 + $0x400] sm:$0xff] }
 0x2cc   : > { %2388 = vmatpush1.msra.mxu0 %v2311_v9  ;;  %2588 = vmatmul.mubr.f32.vlgmr.msra.gmra.mxu1 %v2508_v27 }
 0x2cd   : > { %2389 = vmatprep.subr.mxu0 %v2310_v38  ;;  %2423 = vmatprep.mubr.f32.mxu0 %v6319_v41 }
 0x2ce   : > { %2390 = vmatpush1.msra.mxu0 %v2309_v23  ;;  %2593 = vmatprep.mubr.f32.mxu1 %v6319_v41 }
 0x2cf   : > { %2424 = vmatmul.mubr.f32.vlgmr.msra.gmra.mxu0 %v2344_v14  ;;  %2686 = vmatprep.subr.mxu0 %v2668_v62 }
 0x2d0   : > { %2594 = vmatmul.mubr.f32.gmra.mxu1 %v2510_v56  ;;  %2687 = vmatpush1.msra.mxu0 %v2667_v44 }
 0x2d1   : > { %2688 = vmatprep.subr.mxu0 %v2666_v5  ;;  %2429 = vmatprep.mubr.f32.mxu0 %v6319_v41 }
 0x2d2   : > { %2689 = vmatpush1.msra.mxu0 %v2665_v33  ;;  %2599 = vmatprep.mubr.f32.mxu1 %v6319_v41 }
 0x2d3   : > { %2430 = vmatmul.mubr.f32.gmra.mxu0 %v2346_v21  ;;  %2690 = vmatprep.subr.mxu0 %v2664_v20 }
 0x2d4   : > { %2600 = vmatmul.mubr.f32.gmra.mxu1 %v2512_v47  ;;  %2691 = vmatpush1.msra.mxu0 %v2663_v18 }
 0x2d5   : > { %2692 = vmatprep.subr.mxu0 %v2662_v3  ;;  %2435 = vmatprep.mubr.f32.mxu0 %v6319_v41 }
 0x2d6   : > { %2693 = vmatpush1.msra.mxu0 %v2661_v17  ;;  %2605 = vmatprep.mubr.f32.mxu1 %v6319_v41 }
 0x2d7   : > { %2436 = vmatmul.mubr.f32.gmra.mxu0 %v2348_v48  ;;  %2694 = vmatprep.subr.mxu0 %v2660_v30 }
 0x2d8   : > { %2606 = vmatmul.mubr.f32.gmra.mxu1 %v2514_v53  ;;  %2695 = vmatpush1.msra.mxu0 %v2659_v8 }
 0x2d9   : > { %2696 = vmatprep.subr.mxu0 %v2658_v49  ;;  %2441 = vmatprep.mubr.f32.mxu0 %v6319_v41 }
 0x2da   : > { %2697 = vmatpush1.msra.mxu0 %v2657_v54  ;;  %2611 = vmatprep.mubr.f32.mxu1 %v6319_v41 }
 0x2db   : > { %2442 = vmatmul.mubr.f32.gmra.mxu0 %v2350_v32  ;;  %2698 = vmatprep.subr.mxu0 %v2656_v12 }
 0x2dc   : > { %2612 = vmatmul.mubr.f32.gmra.mxu1 %v2516_v35  ;;  %2699 = vmatpush1.msra.mxu0 %v2655_v50 }
 0x2dd   : > { %2700 = vmatprep.subr.mxu0 %v2654_v22  ;;  %2447 = vmatprep.mubr.f32.mxu0 %v6319_v41 }
 0x2de   : > { %2701 = vmatpush1.msra.mxu0 %v2653_v36  ;;  %2617 = vmatprep.mubr.f32.mxu1 %v6319_v41 }
 0x2df   : > { %2448 = vmatmul.mubr.f32.gmra.mxu0 %v2352_v58  ;;  %2702 = vmatprep.subr.mxu0 %v2652_v43 }
 0x2e0   : > { %2618 = vmatmul.mubr.f32.gmra.mxu1 %v2515_v15  ;;  %2703 = vmatpush1.msra.mxu0 %v2651_v60 }
 0x2e1   : > { %2704 = vmatprep.subr.mxu0 %v2650_v59  ;;  %2453 = vmatprep.mubr.f32.mxu0 %v6319_v41 }
 0x2e2   : > { %2705 = vmatpush1.msra.mxu0 %v2649_v63 }
 0x2e3   : > { %2454 = vmatmul.mubr.f32.gmra.mxu0 %v2351_v29  ;;  %2706 = vmatprep.subr.mxu0 %v2648_v1 }
 0x2e4   : > { %2707 = vmatpush1.msra.mxu0 %v2647_v6  ;;  %2750 = vmatprep.mubr.f32.mxu0 %v6319_v41 }
 0x2e5   : > { %2708 = vmatprep.subr.mxu0 %v2646_v4 }
 0x2e6   : > { %2709 = vmatpush1.msra.mxu0 %v2645_v19 }
 0x2e7   : > { %2710 = vmatprep.subr.mxu0 %v2644_v7 }
 0x2e8   : > { %2711 = vmatpush1.msra.mxu0 %v2643_v57 }
 0x2e9   : > { %2712 = vmatprep.subr.mxu0 %v2642_v45 }
 0x2ea   : > { %2713 = vmatpush1.msra.mxu0 %v2641_v61 }
 0x2eb   : > { %2714 = vmatprep.subr.mxu0 %v2640_v52 }
 0x2ec   : > { %2715 = vmatpush1.msra.mxu0 %v2639_v34 }
 0x2ed   : > { %2716 = vmatprep.subr.mxu0 %v2638_v24 }
 0x2ee   : > { %2717 = vmatpush1.msra.mxu0 %v2637_v28 }
 0x2ef   : > { %2751 = vmatmul.mubr.f32.vlgmr.msra.gmra.mxu0 %v5672_v37  ;;  %4421 = vmatprep.subr.mxu0 %v6319_v41  ;;  %v2824_v37 = vld [vmem:[%s6288_s7] sm:$0xff] }
 0x2f0   : > { %2756 = vmatprep.mubr.f32.mxu0 %v6319_v41  ;;  %4389 = vmatprep.mubr.msk.f32.mxu1 %vm2826_vm6, %v2824_v37 }
 0x2f3   : > { %2757 = vmatmul.mubr.f32.gmra.mxu0 %v5686_v46 }
 0x2f4   : > { %2762 = vmatprep.mubr.f32.mxu0 %v6319_v41 }
 0x2f7   : > { %2763 = vmatmul.mubr.f32.gmra.mxu0 %v5689_v2 }
 0x2f8   : > { %2768 = vmatprep.mubr.f32.mxu0 %v6319_v41 }
 0x2fb   : > { %2769 = vmatmul.mubr.f32.gmra.mxu0 %v5696_v25 }
 0x2fc   : > { %2774 = vmatprep.mubr.f32.mxu0 %v6319_v41 }
 0x2ff   : > { %2775 = vmatmul.mubr.f32.gmra.mxu0 %v5701_v39 }
 0x300   : > { %2780 = vmatprep.mubr.f32.mxu0 %v6319_v41 }
 0x303   : > { %2781 = vmatmul.mubr.f32.gmra.mxu0 %v2678_v10 }
 0x304   : > { %4453 = vmatprep.mubr.msk.f32.mxu0 %vm4784_vm7, %v6319_v41 }
 0x362   : > { %v2273_v9 = vpop.f32.mrf.mxu1 }
 0x364   : > { %v2275_v42 = vpop.f32.mrf.mxu1 }
 0x365   : > { %v2172_v46 = vpop.f32.mrf.mxu0 }
 0x366   : > { %v2274_v32 = vadd.f32 %v2273_v9, %v2172_v46 }
 0x367   : > { %v2174_v2 = vpop.f32.mrf.mxu0  ;;  %v2279_v40 = vpop.f32.mrf.mxu1 }
 0x368   : > { %v2276_v22 = vadd.f32 %v2275_v42, %v2174_v2 }
 0x369   : > { %v2281_v27 = vpop.f32.mrf.mxu1 }
 0x36b   : > { %v2178_v25 = vpop.f32.mrf.mxu0 }
 0x36c   : > { %v2280_v60 = vadd.f32 %v2279_v40, %v2178_v25 }
 0x36d   : > { %v2180_v38 = vpop.f32.mrf.mxu0  ;;  %v5774_v16 = vpop.f32.mrf.mxu1 }
 0x36e   : > { %v2282_v58 = vadd.f32 %v2281_v27, %v2180_v38 }
 0x36f   : > { %v5778_v31 = vpop.f32.mrf.mxu1 }
 0x371   : > { %v5770_v39 = vpop.f32.mrf.mxu0 }
 0x373   : > { %v5772_v23 = vpop.f32.mrf.mxu0  ;;  %v2291_v62 = vpop.f32.mrf.mxu1 }
 0x375   : > { %v2293_v14 = vpop.f32.mrf.mxu1 }
 0x377   : > { %v5776_v10 = vpop.f32.mrf.mxu0 }
 0x379   : > { %v2192_v13 = vpop.f32.mrf.mxu0  ;;  %v2297_v51 = vpop.f32.mrf.mxu1 }
 0x37b   : > { %v2299_v33 = vpop.f32.mrf.mxu1 }
 0x37d   : > { %v2196_v44 = vpop.f32.mrf.mxu0 }
 0x37f   : > { %v2198_v5 = vpop.f32.mrf.mxu0  ;;  %v2303_v18 = vpop.f32.mrf.mxu1 }
 0x380   : > { %v2300_v40 = vadd.f32 %v2299_v33, %v2198_v5 }
 0x381   : > { %v2305_v47 = vpop.f32.mrf.mxu1 }
 0x383   : > { %v2202_v56 = vpop.f32.mrf.mxu0 }
 0x385   : > { %v2204_v20 = vpop.f32.mrf.mxu0 }
 0x38c   : > { %v2589_v55 = vpop.f32.mrf.mxu1 }
 0x38e   : > { %v2591_v8 = vpop.f32.mrf.mxu1 }
 0x38f   : > { %v2425_v26 = vpop.f32.mrf.mxu0 }
 0x390   : > { %v2595_v0 = vpop.f32.mrf.mxu1  ;;  %v2460_v36 = vadd.f32 %v2425_v26, %v2274_v32  ;;  %v2306_v32 = vadd.f32 %v2305_v47, %v2204_v20 }
 0x391   : > { %v2427_v21 = vpop.f32.mrf.mxu0 }
 0x392   : > { %v2597_v54 = vpop.f32.mrf.mxu1  ;;  %v2461_v29 = vadd.f32 %v2427_v21, %v2276_v22  ;;  %v2624_v4 = vadd.f32 %v2589_v55, %v2460_v36  ;;  %v2294_v21 = vadd.f32 %v2293_v14, %v2192_v13  ;;  %v2288_v55 = vadd.f32 %v5778_v31, %v5772_v23 }
 0x393   : > { %v2431_v3 = vpop.f32.mrf.mxu0 }
 0x394   : > { %v5780_v15 = vpop.f32.mrf.mxu1  ;;  %v2462_v1 = vadd.f32 %v2431_v3, %v2280_v60  ;;  %v2625_v19 = vadd.f32 %v2591_v8, %v2461_v29  ;;  %v2298_v3 = vadd.f32 %v2297_v51, %v2196_v44  ;;  %v2292_v8 = vadd.f32 %v2291_v62, %v5776_v10 }
 0x395   : > { %v2433_v17 = vpop.f32.mrf.mxu0  ;;  %v2286_v29 = vadd.f32 %v5774_v16, %v5770_v39 }
 0x396   : > { %v2603_v35 = vpop.f32.mrf.mxu1  ;;  %v2463_v6 = vadd.f32 %v2433_v17, %v2282_v58  ;;  %v2626_v24 = vadd.f32 %v2595_v0, %v2462_v1 }
 0x397   : > { %v2437_v11 = vpop.f32.mrf.mxu0 }
 0x398   : > { %v2607_v59 = vpop.f32.mrf.mxu1  ;;  %v2627_v28 = vadd.f32 %v2597_v54, %v2463_v6  ;;  %v2304_v54 = vadd.f32 %v2303_v18, %v2202_v56  ;;  %v2464_v51 = vadd.f32 %v2437_v11, %v2286_v29 }
 0x399   : > { %v2439_v30 = vpop.f32.mrf.mxu0 }
 0x39a   : > { %v2609_v61 = vpop.f32.mrf.mxu1  ;;  %v2465_v60 = vadd.f32 %v2439_v30, %v2288_v55  ;;  %v2628_v16 = vadd.f32 %v5780_v15, %v2464_v51  ;;  %v4084_v55 = vld [vmem:[%s6290_s9 + $0xb8] sm:$0xff]  ;;  %v3085_v51 = vld [vmem:[%s6290_s9 + $0x70] sm:$0xff] }
 0x39b   : > { %v2443_v48 = vpop.f32.mrf.mxu0 }
 0x39c   : > { %v2613_v9 = vpop.f32.mrf.mxu1  ;;  %v2466_v5 = vadd.f32 %v2443_v48, %v2292_v8  ;;  %v2629_v56 = vadd.f32 %v2603_v35, %v2465_v60  ;;  %v4067_v35 = vld [vmem:[%s6287_s6] ss:$0 sm:$0xff]  ;;  %v4083_v8 = vld [vmem:[%s6290_s9 + $0xb0] sm:$0xff] }
 0x39d   : > { %v2445_v49 = vpop.f32.mrf.mxu0 }
 0x39e   : > { %v2615_v27 = vpop.f32.mrf.mxu1  ;;  %v2467_v22 = vadd.f32 %v2445_v49, %v2294_v21  ;;  %v2630_v20 = vadd.f32 %v2607_v59, %v2466_v5  ;;  %v4087_v21 = vld [vmem:[%s6290_s9 + $0xd0] sm:$0xff] }
 0x39f   : > { %v2449_v53 = vpop.f32.mrf.mxu0 }
 0x3a0   : > { %v2468_v36 = vadd.f32 %v2449_v53, %v2298_v3  ;;  %v2619_v33 = vpop.f32.mrf.mxu1  ;;  %v2631_v23 = vadd.f32 %v2609_v61, %v2467_v22  ;;  %v4086_v3 = vld [vmem:[%s6290_s9 + $0xc8] sm:$0xff]  ;;  %v4079_v22 = vld [vmem:[%s6290_s9 + $0x90] sm:$0xff] }
 0x3a1   : > { %v2451_v12 = vpop.f32.mrf.mxu0 }
 0x3a2   : > { %v2469_v17 = vadd.f32 %v2451_v12, %v2300_v40  ;;  %v2632_v31 = vadd.f32 %v2613_v9, %v2468_v36  ;;  %v2621_v62 = vpop.f32.mrf.mxu1  ;;  %v4090_v40 = vld [vmem:[%s6290_s9 + $0xe8] sm:$0xff] }
 0x3a3   : > { %v2455_v50 = vpop.f32.mrf.mxu0 }
 0x3a4   : > { %v2470_v13 = vadd.f32 %v2455_v50, %v2304_v54  ;;  %v2633_v14 = vadd.f32 %v2615_v27, %v2469_v17  ;;  %v4089_v27 = vld [vmem:[%s6290_s9 + $0xe0] sm:$0xff] }
 0x3a5   : > { %v2457_v43 = vpop.f32.mrf.mxu0  ;;  %v4085_v17 = vld [vmem:[%s6290_s9 + $0xc0] sm:$0xff] }
 0x3a6   : > { %v2471_v44 = vadd.f32 %v2457_v43, %v2306_v32  ;;  %v2634_v53 = vadd.f32 %v2619_v33, %v2470_v13  ;;  %v4081_v54 = vld [vmem:[%s6290_s9 + $0xa0] sm:$0xff]  ;;  %v4080_v32 = vld [vmem:[%s6290_s9 + $0x98] sm:$0xff] }
 0x3a7   : > { %v2996_v13 = vld [vmem:[%s6292_s11] sm:$0xf] }
 0x3a8   : > { %v2635_v39 = vadd.f32 %v2621_v62, %v2471_v44  ;;  %v4075_v44 = vld [vmem:[%s6292_s11 + $0x4] sm:$0xf]  ;;  %v3080_v62 = vld [vmem:[%s6290_s9 + $0x48] sm:$0xff] }
 0x3af   : > { %v2752_v63 = vpop.f32.mrf.mxu0 }
 0x3b0   : > { %v5782_v57 = vadd.f32 %v2752_v63, %v2624_v4 }
 0x3b1   : > { %v2754_v7 = vpop.f32.mrf.mxu0 }
 0x3b2   : > { %v5784_v45 = vadd.f32 %v2754_v7, %v2625_v19 }
 0x3b3   : > { %v2758_v52 = vpop.f32.mrf.mxu0 }
 0x3b4   : > { %v2799_v34 = vmax.f32 %v5782_v57, %v5784_v45  ;;  %v2789_v46 = vadd.f32 %v2758_v52, %v2626_v24  ;;  %v2912_v57 = vld [vmem:[%s6289_s8 + $0x8] sm:$0xff]  ;;  %v4092_v45 = vld [vmem:[%s6290_s9 + $0xf8] sm:$0xff] }
 0x3b5   : > { %v2760_v37 = vpop.f32.mrf.mxu0  ;;  %4422 = vmatpush3.msra.mxu0 %v4092_v45  ;;  %v4126_v45 = vld [vmem:[%s6290_s9 + $0x1e8] sm:$0xff] }
 0x3b6   : > { %v2790_v2 = vadd.f32 %v2760_v37, %v2627_v28  ;;  %4423 = vmatprep.subr.mxu0 %v6319_v41 }
 0x3b7   : > { %v2764_v25 = vpop.f32.mrf.mxu0 }
 0x3b8   : > { %v2800_v42 = vmax.f32 %v2789_v46, %v2790_v2  ;;  %v2791_v1 = vadd.f32 %v2764_v25, %v2628_v16  ;;  %v2812_v46 = vadd.f32 %v4067_v35, %v2799_v34  ;;  %v4091_v34 = vld [vmem:[%s6290_s9 + $0xf0] sm:$0xff]  ;;  %v3072_v16 = vld [vmem:[%s6290_s9 + $0x8] sm:$0xff] }
 0x3b9   : > { %v2766_v38 = vpop.f32.mrf.mxu0  ;;  %4424 = vmatpush3.msra.mxu0 %v4091_v34  ;;  %v4125_v34 = vld [vmem:[%s6290_s9 + $0x1e0] sm:$0xff] }
 0x3ba   : > { %v2792_v30 = vadd.f32 %v2766_v38, %v2629_v56  ;;  %v2813_v28 = vadd.f32 %v4067_v35, %v2800_v42  ;;  %v2818_v25 = vmax.f32 %v2812_v46, 0.0  ;;  %v2825_v42 = vld [vmem:[%s6288_s7 + $0x8] sm:$0xff]  ;;  %v2911_v38 = vld [vmem:[%s6289_s8] sm:$0xff]  ;;  %4425 = vmatprep.subr.mxu0 %v6319_v41 }
 0x3bb   : > { %v2770_v26 = vpop.f32.mrf.mxu0  ;;  %4426 = vmatpush3.msra.mxu0 %v4090_v40  ;;  %v3079_v56 = vld [vmem:[%s6290_s9 + $0x40] sm:$0xff]  ;;  %v4124_v40 = vld [vmem:[%s6290_s9 + $0x1d8] sm:$0xff] }
 0x3bc   : > { %v2793_v50 = vadd.f32 %v2770_v26, %v2630_v20  ;;  %v2801_v59 = vmax.f32 %v2791_v1, %v2792_v30  ;;  %v2819_v9 = vmax.f32 %v2813_v28, 0.0  ;;  %4427 = vmatprep.subr.mxu0 %v6319_v41  ;;  %v4088_v26 = vld [vmem:[%s6290_s9 + $0xd8] sm:$0xff]  ;;  %v4078_v30 = vld [vmem:[%s6290_s9 + $0x88] sm:$0xff]  ;;  %v4101_v28 = vld [vmem:[%s6290_s9 + $0x130] sm:$0xff] }
 0x3bd   : > { %v2772_v0 = vpop.f32.mrf.mxu0  ;;  %4428 = vmatpush3.msra.mxu0 %v4089_v27  ;;  %v3078_v20 = vld [vmem:[%s6290_s9 + $0x38] sm:$0xff]  ;;  %v4093_v1 = vld [vmem:[%s6292_s11 + $0x8] sm:$0xf]  ;;  %v4099_v46 = vld [vmem:[%s6290_s9 + $0x120] sm:$0xff] }
 0x3be   : > { %v2794_v47 = vadd.f32 %v2772_v0, %v2631_v23  ;;  %v2814_v24 = vadd.f32 %v4067_v35, %v2801_v59  ;;  %4429 = vmatprep.subr.mxu0 %v6319_v41  ;;  %v4082_v0 = vld [vmem:[%s6290_s9 + $0xa8] sm:$0xff]  ;;  %v3083_v23 = vld [vmem:[%s6290_s9 + $0x60] sm:$0xff]  ;;  %v4123_v27 = vld [vmem:[%s6290_s9 + $0x1d0] sm:$0xff] }
 0x3bf   : > { %v2776_v58 = vpop.f32.mrf.mxu0  ;;  %4430 = vmatpush3.msra.mxu0 %v4088_v26  ;;  %v4108_v59 = vld [vmem:[%s6290_s9 + $0x168] sm:$0xff] }
 0x3c0   : > { %v2795_v49 = vadd.f32 %v2776_v58, %v2632_v31  ;;  %v2802_v6 = vmax.f32 %v2793_v50, %v2794_v47  ;;  %v2820_v2 = vmax.f32 %v2814_v24, 0.0  ;;  %4431 = vmatprep.subr.mxu0 %v6319_v41  ;;  %v3082_v31 = vld [vmem:[%s6290_s9 + $0x58] sm:$0xff]  ;;  %v3076_v47 = vld [vmem:[%s6290_s9 + $0x28] sm:$0xff]  ;;  %v4077_v50 = vld [vmem:[%s6290_s9 + $0x80] sm:$0xff] }
 0x3c1   : > { %v2778_v12 = vpop.f32.mrf.mxu0  ;;  %4432 = vmatpush3.msra.mxu0 %v4087_v21  ;;  %v4103_v24 = vld [vmem:[%s6290_s9 + $0x140] sm:$0xff]  ;;  %v4122_v26 = vld [vmem:[%s6290_s9 + $0x1c8] sm:$0xff] }
 0x3c2   : > { %v2796_v10 = vadd.f32 %v2778_v12, %v2633_v14  ;;  %v2815_v61 = vadd.f32 %v4067_v35, %v2802_v6  ;;  %4433 = vmatprep.subr.mxu0 %v6319_v41  ;;  %v3086_v14 = vld [vmem:[%s6290_s9 + $0x78] sm:$0xff]  ;;  %v3084_v12 = vld [vmem:[%s6290_s9 + $0x68] sm:$0xff]  ;;  %v4121_v21 = vld [vmem:[%s6290_s9 + $0x1c0] sm:$0xff] }
 0x3c3   : > { %v2782_v18 = vpop.f32.mrf.mxu0  ;;  %4434 = vmatpush3.msra.mxu0 %v4086_v3  ;;  %v4120_v3 = vld [vmem:[%s6290_s9 + $0x1b8] sm:$0xff] }
 0x3c4   : > { %v2803_v43 = vmax.f32 %v2795_v49, %v2796_v10  ;;  %v2797_v63 = vadd.f32 %v2782_v18, %v2634_v53  ;;  %v2821_v37 = vmax.f32 %v2815_v61, 0.0  ;;  %4435 = vmatprep.subr.mxu0 %v6319_v41  ;;  %v3081_v10 = vld [vmem:[%s6290_s9 + $0x50] sm:$0xff]  ;;  %v3075_v49 = vld [vmem:[%s6290_s9 + $0x20] sm:$0xff]  ;;  %v3074_v53 = vld [vmem:[%s6290_s9 + $0x18] sm:$0xff] }
 0x3c5   : > { %v2784_v48 = vpop.f32.mrf.mxu0  ;;  %4436 = vmatpush3.msra.mxu0 %v4085_v17  ;;  %v3077_v18 = vld [vmem:[%s6290_s9 + $0x30] sm:$0xff] }
 0x3c6   : > { %v2798_v11 = vadd.f32 %v2784_v48, %v2635_v39  ;;  %v2816_v19 = vadd.f32 %v4067_v35, %v2803_v43  ;;  %4437 = vmatprep.subr.mxu0 %v6319_v41  ;;  %v3073_v39 = vld [vmem:[%s6290_s9 + $0x10] sm:$0xff]  ;;  %v3071_v48 = vld [vmem:[%s6290_s9] sm:$0xff] }
 0x3c7   : > { %4438 = vmatpush3.msra.mxu0 %v4084_v55  ;;  %v4105_v61 = vld [vmem:[%s6290_s9 + $0x150] sm:$0xff]  ;;  %v4118_v55 = vld [vmem:[%s6290_s9 + $0x1a8] sm:$0xff] }
 0x3c8   : > { %v2804_v4 = vmax.f32 %v2797_v63, %v2798_v11  ;;  %v2822_v15 = vmax.f32 %v2816_v19, 0.0  ;;  %4439 = vmatprep.subr.mxu0 %v6319_v41  ;;  %v4107_v19 = vld [vmem:[%s6290_s9 + $0x160] sm:$0xff]  ;;  %v4119_v17 = vld [vmem:[%s6290_s9 + $0x1b0] sm:$0xff] }
 0x3c9   : > { %4440 = vmatpush3.msra.mxu0 %v4083_v8  ;;  %v4117_v8 = vld [vmem:[%s6290_s9 + $0x1a0] sm:$0xff] }
 0x3ca   : > { %v2817_v7 = vadd.f32 %v4067_v35, %v2804_v4  ;;  %4441 = vmatprep.subr.mxu0 %v6319_v41  ;;  %v4110_v4 = vld [vmem:[%s6290_s9 + $0x178] sm:$0xff]  ;;  %v4109_v35 = vld [vmem:[%s6290_s9 + $0x170] sm:$0xff] }
 0x3cb   : > { %4442 = vmatpush3.msra.mxu0 %v4082_v0  ;;  %v4116_v0 = vld [vmem:[%s6290_s9 + $0x198] sm:$0xff] }
 0x3cc   : > { %v2823_v52 = vmax.f32 %v2817_v7, 0.0  ;;  %4443 = vmatprep.subr.mxu0 %v6319_v41  ;;  %v4106_v7 = vld [vmem:[%s6290_s9 + $0x158] sm:$0xff] }
 0x3cd   : > { %4444 = vmatpush3.msra.mxu0 %v4081_v54 }
 0x3ce   : > { %4377 = vmatprep.subr.msk.mxu1 %vm623_vm0, %v2823_v52  ;;  %4445 = vmatprep.subr.mxu0 %v6319_v41 }
 0x3cf   : > { %4378 = vmatpush3.msk.msra.mxu1 %vm623_vm0, %v2823_v52  ;;  %4446 = vmatpush3.msra.mxu0 %v4080_v32 }
 0x3d0   : > { %4379 = vmatprep.subr.mxu1 %v2822_v15  ;;  %4447 = vmatprep.subr.mxu0 %v6319_v41 }
 0x3d1   : > { %4380 = vmatpush3.msra.mxu1 %v2822_v15  ;;  %4448 = vmatpush3.msra.mxu0 %v4079_v22 }
 0x3d2   : > { %4381 = vmatprep.subr.mxu1 %v2821_v37  ;;  %4449 = vmatprep.subr.mxu0 %v6319_v41 }
 0x3d3   : > { %4382 = vmatpush3.msra.mxu1 %v2821_v37  ;;  %4450 = vmatpush3.msra.mxu0 %v4078_v30 }
 0x3d4   : > { %4383 = vmatprep.subr.mxu1 %v2820_v2  ;;  %4451 = vmatprep.subr.mxu0 %v6319_v41 }
 0x3d5   : > { %4384 = vmatpush3.msra.mxu1 %v2820_v2  ;;  %4452 = vmatpush3.msra.mxu0 %v4077_v50  ;;  %v3656_v50 = vld [vmem:[%s6293_s12 + $0x10] sm:$0xff] }
 0x3d6   : > { %4385 = vmatprep.subr.mxu1 %v2819_v9  ;;  %4491 = vmatprep.subr.mxu0 %v6319_v41 }
 0x3d7   : > { %4386 = vmatpush3.msra.mxu1 %v2819_v9 }
 0x3d8   : > { %4387 = vmatprep.subr.mxu1 %v2818_v25 }
 0x3d9   : > { %4388 = vmatpush3.msra.mxu1 %v2818_v25 }
 0x3da   : > { %4392 = vmatprep.subr.msk.mxu1 %vm623_vm0, %v2823_v52  ;;  %4390 = vmatmul.mubr.msk.f32.vlgmr.msra.gmra.mxu1 %vm2826_vm6, %v2825_v42  ;;  %v4095_v42 = vld [vmem:[%s6290_s9 + $0x100] sm:$0xff] }
 0x3db   : > { %4393 = vmatpush3.msk.msra.mxu1 %vm623_vm0, %v2823_v52  ;;  %4404 = vmatprep.mubr.msk.f32.mxu1 %vm2826_vm6, %v2911_v38  ;;  %v4104_v52 = vld [vmem:[%s6290_s9 + $0x148] sm:$0xff]  ;;  %v4128_v38 = vld [vmem:[%s6290_s9 + $0x1f8] sm:$0xff] }
 0x3dc   : > { %4394 = vmatprep.subr.mxu1 %v2822_v15 }
 0x3dd   : > { %4395 = vmatpush3.msra.mxu1 %v2822_v15  ;;  %v4102_v15 = vld [vmem:[%s6290_s9 + $0x138] sm:$0xff] }
 0x3de   : > { %4396 = vmatprep.subr.mxu1 %v2821_v37 }
 0x3df   : > { %4397 = vmatpush3.msra.mxu1 %v2821_v37  ;;  %v4100_v37 = vld [vmem:[%s6290_s9 + $0x128] sm:$0xff] }
 0x3e0   : > { %4398 = vmatprep.subr.mxu1 %v2820_v2 }
 0x3e1   : > { %4399 = vmatpush3.msra.mxu1 %v2820_v2  ;;  %v4098_v2 = vld [vmem:[%s6290_s9 + $0x118] sm:$0xff] }
 0x3e2   : > { %4400 = vmatprep.subr.mxu1 %v2819_v9 }
 0x3e3   : > { %4401 = vmatpush3.msra.mxu1 %v2819_v9  ;;  %v4097_v9 = vld [vmem:[%s6290_s9 + $0x110] sm:$0xff] }
 0x3e4   : > { %4402 = vmatprep.subr.mxu1 %v2818_v25 }
 0x3e5   : > { %4403 = vmatpush3.msra.mxu1 %v2818_v25  ;;  %v4096_v25 = vld [vmem:[%s6290_s9 + $0x108] sm:$0xff] }
 0x3e6   : > { %4405 = vmatmul.mubr.msk.f32.vlgmr.msra.gmra.mxu1 %vm2826_vm6, %v2912_v57  ;;  %4407 = vmatprep.subr.mxu1 %v6319_v41  ;;  %v4127_v57 = vld [vmem:[%s6290_s9 + $0x1f0] sm:$0xff] }
 0x3e7   : > { %4411 = vmatprep.mubr.msk.f32.mxu1 %vm4784_vm7, %v6319_v41 }
 0x49a   : > { %v4391_v36 = vpop.f32.mrf.mxu1 }
 0x49c   : > { %v2902_v29 = vpop.f32.mrf.mxu1 }
 0x4a6   : > { %v4406_v60 = vpop.f32.mrf.mxu1 }
 0x4a7   : > { %v5877_v5 = vmax.f32 %v4391_v36, %v4406_v60 }
 0x4a8   : > { %v2985_v33 = vpop.f32.mrf.mxu1 }
 0x4a9   : > { %v5879_v58 = vmax.f32 %v2902_v29, %v2985_v33  ;;  %4408 = vmatpush3.msra.mxu1 %v5877_v5  ;;  %v4111_v33 = vld [vmem:[%s6292_s11 + $0xc] sm:$0xf] }
 0x4aa   : > { %4409 = vmatprep.subr.mxu1 %v6319_v41 }
 0x4ab   : > { %4410 = vmatpush3.msra.mxu1 %v5879_v58 }
 0x4ac   : > { %4412 = vmatmul.mubr.msk.f32.vlgmr.msra.gmra.mxu1 %vm2997_vm8, %v2996_v13  ;;  %4414 = vmatprep.subr.mxu1 %v6319_v41 }
 0x4ad   : > { %4415 = vmatpush3.msra.mxu1 %v5877_v5  ;;  %4418 = vmatprep.mubr.msk.f32.mxu1 %vm4784_vm7, %v6319_v41 }
 0x4ae   : > { %4416 = vmatprep.subr.mxu1 %v6319_v41 }
 0x4af   : > { %4417 = vmatpush3.msra.mxu1 %v5879_v58 }
 0x4b0   : > { %4419 = vmatmul.mubr.msk.f32.vlgmr.msra.gmra.mxu1 %vm2997_vm8, %v4075_v44  ;;  %4456 = vmatprep.subr.mxu1 %v6319_v41  ;;  %v4114_v44 = vld [vmem:[%s6290_s9 + $0x188] sm:$0xff] }
 0x4b1   : > { %4457 = vmatpush3.msra.mxu1 %v3086_v14  ;;  %4488 = vmatprep.mubr.msk.f32.mxu1 %vm4784_vm7, %v6319_v41  ;;  %v3668_v14 = vld [vmem:[%s6293_s12 + $0x70] sm:$0xff] }
 0x4b2   : > { %4458 = vmatprep.subr.mxu1 %v6319_v41 }
 0x4b3   : > { %4459 = vmatpush3.msra.mxu1 %v3085_v51  ;;  %v3667_v51 = vld [vmem:[%s6293_s12 + $0x68] sm:$0xff] }
 0x4b4   : > { %4460 = vmatprep.subr.mxu1 %v6319_v41 }
 0x4b5   : > { %4461 = vmatpush3.msra.mxu1 %v3084_v12  ;;  %v3666_v12 = vld [vmem:[%s6293_s12 + $0x60] sm:$0xff] }
 0x4b6   : > { %4462 = vmatprep.subr.mxu1 %v6319_v41 }
 0x4b7   : > { %4463 = vmatpush3.msra.mxu1 %v3083_v23  ;;  %v3665_v23 = vld [vmem:[%s6293_s12 + $0x58] sm:$0xff] }
 0x4b8   : > { %4464 = vmatprep.subr.mxu1 %v6319_v41 }
 0x4b9   : > { %4465 = vmatpush3.msra.mxu1 %v3082_v31  ;;  %v3664_v31 = vld [vmem:[%s6293_s12 + $0x50] sm:$0xff] }
 0x4ba   : > { %4466 = vmatprep.subr.mxu1 %v6319_v41 }
 0x4bb   : > { %4467 = vmatpush3.msra.mxu1 %v3081_v10  ;;  %v3663_v10 = vld [vmem:[%s6293_s12 + $0x48] sm:$0xff] }
 0x4bc   : > { %4468 = vmatprep.subr.mxu1 %v6319_v41 }
 0x4bd   : > { %4469 = vmatpush3.msra.mxu1 %v3080_v62  ;;  %v3662_v62 = vld [vmem:[%s6293_s12 + $0x40] sm:$0xff] }
 0x4be   : > { %4470 = vmatprep.subr.mxu1 %v6319_v41 }
 0x4bf   : > { %4471 = vmatpush3.msra.mxu1 %v3079_v56  ;;  %v3661_v56 = vld [vmem:[%s6293_s12 + $0x38] sm:$0xff] }
 0x4c0   : > { %4472 = vmatprep.subr.mxu1 %v6319_v41 }
 0x4c1   : > { %4473 = vmatpush3.msra.mxu1 %v3078_v20  ;;  %v3660_v20 = vld [vmem:[%s6293_s12 + $0x30] sm:$0xff] }
 0x4c2   : > { %4474 = vmatprep.subr.mxu1 %v6319_v41 }
 0x4c3   : > { %4475 = vmatpush3.msra.mxu1 %v3077_v18  ;;  %v3659_v18 = vld [vmem:[%s6293_s12 + $0x28] sm:$0xff] }
 0x4c4   : > { %4476 = vmatprep.subr.mxu1 %v6319_v41 }
 0x4c5   : > { %4477 = vmatpush3.msra.mxu1 %v3076_v47  ;;  %v3658_v47 = vld [vmem:[%s6293_s12 + $0x20] sm:$0xff] }
 0x4c6   : > { %4478 = vmatprep.subr.mxu1 %v6319_v41 }
 0x4c7   : > { %4479 = vmatpush3.msra.mxu1 %v3075_v49 }
 0x4c8   : > { %4480 = vmatprep.subr.mxu1 %v6319_v41 }
 0x4c9   : > { %4481 = vmatpush3.msra.mxu1 %v3074_v53 }
 0x4ca   : > { %4482 = vmatprep.subr.mxu1 %v6319_v41 }
 0x4cb   : > { %4483 = vmatpush3.msra.mxu1 %v3073_v39 }
 0x4cc   : > { %4484 = vmatprep.subr.mxu1 %v6319_v41 }
 0x4cd   : > { %4485 = vmatpush3.msra.mxu1 %v3072_v16 }
 0x4ce   : > { %4486 = vmatprep.subr.mxu1 %v6319_v41 }
 0x4cf   : > { %4487 = vmatpush3.msra.mxu1 %v3071_v48  ;;  %v3657_v48 = vld [vmem:[%s6293_s12 + $0x18] sm:$0xff] }
 0x4d0   : > { %4540 = vmatprep.subr.mxu1 %v6319_v41 }
 0x56c   : > { %v3067_v43 = vpop.f32.mrf.mxu1 }
 0x56d   : > { %4489 = vmatmul.mubr.f32.vlgmr.msra.gmra.mxu1 %v3067_v43  ;;  %v3655_v43 = vld [vmem:[%s6293_s12 + $0x8] sm:$0xff] }
 0x56e   : > { %v4413_v63 = vpop.f32.mrf.mxu1  ;;  %4572 = vmatprep.mubr.msk.f32.mxu1 %vm4784_vm7, %v6319_v41  ;;  %4541 = vmatpush3.msra.mxu1 %v4128_v38 }
 0x56f   : > { %4542 = vmatprep.subr.mxu1 %v6319_v41  ;;  %v3654_v63 = vld [vmem:[%s6293_s12] sm:$0xff] }
 0x570   : > { %v3158_v11 = vpop.f32.mrf.mxu1  ;;  %4543 = vmatpush3.msra.mxu1 %v4127_v57 }
 0x571   : > { %4454 = vmatmul.mubr.f32.vlgmr.msra.gmra.mxu0 %v3158_v11  ;;  %4544 = vmatprep.subr.mxu1 %v6319_v41  ;;  %v3761_v11 = vld [vmem:[%s6295_s14 + $0x50] sm:$0xf] }
 0x572   : > { %4492 = vmatpush3.msra.mxu0 %v5877_v5  ;;  %4495 = vmatprep.mubr.msk.f32.mxu0 %vm4784_vm7, %v6319_v41  ;;  %v4420_v6 = vpop.f32.mrf.mxu1 }
 0x573   : > { %4493 = vmatprep.subr.mxu0 %v6319_v41  ;;  %4545 = vmatpush3.msra.mxu1 %v4126_v45  ;;  %v3759_v6 = vld [vmem:[%s6295_s14 + $0x40] sm:$0xff] }
 0x574   : > { %4494 = vmatpush3.msra.mxu0 %v5879_v58  ;;  %4546 = vmatprep.subr.mxu1 %v6319_v41 }
 0x575   : > { %4496 = vmatmul.mubr.msk.f32.vlgmr.msra.gmra.mxu0 %vm2997_vm8, %v4093_v1  ;;  %4498 = vmatprep.subr.mxu0 %v6319_v41  ;;  %v3760_v1 = vld [vmem:[%s6295_s14 + $0x48] sm:$0xff] }
 0x576   : > { %4499 = vmatpush3.msra.mxu0 %v4110_v4  ;;  %4530 = vmatprep.mubr.msk.f32.mxu0 %vm4784_vm7, %v6319_v41  ;;  %v3758_v4 = vld [vmem:[%s6295_s14 + $0x38] sm:$0xff] }
 0x577   : > { %4500 = vmatprep.subr.mxu0 %v6319_v41  ;;  %4547 = vmatpush3.msra.mxu1 %v4125_v34  ;;  %v4132_v34 = vld [vmem:[%s6296_s15] ss:$0 sm:$0xff] }
 0x578   : > { %4501 = vmatpush3.msra.mxu0 %v4109_v35  ;;  %4548 = vmatprep.subr.mxu1 %v6319_v41  ;;  %v3757_v35 = vld [vmem:[%s6295_s14 + $0x30] sm:$0xff] }
 0x579   : > { %4502 = vmatprep.subr.mxu0 %v6319_v41  ;;  %4549 = vmatpush3.msra.mxu1 %v4124_v40 }
 0x57a   : > { %4503 = vmatpush3.msra.mxu0 %v4108_v59  ;;  %4550 = vmatprep.subr.mxu1 %v6319_v41  ;;  %v3756_v59 = vld [vmem:[%s6295_s14 + $0x28] sm:$0xff] }
 0x57b   : > { %4504 = vmatprep.subr.mxu0 %v6319_v41  ;;  %4551 = vmatpush3.msra.mxu1 %v4123_v27 }
 0x57c   : > { %4505 = vmatpush3.msra.mxu0 %v4107_v19  ;;  %4552 = vmatprep.subr.mxu1 %v6319_v41  ;;  %v3755_v19 = vld [vmem:[%s6295_s14 + $0x20] sm:$0xff] }
 0x57d   : > { %4506 = vmatprep.subr.mxu0 %v6319_v41  ;;  %4553 = vmatpush3.msra.mxu1 %v4122_v26 }
 0x57e   : > { %4507 = vmatpush3.msra.mxu0 %v4106_v7  ;;  %4554 = vmatprep.subr.mxu1 %v6319_v41  ;;  %v3754_v7 = vld [vmem:[%s6295_s14 + $0x18] sm:$0xff] }
 0x57f   : > { %4508 = vmatprep.subr.mxu0 %v6319_v41  ;;  %4555 = vmatpush3.msra.mxu1 %v4121_v21 }
 0x580   : > { %4509 = vmatpush3.msra.mxu0 %v4105_v61  ;;  %4556 = vmatprep.subr.mxu1 %v6319_v41 }
 0x581   : > { %4510 = vmatprep.subr.mxu0 %v6319_v41  ;;  %4557 = vmatpush3.msra.mxu1 %v4120_v3 }
 0x582   : > { %4511 = vmatpush3.msra.mxu0 %v4104_v52  ;;  %4558 = vmatprep.subr.mxu1 %v6319_v41  ;;  %v4129_v52 = vld [vmem:[%s6291_s10] ss:$0 sm:$0xff] }
 0x583   : > { %4512 = vmatprep.subr.mxu0 %v6319_v41  ;;  %4559 = vmatpush3.msra.mxu1 %v4119_v17 }
 0x584   : > { %4513 = vmatpush3.msra.mxu0 %v4103_v24  ;;  %4560 = vmatprep.subr.mxu1 %v6319_v41 }
 0x585   : > { %4514 = vmatprep.subr.mxu0 %v6319_v41  ;;  %4561 = vmatpush3.msra.mxu1 %v4118_v55 }
 0x586   : > { %4515 = vmatpush3.msra.mxu0 %v4102_v15  ;;  %4562 = vmatprep.subr.mxu1 %v6319_v41 }
 0x587   : > { %4516 = vmatprep.subr.mxu0 %v6319_v41  ;;  %4563 = vmatpush3.msra.mxu1 %v4117_v8 }
 0x588   : > { %4517 = vmatpush3.msra.mxu0 %v4101_v28  ;;  %4564 = vmatprep.subr.mxu1 %v6319_v41 }
 0x589   : > { %4518 = vmatprep.subr.mxu0 %v6319_v41  ;;  %4565 = vmatpush3.msra.mxu1 %v4116_v0 }
 0x58a   : > { %4519 = vmatpush3.msra.mxu0 %v4100_v37  ;;  %4566 = vmatprep.subr.mxu1 %v6319_v41 }
 0x58b   : > { %4520 = vmatprep.subr.mxu0 %v6319_v41 }
 0x58c   : > { %4521 = vmatpush3.msra.mxu0 %v4099_v46  ;;  %v3753_v46 = vld [vmem:[%s6295_s14 + $0x10] sm:$0xff] }
 0x58d   : > { %4522 = vmatprep.subr.mxu0 %v6319_v41 }
 0x58e   : > { %4523 = vmatpush3.msra.mxu0 %v4098_v2  ;;  %v3752_v2 = vld [vmem:[%s6295_s14 + $0x8] sm:$0xff] }
 0x58f   : > { %4524 = vmatprep.subr.mxu0 %v6319_v41 }
 0x590   : > { %4525 = vmatpush3.msra.mxu0 %v4097_v9  ;;  %v3751_v9 = vld [vmem:[%s6295_s14] sm:$0xff] }
 0x591   : > { %4526 = vmatprep.subr.mxu0 %v6319_v41 }
 0x592   : > { %4527 = vmatpush3.msra.mxu0 %v4096_v25  ;;  %v4130_v25 = vld [vmem:[%s6294_s13] ss:$0 sm:$0xff] }
 0x593   : > { %4528 = vmatprep.subr.mxu0 %v6319_v41 }
 0x594   : > { %4529 = vmatpush3.msra.mxu0 %v4095_v42 }
 0x595   : > { %4533 = vmatprep.subr.mxu0 %v6319_v41 }
 0x62d   : > { %v3315_v54 = vpop.f32.mrf.mxu1 }
 0x62f   : > { %v4490_v32 = vpop.f32.mrf.mxu1 }
 0x631   : > { %v3245_v22 = vpop.f32.mrf.mxu0 }
 0x632   : > { %v3316_v36 = vadd.f32 %v3315_v54, %v3245_v22 }
 0x633   : > { %v4455_v29 = vpop.f32.mrf.mxu0 }
 0x635   : > { %v3390_v60 = vpop.f32.mrf.mxu0 }
 0x636   : > { %4531 = vmatmul.mubr.f32.vlgmr.msra.gmra.mxu0 %v3390_v60 }
 0x637   : > { %4534 = vmatpush3.msra.mxu0 %v5877_v5  ;;  %4537 = vmatprep.mubr.msk.f32.mxu0 %vm4784_vm7, %v6319_v41  ;;  %v4497_v13 = vpop.f32.mrf.mxu0  ;;  %v4115_v5 = vld [vmem:[%s6290_s9 + $0x190] sm:$0xff] }
 0x638   : > { %4535 = vmatprep.subr.mxu0 %v6319_v41  ;;  %4567 = vmatpush3.msra.mxu1 %v4115_v5 }
 0x639   : > { %4536 = vmatpush3.msra.mxu0 %v5879_v58  ;;  %4568 = vmatprep.subr.mxu1 %v6319_v41  ;;  %v4113_v58 = vld [vmem:[%s6290_s9 + $0x180] sm:$0xff] }
 0x63a   : > { %4538 = vmatmul.mubr.msk.f32.vlgmr.msra.gmra.mxu0 %vm2997_vm8, %v4111_v33  ;;  %4575 = vmatprep.subr.mxu0 %v6319_v41 }
 0x63b   : > { %4605 = vmatprep.mubr.msk.f32.mxu0 %vm4784_vm7, %v6319_v41  ;;  %4569 = vmatpush3.msra.mxu1 %v4114_v44 }
 0x63c   : > { %4570 = vmatprep.subr.mxu1 %v6319_v41  ;;  %4576 = vmatpush3.msra.mxu0 %v3668_v14 }
 0x63d   : > { %4571 = vmatpush3.msra.mxu1 %v4113_v58  ;;  %4577 = vmatprep.subr.mxu0 %v6319_v41 }
 0x63e   : > { %4608 = vmatprep.subr.mxu1 %v6319_v41  ;;  %4578 = vmatpush3.msra.mxu0 %v3667_v51 }
 0x63f   : > { %4579 = vmatprep.subr.mxu0 %v6319_v41 }
 0x640   : > { %4580 = vmatpush3.msra.mxu0 %v3666_v12 }
 0x641   : > { %4581 = vmatprep.subr.mxu0 %v6319_v41 }
 0x642   : > { %4582 = vmatpush3.msra.mxu0 %v3665_v23 }
 0x643   : > { %4583 = vmatprep.subr.mxu0 %v6319_v41 }
 0x644   : > { %4584 = vmatpush3.msra.mxu0 %v3664_v31 }
 0x645   : > { %4585 = vmatprep.subr.mxu0 %v6319_v41 }
 0x646   : > { %4586 = vmatpush3.msra.mxu0 %v3663_v10 }
 0x647   : > { %4587 = vmatprep.subr.mxu0 %v6319_v41 }
 0x648   : > { %4588 = vmatpush3.msra.mxu0 %v3662_v62 }
 0x649   : > { %4589 = vmatprep.subr.mxu0 %v6319_v41 }
 0x64a   : > { %4590 = vmatpush3.msra.mxu0 %v3661_v56 }
 0x64b   : > { %4591 = vmatprep.subr.mxu0 %v6319_v41 }
 0x64c   : > { %4592 = vmatpush3.msra.mxu0 %v3660_v20 }
 0x64d   : > { %4593 = vmatprep.subr.mxu0 %v6319_v41 }
 0x64e   : > { %4594 = vmatpush3.msra.mxu0 %v3659_v18 }
 0x64f   : > { %4595 = vmatprep.subr.mxu0 %v6319_v41 }
 0x650   : > { %4596 = vmatpush3.msra.mxu0 %v3658_v47 }
 0x651   : > { %4597 = vmatprep.subr.mxu0 %v6319_v41 }
 0x652   : > { %4598 = vmatpush3.msra.mxu0 %v3657_v48 }
 0x653   : > { %4599 = vmatprep.subr.mxu0 %v6319_v41 }
 0x654   : > { %4600 = vmatpush3.msra.mxu0 %v3656_v50 }
 0x655   : > { %4601 = vmatprep.subr.mxu0 %v6319_v41 }
 0x656   : > { %4602 = vmatpush3.msra.mxu0 %v3655_v43 }
 0x657   : > { %4603 = vmatprep.subr.mxu0 %v6319_v41 }
 0x658   : > { %4604 = vmatpush3.msra.mxu0 %v3654_v63 }
 0x6f6   : > { %v3477_v49 = vpop.f32.mrf.mxu0 }
 0x6f7   : > { %v3481_v53 = vadd.f32 %v3477_v49, %v3316_v36 }
 0x6f8   : > { %v4532_v39 = vpop.f32.mrf.mxu0 }
 0x6fa   : > { %v3553_v16 = vpop.f32.mrf.mxu0 }
 0x6fb   : > { %4573 = vmatmul.mubr.f32.vlgmr.msra.gmra.mxu1 %v3553_v16 }
 0x6fc   : > { %v4539_v30 = vpop.f32.mrf.mxu0  ;;  %4630 = vmatprep.mubr.msk.f32.mxu1 %vm4784_vm7, %v6319_v41  ;;  %4609 = vmatpush3.msk.msra.mxu1 %vm623_vm0, %v3761_v11 }
 0x6fd   : > { %4610 = vmatprep.subr.mxu1 %v6319_v41 }
 0x6fe   : > { %4611 = vmatpush3.msra.mxu1 %v3760_v1 }
 0x6ff   : > { %4612 = vmatprep.subr.mxu1 %v6319_v41 }
 0x700   : > { %4613 = vmatpush3.msra.mxu1 %v3759_v6 }
 0x701   : > { %4614 = vmatprep.subr.mxu1 %v6319_v41 }
 0x702   : > { %4615 = vmatpush3.msra.mxu1 %v3758_v4 }
 0x703   : > { %4616 = vmatprep.subr.mxu1 %v6319_v41 }
 0x704   : > { %4617 = vmatpush3.msra.mxu1 %v3757_v35 }
 0x705   : > { %4618 = vmatprep.subr.mxu1 %v6319_v41 }
 0x706   : > { %4619 = vmatpush3.msra.mxu1 %v3756_v59 }
 0x707   : > { %4620 = vmatprep.subr.mxu1 %v6319_v41 }
 0x708   : > { %4621 = vmatpush3.msra.mxu1 %v3755_v19 }
 0x709   : > { %4622 = vmatprep.subr.mxu1 %v6319_v41 }
 0x70a   : > { %4623 = vmatpush3.msra.mxu1 %v3754_v7 }
 0x70b   : > { %4624 = vmatprep.subr.mxu1 %v6319_v41 }
 0x70c   : > { %4625 = vmatpush3.msra.mxu1 %v3753_v46 }
 0x70d   : > { %4626 = vmatprep.subr.mxu1 %v6319_v41 }
 0x70e   : > { %4627 = vmatpush3.msra.mxu1 %v3752_v2 }
 0x70f   : > { %4628 = vmatprep.subr.mxu1 %v6319_v41 }
 0x710   : > { %4629 = vmatpush3.msra.mxu1 %v3751_v9 }
 0x7bb   : > { %v3640_v61 = vpop.f32.mrf.mxu1 }
 0x7bc   : > { %v3644_v24 = vadd.f32 %v3640_v61, %v3481_v53 }
 0x7bd   : > { %v4574_v15 = vpop.f32.mrf.mxu1 }
 0x7be   : > { %v3652_v28 = vadd.f32 %v4129_v52, %v3644_v24 }
 0x7c0   : > { %v3653_v37 = vmax.f32 %v3652_v28, 0.0 }
 0x7c2   : > { %4606 = vmatmul.mubr.msk.f32.vlgmr.msra.gmra.mxu0 %vm3676_vm9, %v3653_v37 }
 0x882   : > { %v3746_v42 = vpop.f32.mrf.mxu0 }
 0x883   : > { %v3747_v38 = vadd.f32 %v4130_v25, %v3746_v42 }
 0x884   : > { %v4607_v57 = vpop.f32.mrf.mxu0 }
 0x885   : > { %v3750_v45 = vmax.f32 %v3747_v38, 0.0 }
 0x887   : > { %4631 = vmatmul.mubr.msk.f32.vlgmr.msra.gmra.mxu1 %vm3769_vm10, %v3750_v45 }
 0x947   : > { %v3842_v41 = vpop.f32.mrf.mxu1 }
 0x948   : > { %v3843_v40 = vadd.f32 %v4132_v34, %v3842_v41 }
 0x949   : > { %v4632_v27 = vpop.f32.mrf.mxu1 }
 0x94a   : > { %3846 = vst [vmem:[%s529_s23] sm:$0xf] %v3843_v40 }
 0x94b   : > { %4727 = shalt.err (!%p4724_p0)
}
 0x94c   : > { %s4728_s30 = scalar_lea.hbm %s6246_s28, 64  ;;  %s4732_s21 = scalar_lea.hbm %s6297_s16, 128 }
 0x94d   : > { %p4729_p1 = scmp.ne.s32.totalorder %s6246_s28, %s4728_s30  ;;  %p4733_p4 = scmp.lt.s32.totalorder %s6246_s28, %s6297_s16 }
 0x94e   : > { %p4734_p7 = scmp.lt.s32.totalorder %s4732_s21, %s4728_s30 }
 0x94f   : > { %p4730_p2 = pnand %p4729_p1, %p4909_p5 }
 0x950   : > { %p4735_p8 = por %p4734_p7, %p4733_p4 }
 0x951   : > { %p4731_p3 = pneg %p4730_p2 }
 0x953   : > { %p4736_p6 = pnand %p4735_p8, %p4731_p3 }
 0x955   : > { %4739 = shalt.err (!%p4736_p6)
}
 0x956   : > { %4638 = dma.vmem_to_hbm [thread:$0]  (%p4909_p5), %s3862_s24, 64, %s6246_s28, %s3848_s29  }
 0x957 PF: > { %s6320_s26 = sld [smem:[#allocation10_spill]] }
 0x958   : > { %s6321_s5 = sld [smem:[#allocation8_spill]] }
 0x959   : > { %s6322_s27 = sld [smem:[#allocation13_spill]] }
 0x95d   : > { %p4650_p9 = scmp.ge.s32.totalorder %s6320_s26, 2 }
 0x95e   : > { %s3873_s25 = sand.u32 1, %s6321_s5  }
 0x95f   : > { %p6323_p10 = scmp.ne.s32.totalorder %s6322_s27, 0  ;;  %s3874_s19 = scalar_lea.sflag [#allocation4], %s3873_s25 }
 0x961   : > { %p4645_p11 = pnand %p4650_p9, %p6323_p10 }
 0x963   : > { %p4646_p12 = pneg %p4645_p11 }
 0x965   : > { %4761 = dma.done.wait (%p4646_p12), %s3874_s19, 64  }
 0x966   : > { %4763 = vsyncadd (%p4646_p12), %s3874_s19, 4294967232  ;;  %s6324_s24 = sld [smem:[#allocation11_spill]]  ;;  %s6327_s21 = smov %s4770_s22 }
 0x967   : > { %s6325_s30 = sld [smem:[#allocation9_spill]] }
 0x968   : > { %s6326_s23 = sld [smem:[#allocation12_spill]] }
 0x96c   : > { %p27_p13 = scmp.ge.s32.totalorder %s6324_s24, 4  }
 0x96d   : > { %s6328_s22 = smov %s6325_s30 }
 0x96e   :  { %29 = sbr.rel (!%p27_p13) target bundleno = 7 (0x7), region = 138 }
 0x973   :  { %3879 = vsyncpa [#allocation3], 1 }
 0x974   :  { %3881 = vsyncpa [#allocation3 + $0x1], 1 }
 0x975   :  { %3882 = vsyncpa [#allocation4], 1 }
 0x976   :  { %3884 = vsyncpa [#allocation4 + $0x1], 1 }

</bundles_post_ra>
